<compile_context>
chip_gen: v5e
topology: v5e:2x2
jax: 0.10.0
libtpu: 0.0.40
codegen_flags: <defaults>
</compile_context>

<pallas_src>
import functools

import jax
import jax.numpy as jnp
from jax.experimental import pallas as pl
from jax.experimental.pallas import tpu as pltpu


def encoder_meanpool_kernel(x_ref, w_ref, b_ref, mask_ref, out_ref, den_ref, *, bf16_tail):
    """One (batch-tile, seq-tile) grid step.

    x_ref:    (B_t, S_t, H) bf16 token input embeddings
    w_ref:    (H, H)        bf16 dense weight (VMEM-resident, constant index_map)
    b_ref:    (1, H)        f32  dense bias   (VMEM-resident)
    mask_ref: (B_t, 1, S_t) bf16 attention mask (0/1), seq axis on lanes
    out_ref:  (B_t, H)      f32  sentence embeddings (VMEM-resident across seq axis)
    den_ref:  (B_t, 1)      f32  mask-count accumulator scratch
    """
    s = pl.program_id(1)

    @pl.when(s == 0)
    def _init():
        out_ref[...] = jnp.zeros_like(out_ref)
        den_ref[...] = jnp.zeros_like(den_ref)

    b_t, s_t, h = x_ref.shape

    # Synthetic "AutoModel" token embeddings: one dense + tanh.
    # Collapse (B_t, S_t) -> M = B_t*S_t so the MXU sees one large matmul (layout no-op
    # since S_t is a multiple of the bf16 sublane packing).
    x2 = x_ref[...].reshape(b_t * s_t, h)                               # (M, H) bf16
    tok = jnp.dot(x2, w_ref[...], preferred_element_type=jnp.float32)   # (M, H) f32
    b_row = b_ref[...]                                                  # (1, H) f32, hoisted
    if bf16_tail:
        # v6e / v7x: bf16 VPU+EUP -> halve elementwise/transcendental work.
        tok = jnp.tanh((tok + b_row).astype(jnp.bfloat16))              # (M, H) bf16
    else:
        # v5e and older: no bf16 VPU/EUP; compute tail in f32, cast only for the MXU.
        tok = jnp.tanh(tok + b_row).astype(jnp.bfloat16)                # (M, H) bf16
    tok = tok.reshape(b_t, s_t, h)                                      # (B_t, S_t, H)

    # Masked partial sum over this sequence tile, contracted on the MXU (huge slack):
    #   (B_t, 1, S_t) x (B_t, S_t, H) -> (B_t, 1, H), f32 accumulation.
    mask = mask_ref[...]                                                # (B_t, 1, S_t) bf16
    part = jnp.einsum("bqs,bsh->bqh", mask, tok,
                      preferred_element_type=jnp.float32)               # (B_t, 1, H) f32
    out_ref[...] += part[:, 0, :]                                       # accumulate in-place
    den_ref[...] += jnp.sum(mask.astype(jnp.float32), axis=2)           # (B_t, 1), exact (0/1)

    @pl.when(s == pl.num_programs(1) - 1)
    def _finalize():
        # torch.clamp(mask_sum, min=1e-9) reciprocal on the (otherwise idle) EUP.
        inv = pl.reciprocal(jnp.maximum(den_ref[...], 1e-9), approx=True)  # (B_t, 1)
        out_ref[...] = out_ref[...] * inv


def mean_pool_encode(x_emb, w, b, attention_mask, *, b_tile=8, s_tile=512):
    """sentence_embeddings = mean_pooling(tanh(x_emb @ w + b), attention_mask)."""
    B, S, H = x_emb.shape
    b_tile = min(b_tile, B)
    s_tile = min(s_tile, S)
    assert B % b_tile == 0 and S % s_tile == 0, "shapes must tile evenly"
    assert b_tile % 8 == 0 and s_tile % 16 == 0, "keep reshapes layout no-ops"

    # bf16 MXU inputs; avoid re-materializing the activation if it is already bf16.
    x_bf16 = x_emb if x_emb.dtype == jnp.bfloat16 else x_emb.astype(jnp.bfloat16)
    w_bf16 = w.astype(jnp.bfloat16)
    b_f32 = b.astype(jnp.float32).reshape(1, H)
    # (B, S) -> (B, 1, S): free reshape, keeps the seq axis on lanes inside the kernel.
    mask_bf16 = attention_mask.astype(jnp.bfloat16).reshape(B, 1, S)

    # bf16 elementwise tail only on generations with a bf16 VPU/EUP (v6e, v7x).
    kind = jax.devices()[0].device_kind.lower()
    bf16_tail = not any(tag in kind for tag in ("v2", "v3", "v4", "v5"))

    # Scoped-VMEM budget: 2x double-buffered bf16 x block + f32 tok temp + weights,
    # with headroom; capped well below v7x's 64 MiB physical VMEM per core.
    x_block_bytes = b_tile * s_tile * H * 2
    tok_bytes = b_tile * s_tile * H * 4
    w_bytes = 2 * H * H * 2
    est = 2 * x_block_bytes + tok_bytes + w_bytes + (1 << 20)
    vmem_limit = int(min(max(2 * est, 32 << 20), 48 << 20))

    grid = (B // b_tile, S // s_tile)  # (batch: parallel, sequence: reduction, last)

    kernel = functools.partial(encoder_meanpool_kernel, bf16_tail=bf16_tail)

    return pl.pallas_call(
        kernel,
        out_shape=jax.ShapeDtypeStruct((B, H), jnp.float32),
        grid_spec=pltpu.PrefetchScalarGridSpec(
            num_scalar_prefetch=0,
            grid=grid,
            in_specs=[
                pl.BlockSpec((b_tile, s_tile, H), lambda bi, si: (bi, si, 0)),
                pl.BlockSpec((H, H), lambda bi, si: (0, 0)),          # weight: resident
                pl.BlockSpec((1, H), lambda bi, si: (0, 0)),          # bias:   resident
                pl.BlockSpec((b_tile, 1, s_tile), lambda bi, si: (bi, 0, si)),
            ],
            out_specs=pl.BlockSpec((b_tile, H), lambda bi, si: (bi, 0)),
            scratch_shapes=[pltpu.VMEM((b_tile, 1), jnp.float32)],
        ),
        compiler_params=pltpu.CompilerParams(
            dimension_semantics=("parallel", "arbitrary"),
            vmem_limit_bytes=vmem_limit,
        ),
    )(x_bf16, w_bf16, b_f32, mask_bf16)


def reference(x_emb, w, b, attention_mask):
    # Matching input precision (bf16-rounded activations/weights), f32 math.
    x = x_emb.astype(jnp.bfloat16).astype(jnp.float32)
    wf = w.astype(jnp.bfloat16).astype(jnp.float32)
    tok = jnp.tanh(jnp.einsum("bsh,hd->bsd", x, wf) + b.reshape(1, 1, -1))
    m = attention_mask.astype(jnp.float32)[:, :, None]
    return jnp.sum(tok * m, axis=1) / jnp.maximum(jnp.sum(m, axis=1), 1e-9)


if __name__ == "__main__":
    B, S, H, VOCAB = 16, 512, 128, 64
    B_TILE, S_TILE = 8, 256  # grid (2, 2): exercises both megacore axis and the reduction

    key = jax.random.PRNGKey(0)
    k_emb, k_w, k_b, k_ids = jax.random.split(key, 4)

    # Deterministic synthetic parameters. Embedding table stored in bf16 so jnp.take
    # emits bf16 directly (no f32 activation round-trip through HBM).
    embed_table = (jax.random.normal(k_emb, (VOCAB, H), dtype=jnp.float32) * 0.02
                   ).astype(jnp.bfloat16)
    w = jax.random.normal(k_w, (H, H), dtype=jnp.float32) * (1.0 / jnp.sqrt(H))
    b = jax.random.normal(k_b, (1, H), dtype=jnp.float32) * 0.01

    # Inputs: token ids and a deterministic ragged attention mask (includes padding).
    input_ids = jax.random.randint(k_ids, (B, S), 0, VOCAB, dtype=jnp.int32)
    lengths = (jnp.arange(B, dtype=jnp.int32) + 1) * (S // B)          # 32, 64, ..., 512
    attention_mask = (jnp.arange(S)[None, :] < lengths[:, None]).astype(jnp.float32)

    # Glue: embedding lookup stays in plain JAX (bf16 output).
    x_emb = jnp.take(embed_table, input_ids, axis=0)                   # (B, S, H) bf16

    out = mean_pool_encode(x_emb, w, b, attention_mask, b_tile=B_TILE, s_tile=S_TILE)
    out = jax.block_until_ready(out)

    ref = reference(x_emb, w, b, attention_mask)
    assert out.shape == (B, H)
    assert bool(jnp.allclose(out, ref, atol=1e-2, rtol=1e-2)), "mismatch vs reference"

    print("KERNEL_OK")
</pallas_src>

<mosaic_0001>
module attributes {stable_mosaic.version = 11 : i64} {
  func.func @encoder_meanpool_kernel(%arg0: i32, %arg1: i32, %arg2: memref<8x256x128xbf16, #tpu.memory_space<vmem>>, %arg3: memref<128x128xbf16, #tpu.memory_space<vmem>>, %arg4: memref<1x128xf32, #tpu.memory_space<vmem>>, %arg5: memref<8x1x256xbf16, #tpu.memory_space<vmem>>, %arg6: memref<8x128xf32, #tpu.memory_space<vmem>>, %arg7: memref<8x1xf32, #tpu.memory_space<vmem>>) attributes {dimension_semantics = [#tpu.dimension_semantics<parallel>, #tpu.dimension_semantics<arbitrary>], iteration_bounds = array<i64: 2, 2>, scalar_prefetch = 0 : i64, scratch_operands = 1 : i64, tpu.core_type = #tpu.core_type<tc>, window_params = [{transform_indices = @transform_0, window_bounds = array<i64: 8, 256, 128>}, {pipeline_mode = #tpu.pipeline_mode<synchronous>, transform_indices = @transform_1, window_bounds = array<i64: 128, 128>}, {pipeline_mode = #tpu.pipeline_mode<synchronous>, transform_indices = @transform_2, window_bounds = array<i64: 1, 128>}, {transform_indices = @transform_3, window_bounds = array<i64: 8, 1, 256>}, {transform_indices = @transform_4, window_bounds = array<i64: 8, 128>}]} {
    %c0_i32 = arith.constant 0 : i32
    %0 = arith.cmpi eq, %arg1, %c0_i32 : i32
    %1 = arith.extui %0 : i1 to i32
    %c0_i32_0 = arith.constant 0 : i32
    %2 = arith.cmpi ne, %1, %c0_i32_0 : i32
    scf.if %2 {
      %cst_21 = arith.constant 0.000000e+00 : f32
      %27 = vector.broadcast %cst_21 : f32 to vector<8x128xf32>
      %c0_22 = arith.constant 0 : index
      %c0_23 = arith.constant 0 : index
      %28 = vector.load %arg6[%c0_22, %c0_23] : memref<8x128xf32, #tpu.memory_space<vmem>>, vector<8x128xf32>
      tpu.vector_store %arg6[%c0_22, %c0_23], %27 {strides = array<i32>} : memref<8x128xf32, #tpu.memory_space<vmem>>, vector<8x128xf32>,
      %cst_24 = arith.constant 0.000000e+00 : f32
      %29 = vector.broadcast %cst_24 : f32 to vector<8x1xf32>
      %c0_25 = arith.constant 0 : index
      %c0_26 = arith.constant 0 : index
      %30 = vector.load %arg7[%c0_25, %c0_26] : memref<8x1xf32, #tpu.memory_space<vmem>>, vector<8x1xf32>
      tpu.vector_store %arg7[%c0_25, %c0_26], %29 {strides = array<i32>} : memref<8x1xf32, #tpu.memory_space<vmem>>, vector<8x1xf32>,
    } else {
    }
    %c0 = arith.constant 0 : index
    %c0_1 = arith.constant 0 : index
    %c0_2 = arith.constant 0 : index
    %3 = vector.load %arg2[%c0, %c0_1, %c0_2] : memref<8x256x128xbf16, #tpu.memory_space<vmem>>, vector<8x256x128xbf16>
    %4 = vector.shape_cast %3 : vector<8x256x128xbf16> to vector<2048x128xbf16>
    %c0_3 = arith.constant 0 : index
    %c0_4 = arith.constant 0 : index
    %5 = vector.load %arg3[%c0_3, %c0_4] : memref<128x128xbf16, #tpu.memory_space<vmem>>, vector<128x128xbf16>
    %cst = arith.constant dense<0.000000e+00> : vector<2048x128xf32>
    %6 = tpu.matmul %4, %5, %cst {dimension_numbers = #tpu.dot_dimension_numbers<[1], [0], [0], [1], [0, 0, 1, 1], [], []>} : vector<2048x128xbf16>, vector<128x128xbf16>, vector<2048x128xf32> -> vector<2048x128xf32>
    %c0_5 = arith.constant 0 : index
    %c0_6 = arith.constant 0 : index
    %7 = vector.load %arg4[%c0_5, %c0_6] : memref<1x128xf32, #tpu.memory_space<vmem>>, vector<1x128xf32>
    %8 = vector.broadcast %7 : vector<1x128xf32> to vector<2048x128xf32>
    %9 = arith.addf %6, %8 : vector<2048x128xf32>
    %10 = arith.truncf %9 : vector<2048x128xf32> to vector<2048x128xbf16>
    %11 = math.tanh %10 : vector<2048x128xbf16>
    %12 = vector.shape_cast %11 : vector<2048x128xbf16> to vector<8x256x128xbf16>
    %c0_7 = arith.constant 0 : index
    %c0_8 = arith.constant 0 : index
    %c0_9 = arith.constant 0 : index
    %13 = vector.load %arg5[%c0_7, %c0_8, %c0_9] : memref<8x1x256xbf16, #tpu.memory_space<vmem>>, vector<8x1x256xbf16>
    "tpu.trace_start"() <{level = 10 : i32, message = "bqs,bsh->bqh"}> : () -> ()
    %cst_10 = arith.constant dense<0.000000e+00> : vector<8x1x128xf32>
    %14 = tpu.matmul %13, %12, %cst_10 {dimension_numbers = #tpu.dot_dimension_numbers<[2], [1], [1], [2], [0, 0, 0, 1, 1, 2], [0], [0]>} : vector<8x1x256xbf16>, vector<8x256x128xbf16>, vector<8x1x128xf32> -> vector<8x1x128xf32>
    "tpu.trace_stop"() : () -> ()
    %c0_11 = arith.constant 0 : index
    %c0_12 = arith.constant 0 : index
    %15 = vector.load %arg6[%c0_11, %c0_12] : memref<8x128xf32, #tpu.memory_space<vmem>>, vector<8x128xf32>
    %16 = vector.shape_cast %14 : vector<8x1x128xf32> to vector<8x128xf32>
    %17 = arith.addf %15, %16 : vector<8x128xf32>
    %c0_13 = arith.constant 0 : index
    %c0_14 = arith.constant 0 : index
    %18 = vector.load %arg6[%c0_13, %c0_14] : memref<8x128xf32, #tpu.memory_space<vmem>>, vector<8x128xf32>
    tpu.vector_store %arg6[%c0_13, %c0_14], %17 {strides = array<i32>} : memref<8x128xf32, #tpu.memory_space<vmem>>, vector<8x128xf32>,
    %c0_15 = arith.constant 0 : index
    %c0_16 = arith.constant 0 : index
    %19 = vector.load %arg7[%c0_15, %c0_16] : memref<8x1xf32, #tpu.memory_space<vmem>>, vector<8x1xf32>
    %20 = arith.extf %13 : vector<8x1x256xbf16> to vector<8x1x256xf32>
    %cst_17 = arith.constant dense<0.000000e+00> : vector<8x1xf32>
    %21 = vector.multi_reduction <add>, %20, %cst_17 [2] : vector<8x1x256xf32> to vector<8x1xf32>
    %22 = arith.addf %19, %21 : vector<8x1xf32>
    %c0_18 = arith.constant 0 : index
    %c0_19 = arith.constant 0 : index
    %23 = vector.load %arg7[%c0_18, %c0_19] : memref<8x1xf32, #tpu.memory_space<vmem>>, vector<8x1xf32>
    tpu.vector_store %arg7[%c0_18, %c0_19], %22 {strides = array<i32>} : memref<8x1xf32, #tpu.memory_space<vmem>>, vector<8x1xf32>,
    %c1_i32 = arith.constant 1 : i32
    %24 = arith.cmpi eq, %arg1, %c1_i32 : i32
    %25 = arith.extui %24 : i1 to i32
    %c0_i32_20 = arith.constant 0 : i32
    %26 = arith.cmpi ne, %25, %c0_i32_20 : i32
    scf.if %26 {
      %c0_21 = arith.constant 0 : index
      %c0_22 = arith.constant 0 : index
      %27 = vector.load %arg7[%c0_21, %c0_22] : memref<8x1xf32, #tpu.memory_space<vmem>>, vector<8x1xf32>
      %cst_23 = arith.constant 9.99999971E-10 : f32
      %28 = vector.broadcast %cst_23 : f32 to vector<8x1xf32>
      %29 = arith.maximumf %27, %28 : vector<8x1xf32>
      %30 = tpu.reciprocal %29 {approx = true} : vector<8x1xf32> -> vector<8x1xf32>
      %c0_24 = arith.constant 0 : index
      %c0_25 = arith.constant 0 : index
      %31 = vector.load %arg6[%c0_24, %c0_25] : memref<8x128xf32, #tpu.memory_space<vmem>>, vector<8x128xf32>
      %32 = vector.broadcast %30 : vector<8x1xf32> to vector<8x128xf32>
      %33 = arith.mulf %31, %32 : vector<8x128xf32>
      %c0_26 = arith.constant 0 : index
      %c0_27 = arith.constant 0 : index
      %34 = vector.load %arg6[%c0_26, %c0_27] : memref<8x128xf32, #tpu.memory_space<vmem>>, vector<8x128xf32>
      tpu.vector_store %arg6[%c0_26, %c0_27], %33 {strides = array<i32>} : memref<8x128xf32, #tpu.memory_space<vmem>>, vector<8x128xf32>,
    } else {
    }
    return
  }
  func.func @transform_0(%arg0: i32, %arg1: i32) -> (i32, i32, i32) {
    %c0_i32 = arith.constant 0 : i32
    %c0_i32_0 = arith.constant 0 : i32
    return %arg0, %arg1, %c0_i32 : i32, i32, i32
  }
  func.func @transform_1(%arg0: i32, %arg1: i32) -> (i32, i32) {
    %c0_i32 = arith.constant 0 : i32
    %c0_i32_0 = arith.constant 0 : i32
    %c0_i32_1 = arith.constant 0 : i32
    return %c0_i32, %c0_i32_0 : i32, i32
  }
  func.func @transform_2(%arg0: i32, %arg1: i32) -> (i32, i32) {
    %c0_i32 = arith.constant 0 : i32
    %c0_i32_0 = arith.constant 0 : i32
    %c0_i32_1 = arith.constant 0 : i32
    return %c0_i32, %c0_i32_0 : i32, i32
  }
  func.func @transform_3(%arg0: i32, %arg1: i32) -> (i32, i32, i32) {
    %c0_i32 = arith.constant 0 : i32
    %c0_i32_0 = arith.constant 0 : i32
    return %arg0, %c0_i32, %arg1 : i32, i32, i32
  }
  func.func @transform_4(%arg0: i32, %arg1: i32) -> (i32, i32) {
    %c0_i32 = arith.constant 0 : i32
    %c0_i32_0 = arith.constant 0 : i32
    return %arg0, %c0_i32 : i32, i32
  }
}

</mosaic_0001>

<bundles_post_ra>
// kernel: tpu_custom_call.1
= control target key start
LH: loop header
LB: loop body
LE: loop exit
PB: predicated region body
PF: predicated region fallthrough
CT: control target
= control target key end

     0   :  { %s8124_s0 = inlined_call_operand.hbm [shape: bf16[16,512,128], index: 0, kind: input, shape index: {}]   ;;  %s8125_s1 = inlined_call_operand.hbm [shape: bf16[128,128], index: 1, kind: input, shape index: {}]   ;;  %s8126_s2 = inlined_call_operand.hbm [shape: f32[1,128], index: 2, kind: input, shape index: {}]   ;;  %s8127_s3 = inlined_call_operand.vmem [shape: bf16[16,1,512], index: 3, kind: input, shape index: {}]   ;;  %s8128_s4 = inlined_call_operand.hbm [shape: f32[16,128], index: 4, kind: output, shape index: {}]  }
   0x1   :  { %8182 = sst [smem:[#allocation131_spill]] %s8124_s0 }
   0x2   :  { %8183 = sst [smem:[#allocation132_spill]] %s8125_s1 }
   0x3   :  { %8184 = sst [smem:[#allocation133_spill]] %s8126_s2 }
   0x4   :  { %9 = vsyncpa [#allocation4], 0 }
   0x5   :  { %11 = vsyncpa [#allocation4 + $0x1], 0 }
   0x6   :  { %12 = vsyncpa [#allocation7], 0 }
   0x7   :  { %13 = vsyncpa [#allocation5], 0 }
   0x8   :  { %15 = vsyncpa [#allocation5 + $0x1], 0  ;;  %s6113_s15 = smov 0   ;;  %s6115_s16 = smov 0  }
   0x9   :  { %s6117_s17 = smov 0   ;;  %s6119_s18 = smov 0  }
   0xa   :  { %s6121_s19 = smov 0   ;;  %s6123_s20 = smov 0  }
   0xb   :  { %s6125_s21 = smov 0   ;;  %s6127_s22 = smov 0  }
   0xc   :  { %s6129_s23 = smov 0   ;;  %s6131_s24 = smov 0  }
   0xd   :  { %s6133_s25 = smov 0  }
   0xe LB: > { %8185 = sst [smem:[#allocation17_spill]] %s6042_s17  ;;  %s4498_s26 = sadd.s32 4294967295, %s6074_s25   ;;  %s6074_s25 = sphi %s6133_s25, %s21_s25   ;;  %s6070_s24 = sphi %s6131_s24, %s8587_s24   ;;  %s6066_s23 = sphi %s6129_s23, %s8586_s23   ;;  %s6062_s22 = sphi %s6127_s22, %s8585_s22   ;;  %s6058_s21 = sphi %s6125_s21, %s8584_s21   ;;  %s6054_s20 = sphi %s6123_s20, %s8577_s20   ;;  %s6050_s19 = sphi %s6121_s19, %s8583_s19   ;;  %s6046_s18 = sphi %s6119_s18, %s8582_s18   ;;  %s6042_s17 = sphi %s6117_s17, %s8575_s17   ;;  %s6038_s16 = sphi %s6115_s16, %s8581_s16   ;;  %s6034_s15 = sphi %s6113_s15, %s8580_s15  }
   0xf   : > { %8186 = sst [smem:[#allocation18_spill]] %s6054_s20  ;;  %s4499_s27 = sadd.s32 4294967294, %s6074_s25  }
  0x10   : > { %s30_s28 = sadd.s32 1, %s6066_s23  ;;  %s33_s29 = sadd.s32 1, %s6070_s24 }
  0x11   : > { %p31_p0 = scmp.ge.s32.totalorder %s30_s28, 2  ;;  %s42_s30 = sadd.s32 1, %s6054_s20 }
  0x12   : > { %p49_p1 = scmp.ne.s32.totalorder %s6054_s20, %s6050_s19  ;;  %p50_p2 = scmp.eq.s32.totalorder %s6074_s25, 0 }
  0x13   : > { %s8589_s28 = smov (%p31_p0, %s30_s28), 0  ;;  %s8591_s29 = smov (!%p31_p0, %s33_s29), %s6070_s24 }
  0x14   : > { %8187 = sst [smem:[#allocation19_spill]] %s8589_s28  ;;  %s38_s5 = ssub.s32 %s6066_s23, %s8589_s28 }
  0x15   : > { %p6179_p3 = por %p50_p2, %p49_p1  ;;  %p35_p4 = scmp.ge.s32.totalorder %s8591_s29, 2 }
  0x16   : > { %p55_p5 = scmp.ne.s32.totalorder %s6050_s19, %s6046_s18  ;;  %p6184_p6 = scmp.eq.s32.totalorder %s4498_s26, 0 }
  0x17   : > { %s138_s8 = sadd.s32 1, %s6042_s17  ;;  %s8593_s29 = smov (%p35_p4, %s8591_s29), 0 }
  0x18   : > { %8190 = sst [smem:[#allocation20_spill]] %s8593_s29  ;;  %p6193_p7 = por %p6184_p6, %p55_p5 }
  0x19   : > { %p148_p8 = scmp.ne.s32.totalorder %s6042_s17, %s6038_s16  ;;  %s37_s10 = ssub.s32 %s6070_s24, %s8593_s29 }
  0x1a   : > { %p149_p9 = scmp.eq.s32.totalorder %s4498_s26, 3  ;;  %s39_s11 = sor.u32 %s38_s5, %s37_s10 }
  0x1b   : > { %p136_p10 = scmp.eq.s32.totalorder %s37_s10, 0  ;;  %p40_p11 = scmp.eq.s32.totalorder %s39_s11, 0 }
  0x1c   : > { %p6201_p12 = por %p149_p9, %p148_p8  ;;  %p154_p13 = scmp.ne.s32.totalorder %s6038_s16, %s6034_s15 }
  0x1d   : > { %s6206_s13 = scalar_select %p136_p10, %s6042_s17, %s138_s8  }
  0x1e   : > { %s6209_s14 = scalar_select %p40_p11, %s6054_s20, %s42_s30  }
  0x1f   : > { %8193 = sst [smem:[#allocation21_spill]] %s6206_s13  ;;  %p155_p0 = scmp.eq.s32.totalorder %s4499_s27, 3 }
  0x20   : > { %8194 = sst [smem:[#allocation22_spill]] %s6209_s14  ;;  %p4500_p1 = scmp.ge.s32.totalorder %s6074_s25, 1 }
  0x21   : > { %p162_p2 = scmp.lt.s32.totalorder %s6074_s25, 5  ;;  %p6215_p4 = por %p155_p0, %p154_p13 }
  0x22   : > { %s8197_s1 = sld [smem:[#allocation132_spill]]  ;;  %s6076_s30 = smov [#allocation6]  }
  0x23   : > { %p6219_p5 = pnand %p4500_p1, %p162_p2  ;;  %s175_s27 = sshll.u32 %s6076_s30, 4  ;;  %s176_s27 = int_to_ptr.vmem [resolvable:$true] %s175_s27 }
  0x24   : > { %s8198_s2 = sld [smem:[#allocation133_spill]]  ;;  %s6077_s14 = smov 64  }
  0x25   : > { %p5252_p8 = pneg %p6219_p5  ;;  %s6078_s13 = smov 4  }
  0x26   : > { %s6079_s17 = smov [#allocation8]   ;;  %p4503_p10 = scmp.ge.s32.totalorder %s6074_s25, 4 }
  0x27   : > { %p5253_p9 = pnand %p5252_p8, %p6184_p6  ;;  %s190_s5 = sshll.u32 %s6079_s17, 4  ;;  %s191_s5 = int_to_ptr.vmem [resolvable:$true] %s190_s5 }
  0x28   : > { %s173_s8 = sshll.u32 %s8197_s1, 4  ;;  %197 = sbr.rel (%p4503_p10) target bundleno = 74 (0x4a), region = 24  ;;  %s174_s8 = int_to_ptr.hbm [resolvable:$true] %s173_s8 }
  0x29   : > { %5255 = dma.hbm_to_vmem [thread:$0]  (!%p5253_p9), %s174_s8, 1024, %s176_s27, [#allocation7], %s6077_s14, %s6077_s14, %s6078_s13  }
  0x2a   : > { %s188_s28 = sshll.u32 %s8198_s2, 4  ;;  %s189_s28 = int_to_ptr.hbm [resolvable:$true] %s188_s28 }
  0x2b   : > { %5258 = dma.hbm_to_vmem [thread:$0]  (!%p5253_p9), %s189_s28, 16, %s191_s5, [#allocation7]  }
  0x2d   : > { %s6235_s10 = sand.u32 1, %s6054_s20   ;;  %s4506_s29 = sshll.u32 %s6066_s23, 5 }
  0x2e   : > { %s4504_s30 = sshll.u32 %s6235_s10, 10  ;;  %s5071_s13 = sshll.u32 %s6070_s24, 9 }
  0x2f   : > { %s211_s14 = sadd.s32 %s5071_s13, %s4506_s29  ;;  %s205_s28 = scalar_lea.vmem [#allocation3], %s4504_s30 }
  0x30   : > { %s4508_s17 = sshll.u32 %s211_s14, 2  ;;  %s228_s8 = sshll.u32 %s205_s28, 4  ;;  %s229_s8 = int_to_ptr.vmem [resolvable:$true] %s228_s8 }
  0x31   : > { %s8199_s0 = sld [smem:[#allocation131_spill]]  ;;  %s6080_s2 = smov 4096  }
  0x32   : > { %s5237_s1 = scalar_select %p6179_p3, [#allocation0], [#allocation13] }
  0x33   : > { %5238 = sst [smem:[#allocation12]] (%p6179_p3), %s6080_s2  ;;  %s6081_s13 = smov 2048  }
  0x34   : > { %s218_s20 = sld [smem:[%s5237_s1]]   ;;  %s6082_s30 = smov 32  }
  0x35   : > { %5239 = sst [smem:[#allocation12 + $0x1]] (%p6179_p3), %s6081_s13  ;;  %s6083_s14 = smov 64  }
  0x36   : > { %5240 = sst [smem:[#allocation12 + $0x2]] (%p6179_p3), %s6082_s30  ;;  %s6084_s28 = smov 4  }
  0x37   : > { %s213_s5 = scalar_lea.hbm %s8199_s0, %s4508_s17  ;;  %5241 = sst [smem:[#allocation12 + $0x3]] (%p6179_p3), %s6083_s14 }
  0x38   : > { %s226_s29 = sshll.u32 %s213_s5, 4  ;;  %5242 = sst [smem:[#allocation12 + $0x4]] (%p6179_p3), %s6083_s14  ;;  %s227_s29 = int_to_ptr.hbm [resolvable:$true] %s226_s29 }
  0x39   : > { %5243 = sst [smem:[#allocation12 + $0x5]] (%p6179_p3), %s6084_s28  ;;  %s202_s1 = scalar_lea.sflag [#allocation4], %s6235_s10 }
  0x3a   : > { %s4509_s17 = sshll.u32 %s218_s20, 26  ;;  %s6085_s27 = smov [#allocation11]  }
  0x3b   : > { %s4510_s2 = sadd.s32 134217728, %s4509_s17  ;;  %250 = sbr.rel (!%p6179_p3) target bundleno = 74 (0x4a), region = 32 }
  0x3c   : > { %5244 = dma.general (%p6179_p3), %s227_s29, 16384, %s229_s8, %s202_s1, %s6085_s27, [#allocation12], %s4510_s2, 0  }
  0x3d   : > { %s4511_s11 = sshll.u32 (%p6179_p3), %s6235_s10, 4  ;;  %s4513_s5 = sshll.u32 (%p6179_p3), %s6066_s23, 1 }
  0x3e   : > { %s5072_s13 = sshll.u32 (%p6179_p3), %s6070_s24, 5  ;;  %s254_s17 = scalar_lea.vmem (%p6179_p3), [#allocation9], %s4511_s11 }
  0x3f   : > { %s258_s30 = sadd.s32 (%p6179_p3), %s5072_s13, %s4513_s5 }
  0x40   : > { %s259_s0 = scalar_lea.vmem %s8127_s3, %s258_s30 }
  0x41   : > { %v276_v0 = vld [vmem:[%s259_s0] sm:$0x3]  ;;  %v278_v1 = vld [vmem:[%s259_s0 + $0x4] sm:$0x3]  ;;  %v280_v2 = vld [vmem:[%s259_s0 + $0x8] sm:$0x3] }
  0x42   : > { %277 = vst [vmem:[%s254_s17] sm:$0x3] %v276_v0  ;;  %v282_v3 = vld [vmem:[%s259_s0 + $0xc] sm:$0x3]  ;;  %v284_v4 = vld [vmem:[%s259_s0 + $0x10] sm:$0x3] }
  0x43   : > { %279 = vst [vmem:[%s254_s17 + $0x2] sm:$0x3] %v278_v1  ;;  %v286_v5 = vld [vmem:[%s259_s0 + $0x14] sm:$0x3]  ;;  %v288_v6 = vld [vmem:[%s259_s0 + $0x18] sm:$0x3] }
  0x44   : > { %281 = vst [vmem:[%s254_s17 + $0x4] sm:$0x3] %v280_v2  ;;  %v290_v7 = vld [vmem:[%s259_s0 + $0x1c] sm:$0x3] }
  0x45   : > { %283 = vst [vmem:[%s254_s17 + $0x6] sm:$0x3] %v282_v3 }
  0x46   : > { %285 = vst [vmem:[%s254_s17 + $0x8] sm:$0x3] %v284_v4 }
  0x47   : > { %287 = vst [vmem:[%s254_s17 + $0xa] sm:$0x3] %v286_v5 }
  0x48   : > { %289 = vst [vmem:[%s254_s17 + $0xc] sm:$0x3] %v288_v6 }
  0x49   : > { %291 = vst [vmem:[%s254_s17 + $0xe] sm:$0x3] %v290_v7 }
  0x4a PF: > { %334 = sbr.rel (%p6219_p5) target bundleno = 1376 (0x560), region = 73 }
  0x4f   : > { %s336_s6 = sand.u32 1, %s6050_s19  }
  0x50   : > { %s4516_s10 = sshll.u32 %s336_s6, 10  ;;  %s337_s8 = scalar_lea.sflag [#allocation4], %s336_s6 }
  0x51   : > { %s6271_s29 = scalar_lea.vmem [#allocation3], %s4516_s10 }
  0x52   : > { %6021 = dma.done.wait (%p6193_p7), %s337_s8, 16384  }
  0x53   : > { %6023 = vsyncadd (%p6193_p7), %s337_s8, 4294950912 }
  0x54   : > { %6025 = dma.done.wait (%p6184_p6), [#allocation7], 1040  }
  0x55   : > { %6027 = vsyncadd (%p6184_p6), [#allocation7], 4294966256  ;;  %s4519_s0 = sshll.u32 %s336_s6, 4  ;;  %s384_s26 = sand.u32 1, %s6038_s16  }
  0x56   : > { %s4520_s28 = sshll.u32 %s384_s26, 3  ;;  %s6284_s2 = scalar_lea.vmem [#allocation9], %s4519_s0 }
  0x57   : > { %s6286_s1 = scalar_lea.vmem [#allocation10], %s4520_s28  ;;  %p4521_p3 = scmp.ne.s32.totalorder %s6058_s21, 0 }
  0x59   : > { %394 = sbr.rel (%p4521_p3) target bundleno = 97 (0x61), region = 93 }
  0x5e   : > { %vm396_vm0 = vcmask 7168   ;;  %v6086_v8 = vmov 0.0  }
  0x5f   : > { %395 = vst [vmem:[%s6286_s1] sm:$0xff] %v6086_v8 }
  0x60   : > { %397 = vst.msk [vmem:[#allocation2] sm:$0xff] %vm396_vm0, %v6086_v8 }
  0x61 PF: > { %v5208_v9 = vld [vmem:[#allocation6 + $0x38] sm:$0xff]  ;;  %v5207_v10 = vld [vmem:[#allocation6 + $0x30] sm:$0xff]  ;;  %v5206_v11 = vld [vmem:[#allocation6 + $0x28] sm:$0xff]  ;;  %vm4277_vm1 = vcmask 1040384   ;;  %vm4205_vm2 = vcmask 1041409   ;;  %vm4208_vm3 = vcmask 1042434  }
  0x62   : > { %1490 = vmatpush.bf16.msra.mxu0 %v5208_v9  ;;  %5211 = vmatpush.bf16.msra.mxu3 %v5208_v9  ;;  %v5205_v12 = vld [vmem:[#allocation6 + $0x20] sm:$0xff]  ;;  %v5204_v13 = vld [vmem:[#allocation6 + $0x18] sm:$0xff]  ;;  %v5203_v14 = vld [vmem:[#allocation6 + $0x10] sm:$0xff]  ;;  %vm4211_vm4 = vcmask 1043459   ;;  %vm4214_vm5 = vcmask 1044484   ;;  %vm4217_vm6 = vcmask 1045509  }
  0x63   : > { %5210 = vmatpush.bf16.msra.mxu2 %v5208_v9  ;;  %5209 = vmatpush.bf16.msra.mxu1 %v5208_v9  ;;  %v5202_v15 = vld [vmem:[#allocation6 + $0x8] sm:$0xff]  ;;  %v5201_v16 = vld [vmem:[#allocation6] sm:$0xff]  ;;  %v5139_v18 = vld [vmem:[%s6271_s29 + $0x210] sm:$0xff]  ;;  %vm4220_vm7 = vcmask 1046534   ;;  %vm4223_vm8 = vcmask 1047559   ;;  %vm4342_vm9 = vcmask 7168  }
  0x64   : > { %v5073_v17 = vld [vmem:[%s6271_s29] sm:$0xff]  ;;  %v5074_v19 = vld [vmem:[%s6271_s29 + $0x8] sm:$0xff]  ;;  %v5140_v20 = vld [vmem:[%s6271_s29 + $0x218] sm:$0xff]  ;;  %p5066_p6 = scmp.ne.s32.totalorder %s6058_s21, 1 }
  0x65   : > { %v5075_v21 = vld [vmem:[%s6271_s29 + $0x10] sm:$0xff]  ;;  %v5141_v22 = vld [vmem:[%s6271_s29 + $0x220] sm:$0xff]  ;;  %v5076_v24 = vld [vmem:[%s6271_s29 + $0x18] sm:$0xff] }
  0x66   : > { %1491 = vmatpush.bf16.msra.mxu0 %v5207_v10  ;;  %5214 = vmatpush.bf16.msra.mxu3 %v5207_v10  ;;  %v5113_v23 = vld [vmem:[%s6271_s29 + $0x140] sm:$0xff]  ;;  %v5142_v25 = vld [vmem:[%s6271_s29 + $0x228] sm:$0xff]  ;;  %v5143_v29 = vld [vmem:[%s6271_s29 + $0x230] sm:$0xff] }
  0x67   : > { %5213 = vmatpush.bf16.msra.mxu2 %v5207_v10  ;;  %5212 = vmatpush.bf16.msra.mxu1 %v5207_v10  ;;  %v5170_v26 = vld [vmem:[%s6271_s29 + $0x308] sm:$0xff]  ;;  %v5077_v28 = vld [vmem:[%s6271_s29 + $0x20] sm:$0xff]  ;;  %v5171_v30 = vld [vmem:[%s6271_s29 + $0x310] sm:$0xff] }
  0x68   : > { %v5114_v27 = vld [vmem:[%s6271_s29 + $0x148] sm:$0xff]  ;;  %v5115_v31 = vld [vmem:[%s6271_s29 + $0x150] sm:$0xff]  ;;  %v5144_v33 = vld [vmem:[%s6271_s29 + $0x238] sm:$0xff] }
  0x69   : > { %v5078_v32 = vld [vmem:[%s6271_s29 + $0x28] sm:$0xff]  ;;  %v5172_v34 = vld [vmem:[%s6271_s29 + $0x318] sm:$0xff]  ;;  %v5079_v36 = vld [vmem:[%s6271_s29 + $0x30] sm:$0xff] }
  0x6a   : > { %1492 = vmatpush.bf16.msra.mxu0 %v5206_v11  ;;  %5217 = vmatpush.bf16.msra.mxu3 %v5206_v11  ;;  %v5116_v35 = vld [vmem:[%s6271_s29 + $0x158] sm:$0xff]  ;;  %v5145_v37 = vld [vmem:[%s6271_s29 + $0x240] sm:$0xff]  ;;  %v5146_v41 = vld [vmem:[%s6271_s29 + $0x248] sm:$0xff] }
  0x6b   : > { %5216 = vmatpush.bf16.msra.mxu2 %v5206_v11  ;;  %5215 = vmatpush.bf16.msra.mxu1 %v5206_v11  ;;  %v5117_v38 = vld [vmem:[%s6271_s29 + $0x160] sm:$0xff]  ;;  %v5080_v40 = vld [vmem:[%s6271_s29 + $0x38] sm:$0xff]  ;;  %v5118_v42 = vld [vmem:[%s6271_s29 + $0x168] sm:$0xff] }
  0x6c   : > { %v5173_v39 = vld [vmem:[%s6271_s29 + $0x320] sm:$0xff]  ;;  %v5174_v43 = vld [vmem:[%s6271_s29 + $0x328] sm:$0xff]  ;;  %v5147_v47 = vld [vmem:[%s6271_s29 + $0x250] sm:$0xff] }
  0x6d   : > { %v6317_v44 = vld [vmem:[#allocation8] ss:$0 sm:$0xff]  ;;  %v5119_v50 = vld [vmem:[%s6271_s29 + $0x170] sm:$0xff]  ;;  %v5082_v58 = vld [vmem:[%s6271_s29 + $0x48] sm:$0xff] }
  0x6e   : > { %1493 = vmatpush.bf16.msra.mxu0 %v5205_v12  ;;  %5220 = vmatpush.bf16.msra.mxu3 %v5205_v12  ;;  %v5081_v45 = vld [vmem:[%s6271_s29 + $0x40] sm:$0xff]  ;;  %v5175_v51 = vld [vmem:[%s6271_s29 + $0x330] sm:$0xff]  ;;  %v5148_v61 = vld [vmem:[%s6271_s29 + $0x258] sm:$0xff] }
  0x6f   : > { %5219 = vmatpush.bf16.msra.mxu2 %v5205_v12  ;;  %5218 = vmatpush.bf16.msra.mxu1 %v5205_v12  ;;  %v5120_v1 = vld [vmem:[%s6271_s29 + $0x178] sm:$0xff]  ;;  %v5127_v12 = vld [vmem:[%s6271_s29 + $0x1b0] sm:$0xff] }
  0x70   : > { %v5176_v4 = vld [vmem:[%s6271_s29 + $0x338] sm:$0xff] }
  0x72   : > { %1494 = vmatpush.bf16.msra.mxu0 %v5204_v13  ;;  %5223 = vmatpush.bf16.msra.mxu3 %v5204_v13 }
  0x73   : > { %5222 = vmatpush.bf16.msra.mxu2 %v5204_v13  ;;  %5221 = vmatpush.bf16.msra.mxu1 %v5204_v13 }
  0x76   : > { %1495 = vmatpush.bf16.msra.mxu0 %v5203_v14  ;;  %5226 = vmatpush.bf16.msra.mxu3 %v5203_v14 }
  0x77   : > { %5225 = vmatpush.bf16.msra.mxu2 %v5203_v14  ;;  %5224 = vmatpush.bf16.msra.mxu1 %v5203_v14 }
  0x7a   : > { %1496 = vmatpush.bf16.msra.mxu0 %v5202_v15  ;;  %5229 = vmatpush.bf16.msra.mxu3 %v5202_v15 }
  0x7b   : > { %5228 = vmatpush.bf16.msra.mxu2 %v5202_v15  ;;  %5227 = vmatpush.bf16.msra.mxu1 %v5202_v15  ;;  %v5083_v15 = vld [vmem:[%s6271_s29 + $0x50] sm:$0xff] }
  0x7e   : > { %1497 = vmatpush.bf16.msra.mxu0 %v5201_v16  ;;  %5232 = vmatpush.bf16.msra.mxu3 %v5201_v16 }
  0x7f   : > { %5231 = vmatpush.bf16.msra.mxu2 %v5201_v16  ;;  %5230 = vmatpush.bf16.msra.mxu1 %v5201_v16 }
  0x81   : > { %1498 = vmatmul.bf16.vlgmr.msra.gmra.mxu0 %v5073_v17  ;;  %1983 = vmatmul.bf16.vlgmr.msra.gmra.mxu3 %v5170_v26  ;;  %v5177_v26 = vld [vmem:[%s6271_s29 + $0x340] sm:$0xff] }
  0x82   : > { %1828 = vmatmul.bf16.vlgmr.msra.gmra.mxu2 %v5139_v18  ;;  %1698 = vmatmul.bf16.vlgmr.msra.gmra.mxu1 %v5113_v23  ;;  %v5149_v18 = vld [vmem:[%s6271_s29 + $0x260] sm:$0xff] }
  0x83   : > { %v5121_v23 = vld [vmem:[%s6271_s29 + $0x180] sm:$0xff] }
  0x91   : > { %1503 = vmatmul.bf16.gmra.mxu0 %v5074_v19  ;;  %1988 = vmatmul.bf16.gmra.mxu3 %v5171_v30 }
  0x92   : > { %1833 = vmatmul.bf16.gmra.mxu2 %v5140_v20  ;;  %1703 = vmatmul.bf16.gmra.mxu1 %v5114_v27 }
  0xa1   : > { %1508 = vmatmul.bf16.gmra.mxu0 %v5075_v21  ;;  %1993 = vmatmul.bf16.gmra.mxu3 %v5172_v34 }
  0xa2   : > { %1838 = vmatmul.bf16.gmra.mxu2 %v5141_v22  ;;  %1708 = vmatmul.bf16.gmra.mxu1 %v5115_v31 }
  0xb1   : > { %1513 = vmatmul.bf16.gmra.mxu0 %v5076_v24  ;;  %1998 = vmatmul.bf16.gmra.mxu3 %v5173_v39 }
  0xb2   : > { %1843 = vmatmul.bf16.gmra.mxu2 %v5142_v25  ;;  %1713 = vmatmul.bf16.gmra.mxu1 %v5116_v35 }
  0xc1   : > { %1518 = vmatmul.bf16.gmra.mxu0 %v5077_v28  ;;  %2003 = vmatmul.bf16.gmra.mxu3 %v5174_v43 }
  0xc2   : > { %1848 = vmatmul.bf16.gmra.mxu2 %v5143_v29  ;;  %1718 = vmatmul.bf16.gmra.mxu1 %v5117_v38  ;;  %v5084_v38 = vld [vmem:[%s6271_s29 + $0x58] sm:$0xff] }
  0xd1   : > { %1523 = vmatmul.bf16.gmra.mxu0 %v5078_v32  ;;  %2008 = vmatmul.bf16.gmra.mxu3 %v5175_v51 }
  0xd2   : > { %1853 = vmatmul.bf16.gmra.mxu2 %v5144_v33  ;;  %1723 = vmatmul.bf16.gmra.mxu1 %v5118_v42 }
  0xe1   : > { %1528 = vmatmul.bf16.gmra.mxu0 %v5079_v36  ;;  %2013 = vmatmul.bf16.gmra.mxu3 %v5176_v4 }
  0xe2   : > { %1858 = vmatmul.bf16.gmra.mxu2 %v5145_v37  ;;  %1728 = vmatmul.bf16.gmra.mxu1 %v5119_v50  ;;  %v5178_v50 = vld [vmem:[%s6271_s29 + $0x348] sm:$0xff] }
  0xf1   : > { %1533 = vmatmul.bf16.gmra.mxu0 %v5080_v40  ;;  %2018 = vmatmul.bf16.gmra.mxu3 %v5177_v26  ;;  %v5152_v26 = vld [vmem:[%s6271_s29 + $0x278] sm:$0xff] }
  0xf2   : > { %1863 = vmatmul.bf16.gmra.mxu2 %v5146_v41  ;;  %1733 = vmatmul.bf16.gmra.mxu1 %v5120_v1  ;;  %v5150_v41 = vld [vmem:[%s6271_s29 + $0x268] sm:$0xff] }
  0xfe   : > { %v1499_v46 = vpop.f32.mrf.mxu0 }
  0xff   : > { %v1500_v48 = vadd.f32 %v6317_v44, %v1499_v46  ;;  %v6348_v21 = vpop.f32.mrf.mxu1 }
 0x101   : > { %v2139_v49 = vpack.c.bf16 %v1500_v48, %v1500_v48  ;;  %1538 = vmatmul.bf16.gmra.mxu0 %v5081_v45  ;;  %2023 = vmatmul.bf16.gmra.mxu3 %v5178_v50 }
 0x102   : > { %1868 = vmatmul.bf16.gmra.mxu2 %v5147_v47  ;;  %1738 = vmatmul.bf16.gmra.mxu1 %v5121_v23  ;;  %v5122_v47 = vld [vmem:[%s6271_s29 + $0x188] sm:$0xff] }
 0x103   : > { %v2395_v52 = vunpack.c.l.bf16 %v2139_v49  ;;  %v5086_v23 = vld [vmem:[%s6271_s29 + $0x68] sm:$0xff] }
 0x105   : > { %v6324_v53 = vpop.f32.mrf.mxu2  ;;  %5369 = vtanh.f32 %v2395_v52 }
 0x106   : > { %v1501_v54 = vpop.f32.mrf.mxu0 }
 0x107   : > { %v1502_v55 = vadd.f32 %v6317_v44, %v1501_v54  ;;  %v6361_v35 = vpop.f32.mrf.mxu1 }
 0x109   : > { %v2140_v56 = vpack.c.bf16 %v1502_v55, %v1502_v55 }
 0x10b   : > { %v2396_v57 = vunpack.c.l.bf16 %v2140_v56  ;;  %v5370_v62 = vpop.eup %5369 }
 0x10c   : > { %v2907_v2 = vpack.c.bf16 %v5370_v62, %v5370_v62 }
 0x10d   : > { %5371 = vtanh.f32 %v2396_v57  ;;  %v6328_v59 = vpop.f32.mrf.mxu2 }
 0x10e   : > { %v1504_v60 = vpop.f32.mrf.mxu0  ;;  %v6336_v9 = vunpack.c.l.b16 %v2907_v2 }
 0x10f   : > { %v1505_v63 = vadd.f32 %v6317_v44, %v1504_v60  ;;  %v6368_v45 = vpop.f32.mrf.mxu1 }
 0x111   : > { %v2141_v0 = vpack.c.bf16 %v1505_v63, %v1505_v63  ;;  %1543 = vmatmul.bf16.gmra.mxu0 %v5082_v58 }
 0x112   : > { %1873 = vmatmul.bf16.gmra.mxu2 %v5148_v61  ;;  %1743 = vmatmul.bf16.gmra.mxu1 %v5122_v47  ;;  %v5181_v47 = vld [vmem:[%s6271_s29 + $0x360] sm:$0xff] }
 0x113   : > { %v5372_v3 = vpop.eup %5371  ;;  %v2397_v6 = vunpack.c.l.bf16 %v2141_v0  ;;  %v5085_v0 = vld [vmem:[%s6271_s29 + $0x60] sm:$0xff] }
 0x114   : > { %v2908_v5 = vpack.c.bf16 %v5372_v3, %v5372_v3  ;;  %v5151_v3 = vld [vmem:[%s6271_s29 + $0x270] sm:$0xff] }
 0x115   : > { %v6334_v7 = vpop.f32.mrf.mxu2  ;;  %5373 = vtanh.f32 %v2397_v6  ;;  %v5123_v6 = vld [vmem:[%s6271_s29 + $0x190] sm:$0xff] }
 0x116   : > { %v1506_v8 = vpop.f32.mrf.mxu0  ;;  %v6338_v10 = vunpack.c.l.b16 %v2908_v5 }
 0x117   : > { %v1507_v11 = vadd.f32 %v6317_v44, %v1506_v8  ;;  %v6381_v61 = vpop.f32.mrf.mxu1 }
 0x119   : > { %v2142_v13 = vpack.c.bf16 %v1507_v11, %v1507_v11 }
 0x11b   : > { %v2398_v14 = vunpack.c.l.bf16 %v2142_v13  ;;  %v5374_v19 = vpop.eup %5373  ;;  %v5179_v13 = vld [vmem:[%s6271_s29 + $0x350] sm:$0xff] }
 0x11c   : > { %v2909_v24 = vpack.c.bf16 %v5374_v19, %v5374_v19  ;;  %2028 = vmatmul.bf16.gmra.mxu3 %v5179_v13  ;;  %v5182_v13 = vld [vmem:[%s6271_s29 + $0x368] sm:$0xff] }
 0x11d   : > { %5375 = vtanh.f32 %v2398_v14  ;;  %v6344_v16 = vpop.f32.mrf.mxu2 }
 0x11e   : > { %v1509_v17 = vpop.f32.mrf.mxu0  ;;  %v6354_v31 = vunpack.c.l.b16 %v2909_v24 }
 0x11f   : > { %v1510_v20 = vadd.f32 %v6317_v44, %v1509_v17  ;;  %v6389_v5 = vpop.f32.mrf.mxu1 }
 0x121   : > { %v2143_v22 = vpack.c.bf16 %v1510_v20, %v1510_v20  ;;  %1548 = vmatmul.bf16.gmra.mxu0 %v5083_v15 }
 0x122   : > { %1878 = vmatmul.bf16.gmra.mxu2 %v5149_v18  ;;  %1748 = vmatmul.bf16.gmra.mxu1 %v5123_v6 }
 0x123   : > { %v5376_v25 = vpop.eup %5375  ;;  %v2399_v28 = vunpack.c.l.bf16 %v2143_v22 }
 0x124   : > { %v2910_v27 = vpack.c.bf16 %v5376_v25, %v5376_v25 }
 0x125   : > { %v6352_v29 = vpop.f32.mrf.mxu2  ;;  %5377 = vtanh.f32 %v2399_v28  ;;  %v5124_v28 = vld [vmem:[%s6271_s29 + $0x198] sm:$0xff] }
 0x126   : > { %v1511_v30 = vpop.f32.mrf.mxu0  ;;  %v6356_v32 = vunpack.c.l.b16 %v2910_v27 }
 0x127   : > { %v1512_v33 = vadd.f32 %v6317_v44, %v1511_v30  ;;  %v6401_v22 = vpop.f32.mrf.mxu1  ;;  %v5180_v30 = vld [vmem:[%s6271_s29 + $0x358] sm:$0xff] }
 0x129   : > { %v2144_v36 = vpack.c.bf16 %v1512_v33, %v1512_v33 }
 0x12b   : > { %v2400_v37 = vunpack.c.l.bf16 %v2144_v36  ;;  %v5378_v42 = vpop.eup %5377 }
 0x12c   : > { %v2911_v48 = vpack.c.bf16 %v5378_v42, %v5378_v42  ;;  %2033 = vmatmul.bf16.gmra.mxu3 %v5180_v30  ;;  %v5153_v42 = vld [vmem:[%s6271_s29 + $0x280] sm:$0xff] }
 0x12d   : > { %5379 = vtanh.f32 %v2400_v37  ;;  %v6364_v39 = vpop.f32.mrf.mxu2 }
 0x12e   : > { %v1514_v40 = vpop.f32.mrf.mxu0  ;;  %v6374_v56 = vunpack.c.l.b16 %v2911_v48  ;;  %v6423_v48 = vpop.f32.mrf.mxu3 }
 0x12f   : > { %v1515_v43 = vadd.f32 %v6317_v44, %v1514_v40  ;;  %v6407_v27 = vpop.f32.mrf.mxu1 }
 0x131   : > { %v2145_v46 = vpack.c.bf16 %v1515_v43, %v1515_v43  ;;  %1553 = vmatmul.bf16.gmra.mxu0 %v5084_v38  ;;  %v5087_v38 = vld [vmem:[%s6271_s29 + $0x70] sm:$0xff] }
 0x132   : > { %1883 = vmatmul.bf16.gmra.mxu2 %v5150_v41  ;;  %1753 = vmatmul.bf16.gmra.mxu1 %v5124_v28  ;;  %v5126_v28 = vld [vmem:[%s6271_s29 + $0x1a8] sm:$0xff] }
 0x133   : > { %v5380_v49 = vpop.eup %5379  ;;  %v2401_v52 = vunpack.c.l.bf16 %v2145_v46  ;;  %v5125_v46 = vld [vmem:[%s6271_s29 + $0x1a0] sm:$0xff] }
 0x134   : > { %v2912_v51 = vpack.c.bf16 %v5380_v49, %v5380_v49 }
 0x135   : > { %v6372_v54 = vpop.f32.mrf.mxu2  ;;  %5381 = vtanh.f32 %v2401_v52 }
 0x136   : > { %v1516_v55 = vpop.f32.mrf.mxu0  ;;  %v6376_v57 = vunpack.c.l.b16 %v2912_v51  ;;  %v6429_v52 = vpop.f32.mrf.mxu3 }
 0x137   : > { %v1517_v58 = vadd.f32 %v6317_v44, %v1516_v55  ;;  %v6413_v37 = vpop.f32.mrf.mxu1  ;;  %v5088_v55 = vld [vmem:[%s6271_s29 + $0x78] sm:$0xff] }
 0x139   : > { %v2146_v62 = vpack.c.bf16 %v1517_v58, %v1517_v58 }
 0x13b   : > { %v2402_v63 = vunpack.c.l.bf16 %v2146_v62  ;;  %v5382_v4 = vpop.eup %5381 }
 0x13c   : > { %v2913_v8 = vpack.c.bf16 %v5382_v4, %v5382_v4  ;;  %2038 = vmatmul.bf16.gmra.mxu3 %v5181_v47 }
 0x13d   : > { %5383 = vtanh.f32 %v2402_v63  ;;  %v6384_v1 = vpop.f32.mrf.mxu2  ;;  %v5154_v63 = vld [vmem:[%s6271_s29 + $0x288] sm:$0xff] }
 0x13e   : > { %v6386_v2 = vpop.f32.mrf.mxu0  ;;  %v6395_v18 = vunpack.c.l.b16 %v2913_v8 }
 0x13f   : > { %v6419_v43 = vpop.f32.mrf.mxu1 }
 0x140   : > { %8200 = vst [vmem:[#allocation23_spill] sm:$0xff] %v6419_v43 }
 0x141   : > { %1558 = vmatmul.bf16.gmra.mxu0 %v5085_v0 }
 0x142   : > { %1888 = vmatmul.bf16.gmra.mxu2 %v5151_v3  ;;  %1758 = vmatmul.bf16.gmra.mxu1 %v5125_v46 }
 0x143   : > { %v5384_v11 = vpop.eup %5383 }
 0x144   : > { %v2914_v14 = vpack.c.bf16 %v5384_v11, %v5384_v11 }
 0x145   : > { %v6393_v15 = vpop.f32.mrf.mxu2 }
 0x146   : > { %v1521_v17 = vpop.f32.mrf.mxu0  ;;  %v6397_v19 = vunpack.c.l.b16 %v2914_v14  ;;  %v6440_v14 = vpop.f32.mrf.mxu3 }
 0x147   : > { %v6427_v51 = vpop.f32.mrf.mxu1  ;;  %v1522_v46 = vadd.f32 %v6317_v44, %v1521_v17 }
 0x148   : > { %8202 = vst [vmem:[#allocation25_spill] sm:$0xff] %v6427_v51 }
 0x14c   : > { %2043 = vmatmul.bf16.gmra.mxu3 %v5182_v13  ;;  %v5089_v13 = vld [vmem:[%s6271_s29 + $0x80] sm:$0xff] }
 0x14d   : > { %v6404_v24 = vpop.f32.mrf.mxu2 }
 0x14e   : > { %v1524_v25 = vpop.f32.mrf.mxu0 }
 0x14f   : > { %v1525_v30 = vadd.f32 %v6317_v44, %v1524_v25 }
 0x151   : > { %1563 = vmatmul.bf16.gmra.mxu0 %v5086_v23  ;;  %v6442_v23 = vpop.f32.mrf.mxu1 }
 0x152   : > { %1893 = vmatmul.bf16.gmra.mxu2 %v5152_v26  ;;  %8204 = vst [vmem:[#allocation27_spill] sm:$0xff] %v6442_v23  ;;  %1763 = vmatmul.bf16.gmra.mxu1 %v5126_v28  ;;  %v5155_v28 = vld [vmem:[%s6271_s29 + $0x290] sm:$0xff] }
 0x155   : > { %v6411_v33 = vpop.f32.mrf.mxu2 }
 0x156   : > { %v1526_v36 = vpop.f32.mrf.mxu0 }
 0x157   : > { %v1527_v8 = vadd.f32 %v6317_v44, %v1526_v36 }
 0x159   : > { %v2150_v47 = vpack.c.bf16 %v1527_v8, %v1527_v8  ;;  %v6454_v17 = vpop.f32.mrf.mxu1 }
 0x15a   : > { %8206 = vst [vmem:[#allocation29_spill] sm:$0xff] %v6454_v17  ;;  %v5161_v17 = vld [vmem:[%s6271_s29 + $0x2c0] sm:$0xff] }
 0x15d   : > { %v6416_v40 = vpop.f32.mrf.mxu2 }
 0x15e   : > { %v1529_v41 = vpop.f32.mrf.mxu0 }
 0x15f   : > { %v1530_v4 = vadd.f32 %v6317_v44, %v1529_v41 }
 0x161   : > { %1568 = vmatmul.bf16.gmra.mxu0 %v5087_v38  ;;  %v2151_v26 = vpack.c.bf16 %v1530_v4, %v1530_v4 }
 0x162   : > { %1898 = vmatmul.bf16.gmra.mxu2 %v5153_v42  ;;  %1768 = vmatmul.bf16.gmra.mxu1 %v5127_v12 }
 0x165   : > { %v6425_v49 = vpop.f32.mrf.mxu2 }
 0x166   : > { %8201 = vst [vmem:[#allocation24_spill] sm:$0xff] %v6425_v49  ;;  %v1531_v50 = vpop.f32.mrf.mxu0 }
 0x167   : > { %v1532_v0 = vadd.f32 %v6317_v44, %v1531_v50 }
 0x169   : > { %v2152_v11 = vpack.c.bf16 %v1532_v0, %v1532_v0  ;;  %v2148_v0 = vpack.c.bf16 %v1522_v46, %v1522_v46 }
 0x16b   : > { %v2408_v36 = vunpack.c.l.bf16 %v2152_v11 }
 0x16d   : > { %v6432_v58 = vpop.f32.mrf.mxu2 }
 0x16e   : > { %8203 = vst [vmem:[#allocation26_spill] sm:$0xff] %v6432_v58  ;;  %v1534_v62 = vpop.f32.mrf.mxu0 }
 0x16f   : > { %v1535_v3 = vadd.f32 %v6317_v44, %v1534_v62  ;;  %v1520_v62 = vadd.f32 %v6317_v44, %v6386_v2 }
 0x171   : > { %v2153_v6 = vpack.c.bf16 %v1535_v3, %v1535_v3  ;;  %1573 = vmatmul.bf16.gmra.mxu0 %v5088_v55  ;;  %v2407_v55 = vunpack.c.l.bf16 %v2151_v26  ;;  %v2406_v3 = vunpack.c.l.bf16 %v2150_v47  ;;  %v2147_v8 = vpack.c.bf16 %v1520_v62, %v1520_v62 }
 0x172   : > { %1903 = vmatmul.bf16.gmra.mxu2 %v5154_v63  ;;  %v2149_v63 = vpack.c.bf16 %v1525_v30, %v1525_v30 }
 0x173   : > { %v2409_v38 = vunpack.c.l.bf16 %v2153_v6  ;;  %v6452_v6 = vpop.f32.mrf.mxu3  ;;  %v2403_v47 = vunpack.c.l.bf16 %v2147_v8 }
 0x174   : > { %v2405_v11 = vunpack.c.l.bf16 %v2149_v63  ;;  %v5183_v63 = vld [vmem:[%s6271_s29 + $0x370] sm:$0xff] }
 0x175   : > { %v6446_v42 = vpop.f32.mrf.mxu2  ;;  %5385 = vtanh.f32 %v2409_v38  ;;  %v2404_v38 = vunpack.c.l.bf16 %v2148_v0  ;;  %2048 = vmatmul.bf16.gmra.mxu3 %v5183_v63 }
 0x176   : > { %8205 = vst [vmem:[#allocation28_spill] sm:$0xff] %v6446_v42  ;;  %v1536_v41 = vpop.f32.mrf.mxu0  ;;  %5387 = vtanh.f32 %v2408_v36  ;;  %v5128_v42 = vld [vmem:[%s6271_s29 + $0x1b8] sm:$0xff] }
 0x177   : > { %v1537_v50 = vadd.f32 %v6317_v44, %v1536_v41  ;;  %5389 = vtanh.f32 %v2407_v55  ;;  %1773 = vmatmul.bf16.gmra.mxu1 %v5128_v42 }
 0x179   : > { %v2154_v25 = vpack.c.bf16 %v1537_v50, %v1537_v50 }
 0x17b   : > { %v2410_v4 = vunpack.c.l.bf16 %v2154_v25  ;;  %v5386_v30 = vpop.eup %5385  ;;  %v6462_v25 = vpop.f32.mrf.mxu3 }
 0x17c   : > { %v5388_v46 = vpop.eup %5387  ;;  %v2921_v55 = vpack.c.bf16 %v5386_v30, %v5386_v30 }
 0x17d   : > { %5391 = vtanh.f32 %v2410_v4  ;;  %v6457_v26 = vpop.f32.mrf.mxu2  ;;  %v5390_v50 = vpop.eup %5389 }
 0x17e   : > { %8207 = vst [vmem:[#allocation30_spill] sm:$0xff] %v6457_v26  ;;  %v1539_v2 = vpop.f32.mrf.mxu0  ;;  %5393 = vtanh.f32 %v2406_v3  ;;  %v6464_v4 = vpop.f32.mrf.mxu1  ;;  %v2920_v3 = vpack.c.bf16 %v5388_v46, %v5388_v46  ;;  %v3223_v30 = vunpack.c.l.b16 %v2921_v55 }
 0x17f   : > { %v1540_v41 = vadd.f32 %v6317_v44, %v1539_v2  ;;  %5395 = vtanh.f32 %v2405_v11  ;;  %8208 = vst [vmem:[#allocation31_spill] sm:$0xff] %v6464_v4  ;;  %v2919_v11 = vpack.c.bf16 %v5390_v50, %v5390_v50 }
 0x180   : > { %5397 = vtanh.f32 %v2404_v38  ;;  %v3222_v20 = vunpack.c.l.b16 %v2920_v3  ;;  %v5090_v3 = vld [vmem:[%s6271_s29 + $0x88] sm:$0xff] }
 0x181   : > { %v2155_v36 = vpack.c.bf16 %v1540_v41, %v1540_v41  ;;  %1578 = vmatmul.bf16.gmra.mxu0 %v5089_v13  ;;  %5399 = vtanh.f32 %v2403_v47 }
 0x182   : > { %1908 = vmatmul.bf16.gmra.mxu2 %v5155_v28 }
 0x183   : > { %v5392_v62 = vpop.eup %5391  ;;  %v2411_v34 = vunpack.c.l.bf16 %v2155_v36  ;;  %v3221_v36 = vunpack.c.l.b16 %v2919_v11  ;;  %v6470_v49 = vpop.f32.mrf.mxu3 }
 0x184   : > { %v2922_v0 = vpack.c.bf16 %v5392_v62, %v5392_v62  ;;  %v5394_v2 = vpop.eup %5393 }
 0x185   : > { %v6467_v8 = vpop.f32.mrf.mxu2  ;;  %v5396_v38 = vpop.eup %5395  ;;  %v2918_v62 = vpack.c.bf16 %v5394_v2, %v5394_v2  ;;  %5401 = vtanh.f32 %v2411_v34  ;;  %v3247_v12 = vpack.c.b16 %v3222_v20, %v3221_v36  ;;  %v5184_v36 = vld [vmem:[%s6271_s29 + $0x378] sm:$0xff] }
 0x186   : > { %8209 = vst [vmem:[#allocation32_spill] sm:$0xff] %v6467_v8  ;;  %v1541_v13 = vpop.f32.mrf.mxu0  ;;  %v3224_v28 = vunpack.c.l.b16 %v2922_v0  ;;  %v5398_v46 = vpop.eup %5397  ;;  %v2917_v47 = vpack.c.bf16 %v5396_v38, %v5396_v38  ;;  %2053 = vmatmul.bf16.gmra.mxu3 %v5184_v36 }
 0x187   : > { %v1542_v41 = vadd.f32 %v6317_v44, %v1541_v13  ;;  %v5400_v63 = vpop.eup %5399  ;;  %v6472_v55 = vpop.f32.mrf.mxu1  ;;  %v3220_v0 = vunpack.c.l.b16 %v2918_v62  ;;  %v2916_v13 = vpack.c.bf16 %v5398_v46, %v5398_v46 }
 0x188   : > { %v3248_v60 = vpack.c.b16 %v3224_v28, %v3223_v30  ;;  %8210 = vst [vmem:[#allocation33_spill] sm:$0xff] %v6472_v55  ;;  %v2915_v2 = vpack.c.bf16 %v5400_v63, %v5400_v63  ;;  %v5156_v28 = vld [vmem:[%s6271_s29 + $0x298] sm:$0xff] }
 0x189   : > { %v2156_v58 = vpack.c.bf16 %v1542_v41, %v1542_v41  ;;  %v3218_v41 = vunpack.c.l.b16 %v2916_v13 }
 0x18a   : > { %3273 = vmatpush.bf16.msrb.mxu1 %v3248_v60  ;;  %v3219_v60 = vunpack.c.l.b16 %v2917_v47  ;;  %v3217_v62 = vunpack.c.l.b16 %v2915_v2 }
 0x18b   : > { %v2412_v50 = vunpack.c.l.bf16 %v2156_v58  ;;  %v5402_v11 = vpop.eup %5401  ;;  %v6480_v63 = vpop.f32.mrf.mxu3 }
 0x18c   : > { %v3246_v38 = vpack.c.b16 %v3220_v0, %v3219_v60  ;;  %v2923_v20 = vpack.c.bf16 %v5402_v11, %v5402_v11  ;;  %v3245_v47 = vpack.c.b16 %v3218_v41, %v3217_v62  ;;  %v5091_v41 = vld [vmem:[%s6271_s29 + $0x90] sm:$0xff]  ;;  %v5157_v62 = vld [vmem:[%s6271_s29 + $0x2a0] sm:$0xff]  ;;  %v5130_v60 = vld [vmem:[%s6271_s29 + $0x1c8] sm:$0xff] }
 0x18d   : > { %5403 = vtanh.f32 %v2412_v50  ;;  %v6475_v30 = vpop.f32.mrf.mxu2 }
 0x18e   : > { %8211 = vst [vmem:[#allocation34_spill] sm:$0xff] %v6475_v30  ;;  %v1544_v34 = vpop.f32.mrf.mxu0  ;;  %3274 = vmatpush.bf16.msrb.mxu1 %v3247_v12 }
 0x18f   : > { %v1545_v58 = vadd.f32 %v6317_v44, %v1544_v34  ;;  %v6482_v50 = vpop.f32.mrf.mxu1 }
 0x190   : > { %8212 = vst [vmem:[#allocation35_spill] sm:$0xff] %v6482_v50  ;;  %v5134_v50 = vld [vmem:[%s6271_s29 + $0x1e8] sm:$0xff] }
 0x191   : > { %v2157_v26 = vpack.c.bf16 %v1545_v58, %v1545_v58  ;;  %1583 = vmatmul.bf16.gmra.mxu0 %v5090_v3  ;;  %v6487_v3 = vunpack.c.l.b16 %v2923_v20 }
 0x192   : > { %3275 = vmatpush.bf16.msrb.mxu1 %v3246_v38  ;;  %1913 = vmatmul.bf16.gmra.mxu2 %v5156_v28 }
 0x193   : > { %v5404_v46 = vpop.eup %5403  ;;  %v2413_v30 = vunpack.c.l.bf16 %v2157_v26  ;;  %v8214_v26 = vpack.c.b16 %v6397_v19, %v6395_v18  ;;  %v6497_v58 = vpop.f32.mrf.mxu3 }
 0x194   : > { %v2924_v12 = vpack.c.bf16 %v5404_v46, %v5404_v46 }
 0x195   : > { %v6485_v0 = vpop.f32.mrf.mxu2  ;;  %5405 = vtanh.f32 %v2413_v30  ;;  %v8217_v30 = vpack.c.b16 %v6376_v57, %v6374_v56  ;;  %v5129_v57 = vld [vmem:[%s6271_s29 + $0x1c0] sm:$0xff] }
 0x196   : > { %8213 = vst [vmem:[#allocation36_spill] sm:$0xff] %v6485_v0  ;;  %v1546_v13 = vpop.f32.mrf.mxu0  ;;  %3276 = vmatpush.bf16.msrb.mxu1 %v3245_v47  ;;  %v6489_v2 = vunpack.c.l.b16 %v2924_v12  ;;  %v8218_v47 = vpack.c.b16 %v6356_v32, %v6354_v31 }
 0x197   : > { %v1547_v34 = vadd.f32 %v6317_v44, %v1546_v13  ;;  %v6499_v38 = vpop.f32.mrf.mxu1  ;;  %v5185_v13 = vld [vmem:[%s6271_s29 + $0x380] sm:$0xff]  ;;  %1778 = vmatmul.bf16.gmra.mxu1 %v5129_v57 }
 0x198   : > { %8215 = vst [vmem:[#allocation37_spill] sm:$0xff] %v6499_v38  ;;  %2058 = vmatmul.bf16.gmra.mxu3 %v5185_v13 }
 0x199   : > { %v2158_v28 = vpack.c.bf16 %v1547_v34, %v1547_v34 }
 0x19a   : > { %3277 = vmatpush.bf16.msrb.mxu1 %v8214_v26 }
 0x19b   : > { %v2414_v11 = vunpack.c.l.bf16 %v2158_v28  ;;  %v5406_v46 = vpop.eup %5405  ;;  %v6513_v34 = vpop.f32.mrf.mxu3 }
 0x19c   : > { %v2925_v36 = vpack.c.bf16 %v5406_v46, %v5406_v46 }
 0x19d   : > { %5407 = vtanh.f32 %v2414_v11  ;;  %v6502_v20 = vpop.f32.mrf.mxu2 }
 0x19e   : > { %8216 = vst [vmem:[#allocation38_spill] sm:$0xff] %v6502_v20  ;;  %v1549_v42 = vpop.f32.mrf.mxu0  ;;  %3278 = vmatpush.bf16.msrb.mxu1 %v8217_v30  ;;  %v6523_v31 = vunpack.c.l.b16 %v2925_v36 }
 0x19f   : > { %v1550_v18 = vadd.f32 %v6317_v44, %v1549_v42  ;;  %v6515_v28 = vpop.f32.mrf.mxu1  ;;  %v8221_v42 = vpack.c.b16 %v6338_v10, %v6336_v9  ;;  %v5092_v9 = vld [vmem:[%s6271_s29 + $0x98] sm:$0xff] }
 0x1a0   : > { %8219 = vst [vmem:[#allocation39_spill] sm:$0xff] %v6515_v28 }
 0x1a1   : > { %v2159_v19 = vpack.c.bf16 %v1550_v18, %v1550_v18  ;;  %1588 = vmatmul.bf16.gmra.mxu0 %v5091_v41 }
 0x1a2   : > { %3279 = vmatpush.bf16.msrb.mxu1 %v8218_v47  ;;  %1918 = vmatmul.bf16.gmra.mxu2 %v5157_v62 }
 0x1a3   : > { %v5408_v12 = vpop.eup %5407  ;;  %v2415_v26 = vunpack.c.l.bf16 %v2159_v19  ;;  %v6530_v19 = vpop.f32.mrf.mxu3 }
 0x1a4   : > { %v2926_v56 = vpack.c.bf16 %v5408_v12, %v5408_v12  ;;  %v5158_v12 = vld [vmem:[%s6271_s29 + $0x2a8] sm:$0xff] }
 0x1a5   : > { %v6518_v11 = vpop.f32.mrf.mxu2  ;;  %5409 = vtanh.f32 %v2415_v26 }
 0x1a6   : > { %8220 = vst [vmem:[#allocation40_spill] sm:$0xff] %v6518_v11  ;;  %v1551_v41 = vpop.f32.mrf.mxu0  ;;  %3280 = vmatpush.bf16.msrb.mxu1 %v8221_v42  ;;  %v6525_v32 = vunpack.c.l.b16 %v2926_v56  ;;  %v5186_v42 = vld [vmem:[%s6271_s29 + $0x388] sm:$0xff] }
 0x1a7   : > { %v1552_v30 = vadd.f32 %v6317_v44, %v1551_v41  ;;  %v6532_v47 = vpop.f32.mrf.mxu1  ;;  %1783 = vmatmul.bf16.gmra.mxu1 %v5130_v60 }
 0x1a8   : > { %8222 = vst [vmem:[#allocation41_spill] sm:$0xff] %v6532_v47  ;;  %2063 = vmatmul.bf16.gmra.mxu3 %v5186_v42 }
 0x1a9   : > { %v2160_v46 = vpack.c.bf16 %v1552_v30, %v1552_v30 }
 0x1ab   : > { %v2416_v18 = vunpack.c.l.bf16 %v2160_v46  ;;  %v5410_v13 = vpop.eup %5409  ;;  %v6540_v30 = vpop.f32.mrf.mxu3 }
 0x1ac   : > { %v2927_v26 = vpack.c.bf16 %v5410_v13, %v5410_v13 }
 0x1ad   : > { %5411 = vtanh.f32 %v2416_v18  ;;  %v6535_v10 = vpop.f32.mrf.mxu2 }
 0x1ae   : > { %8223 = vst [vmem:[#allocation42_spill] sm:$0xff] %v6535_v10  ;;  %v1554_v36 = vpop.f32.mrf.mxu0 }
 0x1af   : > { %v1555_v56 = vadd.f32 %v6317_v44, %v1554_v36  ;;  %v6542_v46 = vpop.f32.mrf.mxu1  ;;  %v6547_v36 = vunpack.c.l.b16 %v2927_v26  ;;  %v5093_v26 = vld [vmem:[%s6271_s29 + $0xa0] sm:$0xff] }
 0x1b0   : > { %8224 = vst [vmem:[#allocation43_spill] sm:$0xff] %v6542_v46 }
 0x1b1   : > { %v2161_v57 = vpack.c.bf16 %v1555_v56, %v1555_v56  ;;  %1593 = vmatmul.bf16.gmra.mxu0 %v5092_v9 }
 0x1b2   : > { %1923 = vmatmul.bf16.gmra.mxu2 %v5158_v12 }
 0x1b3   : > { %v5412_v41 = vpop.eup %5411  ;;  %v2417_v62 = vunpack.c.l.bf16 %v2161_v57  ;;  %v6554_v57 = vpop.f32.mrf.mxu3 }
 0x1b4   : > { %v2928_v18 = vpack.c.bf16 %v5412_v41, %v5412_v41 }
 0x1b5   : > { %v6545_v20 = vpop.f32.mrf.mxu2  ;;  %5413 = vtanh.f32 %v2417_v62 }
 0x1b6   : > { %8225 = vst [vmem:[#allocation44_spill] sm:$0xff] %v6545_v20  ;;  %v1556_v10 = vpop.f32.mrf.mxu0  ;;  %v6549_v9 = vunpack.c.l.b16 %v2928_v18 }
 0x1b7   : > { %v1557_v12 = vadd.f32 %v6317_v44, %v1556_v10  ;;  %v6556_v42 = vpop.f32.mrf.mxu1  ;;  %v5159_v10 = vld [vmem:[%s6271_s29 + $0x2b0] sm:$0xff] }
 0x1b8   : > { %8226 = vst [vmem:[#allocation45_spill] sm:$0xff] %v6556_v42 }
 0x1b9   : > { %v2162_v56 = vpack.c.bf16 %v1557_v12, %v1557_v12  ;;  %v5187_v12 = vld [vmem:[%s6271_s29 + $0x390] sm:$0xff] }
 0x1ba   : > { %2068 = vmatmul.bf16.gmra.mxu3 %v5187_v12 }
 0x1bb   : > { %v2418_v41 = vunpack.c.l.bf16 %v2162_v56  ;;  %v5414_v60 = vpop.eup %5413  ;;  %v6565_v56 = vpop.f32.mrf.mxu3 }
 0x1bc   : > { %v2929_v20 = vpack.c.bf16 %v5414_v60, %v5414_v60  ;;  %v5132_v60 = vld [vmem:[%s6271_s29 + $0x1d8] sm:$0xff] }
 0x1bd   : > { %5415 = vtanh.f32 %v2418_v41  ;;  %v6559_v11 = vpop.f32.mrf.mxu2  ;;  %v5131_v41 = vld [vmem:[%s6271_s29 + $0x1d0] sm:$0xff] }
 0x1be   : > { %8227 = vst [vmem:[#allocation46_spill] sm:$0xff] %v6559_v11  ;;  %v6561_v18 = vpop.f32.mrf.mxu0  ;;  %1788 = vmatmul.bf16.gmra.mxu1 %v5131_v41 }
 0x1bf   : > { %v6567_v13 = vpop.f32.mrf.mxu1 }
 0x1c0   : > { %8228 = vst [vmem:[#allocation47_spill] sm:$0xff] %v6567_v13 }
 0x1c1   : > { %1598 = vmatmul.bf16.gmra.mxu0 %v5093_v26  ;;  %v6574_v26 = vunpack.c.l.b16 %v2929_v20  ;;  %v5188_v20 = vld [vmem:[%s6271_s29 + $0x398] sm:$0xff] }
 0x1c2   : > { %1928 = vmatmul.bf16.gmra.mxu2 %v5159_v10 }
 0x1c3   : > { %v5416_v62 = vpop.eup %5415  ;;  %v6580_v47 = vpop.f32.mrf.mxu3 }
 0x1c4   : > { %v2930_v42 = vpack.c.bf16 %v5416_v62, %v5416_v62  ;;  %v5094_v62 = vld [vmem:[%s6271_s29 + $0xa8] sm:$0xff] }
 0x1c5   : > { %v6570_v11 = vpop.f32.mrf.mxu2 }
 0x1c6   : > { %8229 = vst [vmem:[#allocation48_spill] sm:$0xff] %v6570_v11  ;;  %v6572_v46 = vpop.f32.mrf.mxu0  ;;  %v6576_v10 = vunpack.c.l.b16 %v2930_v42  ;;  %v5160_v11 = vld [vmem:[%s6271_s29 + $0x2b8] sm:$0xff] }
 0x1c7   : > { %v6582_v13 = vpop.f32.mrf.mxu1 }
 0x1c8   : > { %8230 = vst [vmem:[#allocation49_spill] sm:$0xff] %v6582_v13 }
 0x1ca   : > { %2073 = vmatmul.bf16.gmra.mxu3 %v5188_v20 }
 0x1cb   : > { %v6591_v42 = vpop.f32.mrf.mxu3 }
 0x1cc   : > { %8232 = vst [vmem:[#allocation51_spill] sm:$0xff] %v6591_v42 }
 0x1cd   : > { %v6585_v28 = vpop.f32.mrf.mxu2 }
 0x1ce   : > { %8231 = vst [vmem:[#allocation50_spill] sm:$0xff] %v6585_v28  ;;  %v6587_v12 = vpop.f32.mrf.mxu0  ;;  %1793 = vmatmul.bf16.gmra.mxu1 %v5132_v60  ;;  %v1985_v28 = vadd.f32 %v6317_v44, %v6423_v48  ;;  %v5189_v48 = vld [vmem:[%s6271_s29 + $0x3a0] sm:$0xff] }
 0x1cf   : > { %v6593_v41 = vpop.f32.mrf.mxu1 }
 0x1d0   : > { %8233 = vst [vmem:[#allocation52_spill] sm:$0xff] %v6593_v41  ;;  %v2333_v51 = vpack.c.bf16 %v1985_v28, %v1985_v28  ;;  %v5095_v41 = vld [vmem:[%s6271_s29 + $0xb0] sm:$0xff] }
 0x1d1   : > { %1603 = vmatmul.bf16.gmra.mxu0 %v5094_v62  ;;  %v1987_v62 = vadd.f32 %v6317_v44, %v6429_v52 }
 0x1d2   : > { %1933 = vmatmul.bf16.gmra.mxu2 %v5160_v11  ;;  %v2589_v23 = vunpack.c.l.bf16 %v2333_v51  ;;  %v1990_v51 = vadd.f32 %v6317_v44, %v6440_v14 }
 0x1d3   : > { %v6602_v11 = vpop.f32.mrf.mxu3  ;;  %v2334_v20 = vpack.c.bf16 %v1987_v62, %v1987_v62 }
 0x1d4   : > { %8235 = vst [vmem:[#allocation54_spill] sm:$0xff] %v6602_v11  ;;  %v5133_v11 = vld [vmem:[%s6271_s29 + $0x1e0] sm:$0xff]  ;;  %5417 = vtanh.f32 %v2589_v23 }
 0x1d5   : > { %v6596_v0 = vpop.f32.mrf.mxu2  ;;  %v2590_v60 = vunpack.c.l.bf16 %v2334_v20 }
 0x1d6   : > { %8234 = vst [vmem:[#allocation53_spill] sm:$0xff] %v6596_v0  ;;  %v1566_v13 = vpop.f32.mrf.mxu0 }
 0x1d7   : > { %v6604_v8 = vpop.f32.mrf.mxu1  ;;  %5419 = vtanh.f32 %v2590_v60  ;;  %v5162_v60 = vld [vmem:[%s6271_s29 + $0x2c8] sm:$0xff] }
 0x1d8   : > { %8236 = vst [vmem:[#allocation55_spill] sm:$0xff] %v6604_v8  ;;  %v2335_v8 = vpack.c.bf16 %v1990_v51, %v1990_v51 }
 0x1da   : > { %2078 = vmatmul.bf16.gmra.mxu3 %v5189_v48 }
 0x1db   : > { %v6613_v52 = vpop.f32.mrf.mxu3 }
 0x1dc   : > { %8239 = vst [vmem:[#allocation58_spill] sm:$0xff] %v6613_v52 }
 0x1dd   : > { %v6607_v43 = vpop.f32.mrf.mxu2 }
 0x1de   : > { %8237 = vst [vmem:[#allocation56_spill] sm:$0xff] %v6607_v43  ;;  %v1569_v0 = vpop.f32.mrf.mxu0  ;;  %1798 = vmatmul.bf16.gmra.mxu1 %v5133_v11 }
 0x1df   : > { %v6611_v42 = vpop.f32.mrf.mxu1  ;;  %v1570_v4 = vadd.f32 %v6317_v44, %v1569_v0 }
 0x1e0   : > { %8238 = vst [vmem:[#allocation57_spill] sm:$0xff] %v6611_v42  ;;  %v5096_v42 = vld [vmem:[%s6271_s29 + $0xb8] sm:$0xff] }
 0x1e1   : > { %1608 = vmatmul.bf16.gmra.mxu0 %v5095_v41  ;;  %v5418_v41 = vpop.eup %5417 }
 0x1e2   : > { %1938 = vmatmul.bf16.gmra.mxu2 %v5161_v17  ;;  %v1992_v17 = vadd.f32 %v6317_v44, %v6452_v6  ;;  %v5420_v43 = vpop.eup %5419  ;;  %v3101_v11 = vpack.c.bf16 %v5418_v41, %v5418_v41  ;;  %v1567_v41 = vadd.f32 %v6317_v44, %v1566_v13 }
 0x1e3   : > { %v3102_v55 = vpack.c.bf16 %v5420_v43, %v5420_v43 }
 0x1e4   : > { %v2336_v48 = vpack.c.bf16 %v1992_v17, %v1992_v17  ;;  %v6633_v17 = vunpack.c.l.b16 %v3101_v11  ;;  %v2166_v13 = vpack.c.bf16 %v1567_v41, %v1567_v41 }
 0x1e5   : > { %v6616_v28 = vpop.f32.mrf.mxu2 }
 0x1e6   : > { %8240 = vst [vmem:[#allocation59_spill] sm:$0xff] %v6616_v28  ;;  %v1571_v62 = vpop.f32.mrf.mxu0  ;;  %v6627_v28 = vpop.f32.mrf.mxu3  ;;  %v2592_v51 = vunpack.c.l.bf16 %v2336_v48  ;;  %v5190_v48 = vld [vmem:[%s6271_s29 + $0x3a8] sm:$0xff]  ;;  %v2422_v41 = vunpack.c.l.bf16 %v2166_v13 }
 0x1e7   : > { %v6622_v20 = vpop.f32.mrf.mxu1  ;;  %8243 = vst [vmem:[#allocation62_spill] sm:$0xff] %v6627_v28  ;;  %v1572_v14 = vadd.f32 %v6317_v44, %v1571_v62  ;;  %v2167_v62 = vpack.c.bf16 %v1570_v4, %v1570_v4 }
 0x1e8   : > { %8241 = vst [vmem:[#allocation60_spill] sm:$0xff] %v6622_v20  ;;  %v2591_v20 = vunpack.c.l.bf16 %v2335_v8  ;;  %v1565_v8 = vadd.f32 %v6317_v44, %v6587_v12 }
 0x1e9   : > { %8244 = vst [vmem:[#allocation63_spill] sm:$0xff] %v6633_v17  ;;  %v2168_v28 = vpack.c.bf16 %v1572_v14, %v1572_v14  ;;  %v2423_v12 = vunpack.c.l.bf16 %v2167_v62 }
 0x1ea   : > { %5421 = vtanh.f32 %v2591_v20  ;;  %2083 = vmatmul.bf16.gmra.mxu3 %v5190_v48  ;;  %v2165_v14 = vpack.c.bf16 %v1565_v8, %v1565_v8  ;;  %v5097_v8 = vld [vmem:[%s6271_s29 + $0xc0] sm:$0xff] }
 0x1eb   : > { %5423 = vtanh.f32 %v2592_v51  ;;  %v2424_v11 = vunpack.c.l.bf16 %v2168_v28  ;;  %v1997_v28 = vadd.f32 %v6317_v44, %v6470_v49 }
 0x1ed   : > { %v6625_v23 = vpop.f32.mrf.mxu2 }
 0x1ee   : > { %8242 = vst [vmem:[#allocation61_spill] sm:$0xff] %v6625_v23  ;;  %v1574_v52 = vpop.f32.mrf.mxu0  ;;  %v6635_v23 = vunpack.c.l.b16 %v3102_v55  ;;  %1803 = vmatmul.bf16.gmra.mxu1 %v5134_v50 }
 0x1ef   : > { %v1575_v6 = vadd.f32 %v6317_v44, %v1574_v52  ;;  %v6638_v43 = vpop.f32.mrf.mxu1  ;;  %v1562_v52 = vadd.f32 %v6317_v44, %v6572_v46  ;;  %v1560_v46 = vadd.f32 %v6317_v44, %v6561_v18  ;;  %v2421_v18 = vunpack.c.l.bf16 %v2165_v14 }
 0x1f0   : > { %8245 = vst [vmem:[#allocation64_spill] sm:$0xff] %v6635_v23  ;;  %v5422_v51 = vpop.eup %5421 }
 0x1f1   : > { %v2169_v38 = vpack.c.bf16 %v1575_v6, %v1575_v6  ;;  %1613 = vmatmul.bf16.gmra.mxu0 %v5096_v42  ;;  %8246 = vst [vmem:[#allocation65_spill] sm:$0xff] %v6638_v43  ;;  %v2164_v50 = vpack.c.bf16 %v1562_v52, %v1562_v52  ;;  %v2163_v48 = vpack.c.bf16 %v1560_v46, %v1560_v46  ;;  %v5163_v52 = vld [vmem:[%s6271_s29 + $0x2d0] sm:$0xff] }
 0x1f2   : > { %1943 = vmatmul.bf16.gmra.mxu2 %v5162_v60  ;;  %v6648_v60 = vpop.f32.mrf.mxu3 }
 0x1f3   : > { %v2425_v0 = vunpack.c.l.bf16 %v2169_v38  ;;  %v1995_v38 = vadd.f32 %v6317_v44, %v6462_v25  ;;  %v5424_v25 = vpop.eup %5423  ;;  %v2419_v46 = vunpack.c.l.bf16 %v2163_v48 }
 0x1f5   : > { %v6643_v42 = vpop.f32.mrf.mxu2  ;;  %5425 = vtanh.f32 %v2425_v0  ;;  %v2337_v62 = vpack.c.bf16 %v1995_v38, %v1995_v38 }
 0x1f6   : > { %8247 = vst [vmem:[#allocation66_spill] sm:$0xff] %v6643_v42  ;;  %v1576_v55 = vpop.f32.mrf.mxu0  ;;  %5427 = vtanh.f32 %v2424_v11  ;;  %v2338_v42 = vpack.c.bf16 %v1997_v28, %v1997_v28  ;;  %v3104_v11 = vpack.c.bf16 %v5424_v25, %v5424_v25  ;;  %v5135_v25 = vld [vmem:[%s6271_s29 + $0x1f0] sm:$0xff] }
 0x1f7   : > { %v1577_v4 = vadd.f32 %v6317_v44, %v1576_v55  ;;  %v6659_v20 = vpop.f32.mrf.mxu1  ;;  %5429 = vtanh.f32 %v2423_v12  ;;  %v2593_v38 = vunpack.c.l.bf16 %v2337_v62 }
 0x1f8   : > { %8248 = vst [vmem:[#allocation67_spill] sm:$0xff] %v6659_v20  ;;  %v6670_v43 = vunpack.c.l.b16 %v3104_v11  ;;  %v6680_v11 = vld [vmem:[#allocation8] ss:$0 sm:$0xff] }
 0x1f9   : > { %v2170_v6 = vpack.c.bf16 %v1577_v4, %v1577_v4  ;;  %v3103_v4 = vpack.c.bf16 %v5422_v51, %v5422_v51  ;;  %v2594_v51 = vunpack.c.l.bf16 %v2338_v42 }
 0x1fa   : > { %v6664_v17 = vpop.f32.mrf.mxu3  ;;  %8251 = vst [vmem:[#allocation70_spill] sm:$0xff] %v6670_v43 }
 0x1fb   : > { %v2426_v55 = vunpack.c.l.bf16 %v2170_v6  ;;  %v5426_v13 = vpop.eup %5425  ;;  %v2420_v6 = vunpack.c.l.bf16 %v2164_v50  ;;  %v6668_v20 = vunpack.c.l.b16 %v3103_v4 }
 0x1fc   : > { %v5428_v12 = vpop.eup %5427  ;;  %v2937_v28 = vpack.c.bf16 %v5426_v13, %v5426_v13 }
 0x1fd   : > { %5431 = vtanh.f32 %v2426_v55  ;;  %v6662_v0 = vpop.f32.mrf.mxu2  ;;  %v5430_v55 = vpop.eup %5429  ;;  %8250 = vst [vmem:[#allocation69_spill] sm:$0xff] %v6668_v20 }
 0x1fe   : > { %8249 = vst [vmem:[#allocation68_spill] sm:$0xff] %v6662_v0  ;;  %v1579_v49 = vpop.f32.mrf.mxu0  ;;  %5433 = vtanh.f32 %v2422_v41  ;;  %v2936_v41 = vpack.c.bf16 %v5428_v12, %v5428_v12  ;;  %v2935_v42 = vpack.c.bf16 %v5430_v55, %v5430_v55  ;;  %1808 = vmatmul.bf16.gmra.mxu1 %v5135_v25  ;;  %v2000_v55 = vadd.f32 %v6680_v11, %v6480_v63 }
 0x1ff   : > { %v1580_v23 = vadd.f32 %v6317_v44, %v1579_v49  ;;  %5435 = vtanh.f32 %v2421_v18  ;;  %v6672_v50 = vpop.f32.mrf.mxu1  ;;  %v5191_v49 = vld [vmem:[%s6271_s29 + $0x3b0] sm:$0xff] }
 0x200   : > { %5437 = vtanh.f32 %v2420_v6  ;;  %8252 = vst [vmem:[#allocation71_spill] sm:$0xff] %v6672_v50  ;;  %v3238_v12 = vunpack.c.l.b16 %v2936_v41  ;;  %2088 = vmatmul.bf16.gmra.mxu3 %v5191_v49  ;;  %v3237_v25 = vunpack.c.l.b16 %v2935_v42  ;;  %v2339_v63 = vpack.c.bf16 %v2000_v55, %v2000_v55 }
 0x201   : > { %v2171_v14 = vpack.c.bf16 %v1580_v23, %v1580_v23  ;;  %1618 = vmatmul.bf16.gmra.mxu0 %v5097_v8  ;;  %5439 = vtanh.f32 %v2593_v38  ;;  %v3239_v8 = vunpack.c.l.b16 %v2937_v28 }
 0x202   : > { %1948 = vmatmul.bf16.gmra.mxu2 %v5163_v52  ;;  %5441 = vtanh.f32 %v2419_v46  ;;  %v6678_v52 = vpop.f32.mrf.mxu3 }
 0x203   : > { %v5432_v0 = vpop.eup %5431  ;;  %v2427_v23 = vunpack.c.l.bf16 %v2171_v14  ;;  %5443 = vtanh.f32 %v2594_v51 }
 0x204   : > { %v2938_v44 = vpack.c.bf16 %v5432_v0, %v5432_v0  ;;  %v5434_v62 = vpop.eup %5433 }
 0x205   : > { %v6675_v48 = vpop.f32.mrf.mxu2  ;;  %v5436_v13 = vpop.eup %5435  ;;  %v2934_v46 = vpack.c.bf16 %v5434_v62, %v5434_v62  ;;  %5445 = vtanh.f32 %v2427_v23  ;;  %v3255_v62 = vpack.c.b16 %v3238_v12, %v3237_v25  ;;  %v5098_v23 = vld [vmem:[%s6271_s29 + $0xc8] sm:$0xff] }
 0x206   : > { %8253 = vst [vmem:[#allocation72_spill] sm:$0xff] %v6675_v48  ;;  %v1581_v18 = vpop.f32.mrf.mxu0  ;;  %v3240_v4 = vunpack.c.l.b16 %v2938_v44  ;;  %v5438_v14 = vpop.eup %5437  ;;  %v2002_v44 = vadd.f32 %v6680_v11, %v6497_v58 }
 0x207   : > { %v1582_v0 = vadd.f32 %v6680_v11, %v1581_v18  ;;  %v5440_v28 = vpop.eup %5439  ;;  %v2933_v18 = vpack.c.bf16 %v5436_v13, %v5436_v13  ;;  %v2932_v49 = vpack.c.bf16 %v5438_v14, %v5438_v14 }
 0x208   : > { %v3256_v38 = vpack.c.b16 %v3240_v4, %v3239_v8  ;;  %v5442_v48 = vpop.eup %5441  ;;  %v6689_v8 = vpop.f32.mrf.mxu1  ;;  %v3236_v4 = vunpack.c.l.b16 %v2934_v46  ;;  %v2340_v43 = vpack.c.bf16 %v2002_v44, %v2002_v44  ;;  %v5164_v46 = vld [vmem:[%s6271_s29 + $0x2d8] sm:$0xff] }
 0x209   : > { %v2172_v51 = vpack.c.bf16 %v1582_v0, %v1582_v0  ;;  %8254 = vst [vmem:[#allocation73_spill] sm:$0xff] %v6689_v8  ;;  %v5444_v41 = vpop.eup %5443  ;;  %v2931_v20 = vpack.c.bf16 %v5442_v48, %v5442_v48  ;;  %v3235_v13 = vunpack.c.l.b16 %v2933_v18  ;;  %v3234_v14 = vunpack.c.l.b16 %v2932_v49 }
 0x20a   : > { %3286 = vmatpush.bf16.msrb.mxu2 %v3256_v38  ;;  %v6694_v42 = vpop.f32.mrf.mxu3  ;;  %v3106_v8 = vpack.c.bf16 %v5444_v41, %v5444_v41 }
 0x20b   : > { %v2428_v6 = vunpack.c.l.bf16 %v2172_v51  ;;  %v5446_v38 = vpop.eup %5445  ;;  %v3105_v51 = vpack.c.bf16 %v5440_v28, %v5440_v28  ;;  %v3254_v25 = vpack.c.b16 %v3236_v4, %v3235_v13  ;;  %v3233_v44 = vunpack.c.l.b16 %v2931_v20  ;;  %v5136_v4 = vld [vmem:[%s6271_s29 + $0x1f8] sm:$0xff] }
 0x20c   : > { %v2939_v48 = vpack.c.bf16 %v5446_v38, %v5446_v38  ;;  %v6700_v50 = vunpack.c.l.b16 %v3106_v8 }
 0x20d   : > { %5447 = vtanh.f32 %v2428_v6  ;;  %v6692_v0 = vpop.f32.mrf.mxu2  ;;  %v2595_v6 = vunpack.c.l.bf16 %v2339_v63  ;;  %v3253_v28 = vpack.c.b16 %v3234_v14, %v3233_v44  ;;  %v8260_v14 = vpack.c.b16 %v6576_v10, %v6574_v26 }
 0x20e   : > { %8255 = vst [vmem:[#allocation74_spill] sm:$0xff] %v6692_v0  ;;  %v1584_v58 = vpop.f32.mrf.mxu0  ;;  %3287 = vmatpush.bf16.msrb.mxu2 %v3255_v62  ;;  %v2596_v0 = vunpack.c.l.bf16 %v2340_v43  ;;  %v6698_v62 = vunpack.c.l.b16 %v3105_v51  ;;  %v6710_v13 = vunpack.c.l.b16 %v2939_v48  ;;  %1813 = vmatmul.bf16.gmra.mxu1 %v5136_v4 }
 0x20f   : > { %v1585_v12 = vadd.f32 %v6680_v11, %v1584_v58  ;;  %8257 = vst [vmem:[#allocation76_spill] sm:$0xff] %v6700_v50  ;;  %5449 = vtanh.f32 %v2595_v6 }
 0x210   : > { %8256 = vst [vmem:[#allocation75_spill] sm:$0xff] %v6698_v62  ;;  %v6702_v58 = vpop.f32.mrf.mxu1  ;;  %5451 = vtanh.f32 %v2596_v0 }
 0x211   : > { %v2173_v55 = vpack.c.bf16 %v1585_v12, %v1585_v12  ;;  %1623 = vmatmul.bf16.gmra.mxu0 %v5098_v23  ;;  %8258 = vst [vmem:[#allocation77_spill] sm:$0xff] %v6702_v58  ;;  %v5192_v23 = vld [vmem:[%s6271_s29 + $0x3b8] sm:$0xff]  ;;  %v2005_v12 = vadd.f32 %v6680_v11, %v6513_v34 }
 0x212   : > { %3288 = vmatpush.bf16.msrb.mxu2 %v3254_v25  ;;  %v6708_v20 = vpop.f32.mrf.mxu3  ;;  %2093 = vmatmul.bf16.gmra.mxu3 %v5192_v23  ;;  %v2007_v25 = vadd.f32 %v6680_v11, %v6530_v19  ;;  %v8263_v19 = vpack.c.b16 %v6549_v9, %v6547_v36 }
 0x213   : > { %v5448_v18 = vpop.eup %5447  ;;  %1953 = vmatmul.bf16.gmra.mxu2 %v5164_v46  ;;  %v2429_v49 = vunpack.c.l.bf16 %v2173_v55 }
 0x214   : > { %v2940_v41 = vpack.c.bf16 %v5448_v18, %v5448_v18  ;;  %v2341_v18 = vpack.c.bf16 %v2005_v12, %v2005_v12  ;;  %v2342_v34 = vpack.c.bf16 %v2007_v25, %v2007_v25 }
 0x215   : > { %v6705_v63 = vpop.f32.mrf.mxu2  ;;  %5453 = vtanh.f32 %v2429_v49  ;;  %v5450_v6 = vpop.eup %5449 }
 0x216   : > { %8259 = vst [vmem:[#allocation78_spill] sm:$0xff] %v6705_v63  ;;  %v1586_v43 = vpop.f32.mrf.mxu0  ;;  %3289 = vmatpush.bf16.msrb.mxu2 %v3253_v28  ;;  %v6712_v8 = vunpack.c.l.b16 %v2940_v41  ;;  %v5452_v48 = vpop.eup %5451  ;;  %v5099_v28 = vld [vmem:[%s6271_s29 + $0xd0] sm:$0xff]  ;;  %v3107_v10 = vpack.c.bf16 %v5450_v6, %v5450_v6  ;;  %v2597_v12 = vunpack.c.l.bf16 %v2341_v18 }
 0x217   : > { %v1587_v38 = vadd.f32 %v6680_v11, %v1586_v43  ;;  %v3108_v43 = vpack.c.bf16 %v5452_v48, %v5452_v48 }
 0x218   : > { %v6726_v44 = vpop.f32.mrf.mxu1  ;;  %v6741_v9 = vunpack.c.l.b16 %v3107_v10 }
 0x219   : > { %v2174_v46 = vpack.c.bf16 %v1587_v38, %v1587_v38  ;;  %8261 = vst [vmem:[#allocation79_spill] sm:$0xff] %v6726_v44  ;;  %v5165_v38 = vld [vmem:[%s6271_s29 + $0x2e0] sm:$0xff] }
 0x21a   : > { %3290 = vmatpush.bf16.msrb.mxu2 %v8260_v14  ;;  %v6734_v49 = vpop.f32.mrf.mxu3  ;;  %v2598_v14 = vunpack.c.l.bf16 %v2342_v34  ;;  %8265 = vst [vmem:[#allocation81_spill] sm:$0xff] %v6741_v9 }
 0x21b   : > { %v2430_v55 = vunpack.c.l.bf16 %v2174_v46  ;;  %v5454_v26 = vpop.eup %5453 }
 0x21c   : > { %v2941_v25 = vpack.c.bf16 %v5454_v26, %v5454_v26 }
 0x21d   : > { %5455 = vtanh.f32 %v2430_v55  ;;  %v6729_v41 = vpop.f32.mrf.mxu2  ;;  %v8264_v55 = vpack.c.b16 %v6525_v32, %v6523_v31  ;;  %v8269_v31 = vpack.c.b16 %v6489_v2, %v6487_v3  ;;  %v5193_v32 = vld [vmem:[%s6271_s29 + $0x3c0] sm:$0xff]  ;;  %v2010_v3 = vadd.f32 %v6680_v11, %v6540_v30 }
 0x21e   : > { %8262 = vst [vmem:[#allocation80_spill] sm:$0xff] %v6729_v41  ;;  %v1589_v4 = vpop.f32.mrf.mxu0  ;;  %3291 = vmatpush.bf16.msrb.mxu2 %v8263_v19  ;;  %v6743_v19 = vunpack.c.l.b16 %v3108_v43  ;;  %5457 = vtanh.f32 %v2597_v12  ;;  %v6756_v10 = vunpack.c.l.b16 %v2941_v25 }
 0x21f   : > { %v1590_v23 = vadd.f32 %v6680_v11, %v1589_v4  ;;  %v5137_v4 = vld [vmem:[%s6271_s29 + $0x200] sm:$0xff]  ;;  %5459 = vtanh.f32 %v2598_v14 }
 0x220   : > { %8266 = vst [vmem:[#allocation82_spill] sm:$0xff] %v6743_v19  ;;  %v6745_v48 = vpop.f32.mrf.mxu1  ;;  %1818 = vmatmul.bf16.gmra.mxu1 %v5137_v4  ;;  %v5100_v4 = vld [vmem:[%s6271_s29 + $0xd8] sm:$0xff]  ;;  %v1840_v19 = vadd.f32 %v6680_v11, %v6352_v29 }
 0x221   : > { %v2175_v46 = vpack.c.bf16 %v1590_v23, %v1590_v23  ;;  %1628 = vmatmul.bf16.gmra.mxu0 %v5099_v28  ;;  %8267 = vst [vmem:[#allocation83_spill] sm:$0xff] %v6745_v48 }
 0x222   : > { %3292 = vmatpush.bf16.msrb.mxu2 %v8264_v55  ;;  %v6754_v26 = vpop.f32.mrf.mxu3  ;;  %2098 = vmatmul.bf16.gmra.mxu3 %v5193_v32 }
 0x223   : > { %v5456_v36 = vpop.eup %5455  ;;  %1958 = vmatmul.bf16.gmra.mxu2 %v5165_v38  ;;  %v2431_v18 = vunpack.c.l.bf16 %v2175_v46  ;;  %v2012_v46 = vadd.f32 %v6680_v11, %v6554_v57  ;;  %v5166_v38 = vld [vmem:[%s6271_s29 + $0x2e8] sm:$0xff] }
 0x224   : > { %v2942_v6 = vpack.c.bf16 %v5456_v36, %v5456_v36  ;;  %v5458_v14 = vpop.eup %5457 }
 0x225   : > { %v6748_v28 = vpop.f32.mrf.mxu2  ;;  %5461 = vtanh.f32 %v2431_v18  ;;  %v5460_v55 = vpop.eup %5459  ;;  %v3109_v18 = vpack.c.bf16 %v5458_v14, %v5458_v14  ;;  %v5138_v14 = vld [vmem:[%s6271_s29 + $0x208] sm:$0xff] }
 0x226   : > { %8268 = vst [vmem:[#allocation84_spill] sm:$0xff] %v6748_v28  ;;  %v1591_v34 = vpop.f32.mrf.mxu0  ;;  %3293 = vmatpush.bf16.msrb.mxu2 %v8269_v31  ;;  %v6758_v43 = vunpack.c.l.b16 %v2942_v6  ;;  %v2343_v6 = vpack.c.bf16 %v2010_v3, %v2010_v3  ;;  %v2344_v31 = vpack.c.bf16 %v2012_v46, %v2012_v46 }
 0x227   : > { %v1592_v23 = vadd.f32 %v6680_v11, %v1591_v34  ;;  %v6778_v41 = vunpack.c.l.b16 %v3109_v18  ;;  %v2015_v18 = vadd.f32 %v6680_v11, %v6565_v56 }
 0x228   : > { %v6769_v36 = vpop.f32.mrf.mxu1  ;;  %v2600_v3 = vunpack.c.l.bf16 %v2344_v31 }
 0x229   : > { %v2176_v2 = vpack.c.bf16 %v1592_v23, %v1592_v23  ;;  %8270 = vst [vmem:[#allocation85_spill] sm:$0xff] %v6769_v36  ;;  %v3110_v23 = vpack.c.bf16 %v5460_v55, %v5460_v55 }
 0x22a   : > { %v6774_v51 = vpop.f32.mrf.mxu3  ;;  %8272 = vst [vmem:[#allocation87_spill] sm:$0xff] %v6778_v41 }
 0x22b   : > { %v2432_v25 = vunpack.c.l.bf16 %v2176_v2  ;;  %v5462_v30 = vpop.eup %5461  ;;  %v2599_v2 = vunpack.c.l.bf16 %v2343_v6  ;;  %v6780_v46 = vunpack.c.l.b16 %v3110_v23 }
 0x22d   : > { %5463 = vtanh.f32 %v2432_v25  ;;  %v6772_v34 = vpop.f32.mrf.mxu2  ;;  %v2943_v25 = vpack.c.bf16 %v5462_v30, %v5462_v30  ;;  %8273 = vst [vmem:[#allocation88_spill] sm:$0xff] %v6780_v46  ;;  %v5103_v46 = vld [vmem:[%s6271_s29 + $0xf0] sm:$0xff] }
 0x22e   : > { %8271 = vst [vmem:[#allocation86_spill] sm:$0xff] %v6772_v34  ;;  %v1594_v32 = vpop.f32.mrf.mxu0  ;;  %5465 = vtanh.f32 %v2599_v2 }
 0x22f   : > { %v1595_v57 = vadd.f32 %v6680_v11, %v1594_v32  ;;  %5467 = vtanh.f32 %v2600_v3  ;;  %v6790_v31 = vunpack.c.l.b16 %v2943_v25 }
 0x230   : > { %v6782_v34 = vpop.f32.mrf.mxu1  ;;  %1823 = vmatmul.bf16.gmra.mxu1 %v5138_v14  ;;  %v2345_v14 = vpack.c.bf16 %v2015_v18, %v2015_v18 }
 0x231   : > { %v2177_v0 = vpack.c.bf16 %v1595_v57, %v1595_v57  ;;  %1633 = vmatmul.bf16.gmra.mxu0 %v5100_v4  ;;  %8274 = vst [vmem:[#allocation89_spill] sm:$0xff] %v6782_v34  ;;  %v5194_v57 = vld [vmem:[%s6271_s29 + $0x3c8] sm:$0xff] }
 0x232   : > { %v6788_v4 = vpop.f32.mrf.mxu3  ;;  %2103 = vmatmul.bf16.gmra.mxu3 %v5194_v57  ;;  %v2601_v36 = vunpack.c.l.bf16 %v2345_v14 }
 0x233   : > { %v5464_v12 = vpop.eup %5463  ;;  %1963 = vmatmul.bf16.gmra.mxu2 %v5166_v38  ;;  %v2433_v55 = vunpack.c.l.bf16 %v2177_v0  ;;  %8276 = vst [vmem:[#allocation91_spill] sm:$0xff] %v6788_v4 }
 0x234   : > { %v2944_v63 = vpack.c.bf16 %v5464_v12, %v5464_v12  ;;  %v5466_v2 = vpop.eup %5465 }
 0x235   : > { %v6785_v32 = vpop.f32.mrf.mxu2  ;;  %5469 = vtanh.f32 %v2433_v55  ;;  %v5468_v25 = vpop.eup %5467 }
 0x236   : > { %8275 = vst [vmem:[#allocation90_spill] sm:$0xff] %v6785_v32  ;;  %v1596_v6 = vpop.f32.mrf.mxu0  ;;  %v6792_v30 = vunpack.c.l.b16 %v2944_v63  ;;  %v2017_v63 = vadd.f32 %v6680_v11, %v6580_v47  ;;  %v3112_v32 = vpack.c.bf16 %v5468_v25, %v5468_v25  ;;  %v5167_v47 = vld [vmem:[%s6271_s29 + $0x2f0] sm:$0xff] }
 0x237   : > { %v1597_v38 = vadd.f32 %v6680_v11, %v1596_v6  ;;  %v5101_v6 = vld [vmem:[%s6271_s29 + $0xe0] sm:$0xff]  ;;  %v5195_v25 = vld [vmem:[%s6271_s29 + $0x3d0] sm:$0xff] }
 0x238   : > { %v6806_v57 = vpop.f32.mrf.mxu1  ;;  %v2346_v0 = vpack.c.bf16 %v2017_v63, %v2017_v63 }
 0x239   : > { %v2178_v23 = vpack.c.bf16 %v1597_v38, %v1597_v38  ;;  %8278 = vst [vmem:[#allocation93_spill] sm:$0xff] %v6806_v57  ;;  %v3111_v38 = vpack.c.bf16 %v5466_v2, %v5466_v2 }
 0x23a   : > { %v6810_v56 = vpop.f32.mrf.mxu3 }
 0x23b   : > { %v2434_v3 = vunpack.c.l.bf16 %v2178_v23  ;;  %8279 = vst [vmem:[#allocation94_spill] sm:$0xff] %v6810_v56  ;;  %v5470_v55 = vpop.eup %5469  ;;  %v2602_v23 = vunpack.c.l.bf16 %v2346_v0  ;;  %v6813_v34 = vunpack.c.l.b16 %v3111_v38  ;;  %v8320_v56 = vld [vmem:[#allocation23_spill] sm:$0xff] }
 0x23c   : > { %v2945_v18 = vpack.c.bf16 %v5470_v55, %v5470_v55 }
 0x23d   : > { %5471 = vtanh.f32 %v2434_v3  ;;  %v6804_v12 = vpop.f32.mrf.mxu2  ;;  %8280 = vst [vmem:[#allocation95_spill] sm:$0xff] %v6813_v34 }
 0x23e   : > { %8277 = vst [vmem:[#allocation92_spill] sm:$0xff] %v6804_v12  ;;  %v6808_v28 = vpop.f32.mrf.mxu0  ;;  %v6815_v12 = vunpack.c.l.b16 %v3112_v32  ;;  %5473 = vtanh.f32 %v2601_v36  ;;  %v6824_v0 = vunpack.c.l.b16 %v2945_v18  ;;  %v1830_v36 = vadd.f32 %v6680_v11, %v6324_v53 }
 0x23f   : > { %5475 = vtanh.f32 %v2602_v23  ;;  %v5102_v23 = vld [vmem:[%s6271_s29 + $0xe8] sm:$0xff] }
 0x240   : > { %8281 = vst [vmem:[#allocation96_spill] sm:$0xff] %v6815_v12  ;;  %v6828_v55 = vpop.f32.mrf.mxu1 }
 0x241   : > { %1638 = vmatmul.bf16.gmra.mxu0 %v5101_v6  ;;  %8284 = vst [vmem:[#allocation99_spill] sm:$0xff] %v6828_v55  ;;  %v5168_v55 = vld [vmem:[%s6271_s29 + $0x2f8] sm:$0xff] }
 0x242   : > { %v6822_v14 = vpop.f32.mrf.mxu3  ;;  %2108 = vmatmul.bf16.gmra.mxu3 %v5195_v25 }
 0x243   : > { %v5472_v3 = vpop.eup %5471  ;;  %1968 = vmatmul.bf16.gmra.mxu2 %v5167_v47  ;;  %8283 = vst [vmem:[#allocation98_spill] sm:$0xff] %v6822_v14 }
 0x244   : > { %v2946_v63 = vpack.c.bf16 %v5472_v3, %v5472_v3  ;;  %v5474_v38 = vpop.eup %5473 }
 0x245   : > { %v6817_v57 = vpop.f32.mrf.mxu2  ;;  %v5476_v47 = vpop.eup %5475 }
 0x246   : > { %8282 = vst [vmem:[#allocation97_spill] sm:$0xff] %v6817_v57  ;;  %v6819_v2 = vpop.f32.mrf.mxu0  ;;  %v6826_v6 = vunpack.c.l.b16 %v2946_v63  ;;  %v3113_v63 = vpack.c.bf16 %v5474_v38, %v5474_v38  ;;  %v3114_v48 = vpack.c.bf16 %v5476_v47, %v5476_v47  ;;  %v5196_v47 = vld [vmem:[%s6271_s29 + $0x3d8] sm:$0xff] }
 0x248   : > { %v6842_v62 = vpop.f32.mrf.mxu1  ;;  %v6844_v25 = vunpack.c.l.b16 %v3113_v63  ;;  %v6846_v32 = vunpack.c.l.b16 %v3114_v48  ;;  %v1835_v63 = vadd.f32 %v6680_v11, %v6334_v7  ;;  %v1842_v7 = vadd.f32 %v6680_v11, %v6364_v39 }
 0x249   : > { %8287 = vst [vmem:[#allocation102_spill] sm:$0xff] %v6842_v62  ;;  %v1845_v39 = vadd.f32 %v6680_v11, %v6372_v54  ;;  %v1850_v54 = vadd.f32 %v6680_v11, %v6393_v15  ;;  %v1705_v15 = vadd.f32 %v6680_v11, %v6368_v45 }
 0x24a   : > { %v6839_v18 = vpop.f32.mrf.mxu3  ;;  %8288 = vst [vmem:[#allocation103_spill] sm:$0xff] %v6844_v25  ;;  %v2273_v62 = vpack.c.bf16 %v1835_v63, %v1835_v63  ;;  %v2276_v63 = vpack.c.bf16 %v1842_v7, %v1842_v7 }
 0x24b   : > { %8286 = vst [vmem:[#allocation101_spill] sm:$0xff] %v6839_v18  ;;  %v2279_v25 = vpack.c.bf16 %v1850_v54, %v1850_v54 }
 0x24c   : > { %8289 = vst [vmem:[#allocation104_spill] sm:$0xff] %v6846_v32  ;;  %v2529_v48 = vunpack.c.l.bf16 %v2273_v62  ;;  %v1847_v62 = vadd.f32 %v6680_v11, %v6384_v1  ;;  %v1702_v1 = vadd.f32 %v6680_v11, %v6361_v35 }
 0x24d   : > { %v6835_v3 = vpop.f32.mrf.mxu2 }
 0x24e   : > { %8285 = vst [vmem:[#allocation100_spill] sm:$0xff] %v6835_v3  ;;  %v6837_v57 = vpop.f32.mrf.mxu0  ;;  %v1832_v3 = vadd.f32 %v6680_v11, %v6328_v59  ;;  %v1837_v59 = vadd.f32 %v6680_v11, %v6344_v16  ;;  %v2275_v16 = vpack.c.bf16 %v1840_v19, %v1840_v19 }
 0x250   : > { %v2272_v53 = vpack.c.bf16 %v1832_v3, %v1832_v3  ;;  %v2531_v29 = vunpack.c.l.bf16 %v2275_v16  ;;  %v2277_v16 = vpack.c.bf16 %v1845_v39, %v1845_v39  ;;  %v5104_v39 = vld [vmem:[%s6271_s29 + $0xf8] sm:$0xff] }
 0x251   : > { %1643 = vmatmul.bf16.gmra.mxu0 %v5102_v23 }
 0x252   : > { %v6857_v23 = vpop.f32.mrf.mxu3  ;;  %2113 = vmatmul.bf16.gmra.mxu3 %v5196_v47  ;;  %v2528_v41 = vunpack.c.l.bf16 %v2272_v53  ;;  %v2532_v53 = vunpack.c.l.bf16 %v2276_v63 }
 0x253   : > { %1973 = vmatmul.bf16.gmra.mxu2 %v5168_v55  ;;  %8291 = vst [vmem:[#allocation106_spill] sm:$0xff] %v6857_v23  ;;  %v2271_v55 = vpack.c.bf16 %v1830_v36, %v1830_v36  ;;  %v2274_v36 = vpack.c.bf16 %v1837_v59, %v1837_v59 }
 0x255   : > { %v6852_v50 = vpop.f32.mrf.mxu2  ;;  %v2527_v9 = vunpack.c.l.bf16 %v2271_v55  ;;  %v2530_v55 = vunpack.c.l.bf16 %v2274_v36 }
 0x256   : > { %8290 = vst [vmem:[#allocation105_spill] sm:$0xff] %v6852_v50  ;;  %v6854_v38 = vpop.f32.mrf.mxu0  ;;  %v6865_v50 = vpop.f32.mrf.mxu1 }
 0x257   : > { %8292 = vst [vmem:[#allocation107_spill] sm:$0xff] %v6865_v50  ;;  %5477 = vtanh.f32 %v2527_v9 }
 0x258   : > { %5479 = vtanh.f32 %v2528_v41  ;;  %v5197_v41 = vld [vmem:[%s6271_s29 + $0x3e0] sm:$0xff] }
 0x259   : > { %5481 = vtanh.f32 %v2529_v48  ;;  %v1700_v48 = vadd.f32 %v6680_v11, %v6348_v21 }
 0x25a   : > { %v6874_v3 = vpop.f32.mrf.mxu3  ;;  %5483 = vtanh.f32 %v2530_v55  ;;  %v2278_v55 = vpack.c.bf16 %v1847_v62, %v1847_v62 }
 0x25b   : > { %8294 = vst [vmem:[#allocation109_spill] sm:$0xff] %v6874_v3  ;;  %5485 = vtanh.f32 %v2531_v29  ;;  %v2219_v12 = vpack.c.bf16 %v1700_v48, %v1700_v48  ;;  %v8319_v3 = vld [vmem:[#allocation29_spill] sm:$0xff] }
 0x25c   : > { %5487 = vtanh.f32 %v2532_v53  ;;  %v2220_v53 = vpack.c.bf16 %v1702_v1, %v1702_v1  ;;  %v2534_v62 = vunpack.c.l.bf16 %v2278_v55 }
 0x25d   : > { %v6872_v34 = vpop.f32.mrf.mxu2 }
 0x25e   : > { %8293 = vst [vmem:[#allocation108_spill] sm:$0xff] %v6872_v34  ;;  %v1609_v47 = vpop.f32.mrf.mxu0  ;;  %v6880_v59 = vpop.f32.mrf.mxu1 }
 0x25f   : > { %8296 = vst [vmem:[#allocation111_spill] sm:$0xff] %v6880_v59  ;;  %v5478_v34 = vpop.eup %5477  ;;  %v1852_v59 = vadd.f32 %v6680_v11, %v6404_v24  ;;  %v1855_v24 = vadd.f32 %v6680_v11, %v6411_v33  ;;  %v1610_v55 = vadd.f32 %v6680_v11, %v1609_v47  ;;  %v2476_v33 = vunpack.c.l.bf16 %v2220_v53 }
 0x260   : > { %v3039_v36 = vpack.c.bf16 %v5478_v34, %v5478_v34  ;;  %v2533_v34 = vunpack.c.l.bf16 %v2277_v16 }
 0x261   : > { %1648 = vmatmul.bf16.gmra.mxu0 %v5103_v46  ;;  %v5480_v46 = vpop.eup %5479 }
 0x262   : > { %v6885_v19 = vpop.f32.mrf.mxu3  ;;  %2118 = vmatmul.bf16.gmra.mxu3 %v5197_v41  ;;  %v5482_v7 = vpop.eup %5481  ;;  %v3040_v63 = vpack.c.bf16 %v5480_v46, %v5480_v46  ;;  %v6897_v41 = vunpack.c.l.b16 %v3039_v36  ;;  %v2475_v36 = vunpack.c.l.bf16 %v2219_v12  ;;  %5489 = vtanh.f32 %v2533_v34 }
 0x263   : > { %8297 = vst [vmem:[#allocation112_spill] sm:$0xff] %v6885_v19  ;;  %v5484_v21 = vpop.eup %5483  ;;  %v3041_v29 = vpack.c.bf16 %v5482_v7, %v5482_v7  ;;  %5491 = vtanh.f32 %v2534_v62  ;;  %v2183_v34 = vpack.c.bf16 %v1610_v55, %v1610_v55 }
 0x264   : > { %v5486_v35 = vpop.eup %5485  ;;  %v6902_v46 = vunpack.c.l.b16 %v3040_v63  ;;  %v3042_v45 = vpack.c.bf16 %v5484_v21, %v5484_v21  ;;  %v2221_v63 = vpack.c.bf16 %v1705_v15, %v1705_v15  ;;  %v2281_v21 = vpack.c.bf16 %v1855_v24, %v1855_v24 }
 0x265   : > { %v6878_v50 = vpop.f32.mrf.mxu2  ;;  %v5488_v7 = vpop.eup %5487  ;;  %v6910_v44 = vunpack.c.l.b16 %v3041_v29  ;;  %v3043_v58 = vpack.c.bf16 %v5486_v35, %v5486_v35  ;;  %5493 = vtanh.f32 %v2475_v36  ;;  %v1707_v15 = vadd.f32 %v6680_v11, %v6381_v61 }
 0x266   : > { %8295 = vst [vmem:[#allocation110_spill] sm:$0xff] %v6878_v50  ;;  %v1611_v9 = vpop.f32.mrf.mxu0  ;;  %v2280_v50 = vpack.c.bf16 %v1852_v59, %v1852_v59  ;;  %v6913_v59 = vpop.f32.mrf.mxu1  ;;  %v2477_v47 = vunpack.c.l.bf16 %v2221_v63  ;;  %v1600_v63 = vadd.f32 %v6680_v11, %v6808_v28 }
 0x267   : > { %v1612_v16 = vadd.f32 %v6680_v11, %v1611_v9  ;;  %8300 = vst [vmem:[#allocation115_spill] sm:$0xff] %v6913_v59  ;;  %v6915_v9 = vunpack.c.l.b16 %v3042_v45  ;;  %v6921_v53 = vunpack.c.l.b16 %v3043_v58  ;;  %v1602_v58 = vadd.f32 %v6680_v11, %v6819_v2 }
 0x268   : > { %v2536_v12 = vunpack.c.l.bf16 %v2280_v50  ;;  %v1605_v50 = vadd.f32 %v6680_v11, %v6837_v57  ;;  %v5490_v61 = vpop.eup %5489 }
 0x269   : > { %v2184_v29 = vpack.c.bf16 %v1612_v16, %v1612_v16  ;;  %v5492_v36 = vpop.eup %5491  ;;  %v1710_v16 = vadd.f32 %v6680_v11, %v6389_v5 }
 0x26a   : > { %v6906_v54 = vpop.f32.mrf.mxu3  ;;  %v2181_v55 = vpack.c.bf16 %v1605_v50, %v1605_v50  ;;  %v3046_v28 = vpack.c.bf16 %v5492_v36, %v5492_v36 }
 0x26b   : > { %8299 = vst [vmem:[#allocation114_spill] sm:$0xff] %v6906_v54  ;;  %v3044_v54 = vpack.c.bf16 %v5488_v7, %v5488_v7  ;;  %v2440_v45 = vunpack.c.l.bf16 %v2184_v29 }
 0x26d   : > { %v6900_v32 = vpop.f32.mrf.mxu2  ;;  %v6927_v62 = vunpack.c.l.b16 %v3044_v54  ;;  %v2222_v54 = vpack.c.bf16 %v1707_v15, %v1707_v15 }
 0x26e   : > { %8298 = vst [vmem:[#allocation113_spill] sm:$0xff] %v6900_v32  ;;  %v1614_v48 = vpop.f32.mrf.mxu0  ;;  %v2535_v32 = vunpack.c.l.bf16 %v2279_v25  ;;  %v1607_v25 = vadd.f32 %v6680_v11, %v6854_v38  ;;  %v2537_v38 = vunpack.c.l.bf16 %v2281_v21  ;;  %v6943_v29 = vpop.f32.mrf.mxu1 }
 0x26f   : > { %v1615_v1 = vadd.f32 %v6680_v11, %v1614_v48  ;;  %v5198_v48 = vld [vmem:[%s6271_s29 + $0x3e8] sm:$0xff]  ;;  %8303 = vst [vmem:[#allocation118_spill] sm:$0xff] %v6943_v29  ;;  %v2478_v50 = vunpack.c.l.bf16 %v2222_v54 }
 0x270   : > { %5495 = vtanh.f32 %v2535_v32  ;;  %v1857_v32 = vadd.f32 %v6680_v11, %v6416_v40  ;;  %v2182_v7 = vpack.c.bf16 %v1607_v25, %v1607_v25  ;;  %v5494_v40 = vpop.eup %5493  ;;  %v1712_v25 = vadd.f32 %v6680_v11, %v6401_v22 }
 0x271   : > { %v2185_v19 = vpack.c.bf16 %v1615_v1, %v1615_v1  ;;  %1653 = vmatmul.bf16.gmra.mxu0 %v5104_v39  ;;  %5497 = vtanh.f32 %v2476_v33  ;;  %v2439_v1 = vunpack.c.l.bf16 %v2183_v34 }
 0x272   : > { %5499 = vtanh.f32 %v2536_v12  ;;  %2123 = vmatmul.bf16.gmra.mxu3 %v5198_v48  ;;  %v3045_v12 = vpack.c.bf16 %v5490_v61, %v5490_v61  ;;  %v2282_v21 = vpack.c.bf16 %v1857_v32, %v1857_v32  ;;  %v2438_v15 = vunpack.c.l.bf16 %v2182_v7  ;;  %v5105_v61 = vld [vmem:[%s6271_s29 + $0x100] sm:$0xff] }
 0x273   : > { %v2441_v39 = vunpack.c.l.bf16 %v2185_v19  ;;  %v6935_v19 = vpop.f32.mrf.mxu3  ;;  %5501 = vtanh.f32 %v2477_v47  ;;  %v2180_v47 = vpack.c.bf16 %v1602_v58, %v1602_v58  ;;  %v2987_v48 = vpack.c.bf16 %v5494_v40, %v5494_v40 }
 0x274   : > { %8302 = vst [vmem:[#allocation117_spill] sm:$0xff] %v6935_v19  ;;  %v2437_v32 = vunpack.c.l.bf16 %v2181_v55  ;;  %v2538_v7 = vunpack.c.l.bf16 %v2282_v21  ;;  %v2224_v54 = vpack.c.bf16 %v1712_v25, %v1712_v25  ;;  %v6957_v55 = vunpack.c.l.b16 %v3046_v28 }
 0x275   : > { %v6925_v35 = vpop.f32.mrf.mxu2  ;;  %5503 = vtanh.f32 %v2441_v39  ;;  %v2223_v39 = vpack.c.bf16 %v1710_v16, %v1710_v16  ;;  %v2436_v16 = vunpack.c.l.bf16 %v2180_v47 }
 0x276   : > { %8301 = vst [vmem:[#allocation116_spill] sm:$0xff] %v6925_v35  ;;  %v1616_v24 = vpop.f32.mrf.mxu0  ;;  %v5496_v33 = vpop.eup %5495  ;;  %5505 = vtanh.f32 %v2537_v38  ;;  %v2179_v38 = vpack.c.bf16 %v1600_v63, %v1600_v63  ;;  %v6955_v63 = vunpack.c.l.b16 %v3045_v12 }
 0x277   : > { %v1617_v57 = vadd.f32 %v6680_v11, %v1616_v24  ;;  %v5498_v5 = vpop.eup %5497  ;;  %5507 = vtanh.f32 %v2440_v45  ;;  %v3047_v29 = vpack.c.bf16 %v5496_v33, %v5496_v33  ;;  %v1715_v45 = vadd.f32 %v6680_v11, %v6407_v27 }
 0x278   : > { %v6945_v24 = vpop.eup %5499  ;;  %5509 = vtanh.f32 %v2439_v1  ;;  %v2988_v58 = vpack.c.bf16 %v5498_v5, %v5498_v5  ;;  %v6959_v5 = vunpack.c.l.b16 %v2987_v48  ;;  %v2435_v21 = vunpack.c.l.bf16 %v2179_v38 }
 0x279   : > { %v2186_v2 = vpack.c.bf16 %v1617_v57, %v1617_v57  ;;  %v6950_v57 = vpop.eup %5501  ;;  %v6963_v47 = vunpack.c.l.b16 %v3047_v29  ;;  %v6971_v29 = vpop.f32.mrf.mxu1 }
 0x27a   : > { %v6965_v28 = vunpack.c.l.b16 %v2988_v58  ;;  %v2989_v48 = vpack.c.bf16 %v6950_v57, %v6950_v57  ;;  %8306 = vst [vmem:[#allocation121_spill] sm:$0xff] %v6971_v29  ;;  %v1717_v58 = vadd.f32 %v6680_v11, %v6413_v37 }
 0x27b   : > { %v2442_v34 = vunpack.c.l.bf16 %v2186_v2  ;;  %v5504_v36 = vpop.eup %5503  ;;  %v6961_v59 = vpop.f32.mrf.mxu3 }
 0x27c   : > { %v5506_v40 = vpop.eup %5505  ;;  %8305 = vst [vmem:[#allocation120_spill] sm:$0xff] %v6961_v59  ;;  %v2953_v12 = vpack.c.bf16 %v5504_v36, %v5504_v36 }
 0x27d   : > { %5511 = vtanh.f32 %v2442_v34  ;;  %v6948_v22 = vpop.f32.mrf.mxu2  ;;  %v2479_v34 = vunpack.c.l.bf16 %v2223_v39  ;;  %v5508_v33 = vpop.eup %5507  ;;  %v2480_v39 = vunpack.c.l.bf16 %v2224_v54 }
 0x27e   : > { %8304 = vst [vmem:[#allocation119_spill] sm:$0xff] %v6948_v22  ;;  %v1619_v2 = vpop.f32.mrf.mxu0  ;;  %5513 = vtanh.f32 %v2438_v15  ;;  %v5510_v25 = vpop.eup %5509  ;;  %v2225_v15 = vpack.c.bf16 %v1715_v45, %v1715_v45 }
 0x27f   : > { %v1620_v1 = vadd.f32 %v6680_v11, %v1619_v2  ;;  %5515 = vtanh.f32 %v2478_v50  ;;  %v3048_v50 = vpack.c.bf16 %v6945_v24, %v6945_v24 }
 0x280   : > { %5517 = vtanh.f32 %v2437_v32  ;;  %v2952_v32 = vpack.c.bf16 %v5508_v33, %v5508_v33  ;;  %v2481_v54 = vunpack.c.l.bf16 %v2225_v15 }
 0x281   : > { %v2187_v27 = vpack.c.bf16 %v1620_v1, %v1620_v1  ;;  %1658 = vmatmul.bf16.gmra.mxu0 %v5105_v61  ;;  %5519 = vtanh.f32 %v2538_v7  ;;  %v3049_v7 = vpack.c.bf16 %v5506_v40, %v5506_v40  ;;  %v3351_v1 = vunpack.c.l.b16 %v2953_v12  ;;  %v8308_v40 = vld [vmem:[#allocation35_spill] sm:$0xff] }
 0x282   : > { %5521 = vtanh.f32 %v2436_v16  ;;  %v2951_v16 = vpack.c.bf16 %v5510_v25, %v5510_v25  ;;  %v6980_v22 = vunpack.c.l.b16 %v3048_v50  ;;  %v1735_v29 = vadd.f32 %v6680_v11, %v8308_v40 }
 0x283   : > { %v5512_v2 = vpop.eup %5511  ;;  %5523 = vtanh.f32 %v2479_v34  ;;  %v2443_v45 = vunpack.c.l.bf16 %v2187_v27  ;;  %v8309_v27 = vld [vmem:[#allocation37_spill] sm:$0xff]  ;;  %v3350_v25 = vunpack.c.l.b16 %v2952_v32  ;;  %v6991_v50 = vunpack.c.l.b16 %v3049_v7 }
 0x284   : > { %v2954_v38 = vpack.c.bf16 %v5512_v2, %v5512_v2  ;;  %v5514_v61 = vpop.eup %5513  ;;  %5525 = vtanh.f32 %v2435_v21  ;;  %v5199_v2 = vld [vmem:[%s6271_s29 + $0x3f0] sm:$0xff]  ;;  %v3349_v19 = vunpack.c.l.b16 %v2951_v16 }
 0x285   : > { %v6975_v36 = vpop.f32.mrf.mxu2  ;;  %v6977_v24 = vpop.eup %5515  ;;  %5527 = vtanh.f32 %v2480_v39  ;;  %v2950_v35 = vpack.c.bf16 %v5514_v61, %v5514_v61  ;;  %2128 = vmatmul.bf16.gmra.mxu3 %v5199_v2  ;;  %8311 = vst [vmem:[#allocation37_spill] sm:$0xff] %v6991_v50  ;;  %v8313_v61 = vld [vmem:[#allocation33_spill] sm:$0xff] }
 0x286   : > { %8307 = vst [vmem:[#allocation122_spill] sm:$0xff] %v6975_v36  ;;  %v1621_v57 = vpop.f32.mrf.mxu0  ;;  %v3352_v34 = vunpack.c.l.b16 %v2954_v38  ;;  %v5518_v33 = vpop.eup %5517  ;;  %v1737_v36 = vadd.f32 %v6680_v11, %v8309_v27  ;;  %v6989_v38 = vunpack.c.l.b16 %v2989_v48  ;;  %5529 = vtanh.f32 %v2443_v45 }
 0x287   : > { %v1622_v37 = vadd.f32 %v6680_v11, %v1621_v57  ;;  %v6985_v21 = vpop.eup %5519  ;;  %5531 = vtanh.f32 %v2481_v54  ;;  %v2226_v57 = vpack.c.bf16 %v1717_v58, %v1717_v58  ;;  %v2949_v40 = vpack.c.bf16 %v5518_v33, %v5518_v33  ;;  %v6999_v2 = vpop.f32.mrf.mxu3 }
 0x288   : > { %v3376_v15 = vpack.c.b16 %v3352_v34, %v3351_v1  ;;  %v5522_v12 = vpop.eup %5521  ;;  %8310 = vst [vmem:[#allocation35_spill] sm:$0xff] %v6989_v38  ;;  %v8312_v1 = vld [vmem:[#allocation31_spill] sm:$0xff]  ;;  %v1732_v48 = vadd.f32 %v6680_v11, %v8313_v61  ;;  %v2233_v34 = vpack.c.bf16 %v1735_v29, %v1735_v29  ;;  %v2234_v45 = vpack.c.bf16 %v1737_v36, %v1737_v36  ;;  %v5106_v29 = vld [vmem:[%s6271_s29 + $0x108] sm:$0xff] }
 0x289   : > { %v2188_v39 = vpack.c.bf16 %v1622_v37, %v1622_v37  ;;  %v6993_v59 = vpop.eup %5523  ;;  %v1730_v32 = vadd.f32 %v6680_v11, %v8312_v1  ;;  %8314 = vst [vmem:[#allocation31_spill] sm:$0xff] %v6999_v2  ;;  %v3375_v37 = vpack.c.b16 %v3350_v25, %v3349_v19  ;;  %v3348_v50 = vunpack.c.l.b16 %v2950_v35  ;;  %v8317_v36 = vld [vmem:[#allocation27_spill] sm:$0xff]  ;;  %v7014_v2 = vpop.f32.mrf.mxu1  ;;  %v8322_v38 = vld [vmem:[#allocation54_spill] sm:$0xff] }
 0x28a   : > { %3401 = vmatpush.bf16.msrb.mxu3 %v3376_v15  ;;  %v5526_v27 = vpop.eup %5525  ;;  %v2948_v54 = vpack.c.bf16 %v5522_v12, %v5522_v12  ;;  %v8315_v15 = vld [vmem:[#allocation51_spill] sm:$0xff]  ;;  %v2482_v61 = vunpack.c.l.bf16 %v2226_v57  ;;  %v1725_v35 = vadd.f32 %v6680_v11, %v8317_v36  ;;  %v3347_v12 = vunpack.c.l.b16 %v2949_v40 }
 0x28b   : > { %v2444_v7 = vunpack.c.l.bf16 %v2188_v39  ;;  %v7001_v58 = vpop.eup %5527  ;;  %v2020_v1 = vadd.f32 %v6680_v11, %v8315_v15  ;;  %v2947_v19 = vpack.c.bf16 %v5526_v27, %v5526_v27  ;;  %8318 = vst [vmem:[#allocation51_spill] sm:$0xff] %v7014_v2  ;;  %v1727_v33 = vadd.f32 %v6680_v11, %v8319_v3 }
 0x28c   : > { %v5530_v16 = vpop.eup %5529  ;;  %v2231_v23 = vpack.c.bf16 %v1730_v32, %v1730_v32  ;;  %v2489_v15 = vunpack.c.l.bf16 %v2233_v34  ;;  %v2232_v57 = vpack.c.bf16 %v1732_v48, %v1732_v48  ;;  %v3374_v14 = vpack.c.b16 %v3348_v50, %v3347_v12 }
 0x28d   : > { %5533 = vtanh.f32 %v2444_v7  ;;  %v7010_v39 = vpop.f32.mrf.mxu2  ;;  %v7019_v18 = vpop.eup %5531  ;;  %v3346_v36 = vunpack.c.l.b16 %v2948_v54  ;;  %v2347_v27 = vpack.c.bf16 %v2020_v1, %v2020_v1  ;;  %v1720_v40 = vadd.f32 %v6680_v11, %v8320_v56 }
 0x28e   : > { %8316 = vst [vmem:[#allocation33_spill] sm:$0xff] %v7010_v39  ;;  %v1624_v25 = vpop.f32.mrf.mxu0  ;;  %3402 = vmatpush.bf16.msrb.mxu3 %v3375_v37  ;;  %v2490_v39 = vunpack.c.l.bf16 %v2234_v45  ;;  %v8321_v37 = vld [vmem:[#allocation25_spill] sm:$0xff]  ;;  %5535 = vtanh.f32 %v2482_v61  ;;  %v2229_v3 = vpack.c.bf16 %v1725_v35, %v1725_v35  ;;  %v2955_v32 = vpack.c.bf16 %v5530_v16, %v5530_v16 }
 0x28f   : > { %v1625_v7 = vadd.f32 %v6680_v11, %v1624_v25  ;;  %v1722_v2 = vadd.f32 %v6680_v11, %v8321_v37  ;;  %v3345_v34 = vunpack.c.l.b16 %v2947_v19  ;;  %v2022_v48 = vadd.f32 %v6680_v11, %v8322_v38  ;;  %v7027_v16 = vpop.f32.mrf.mxu3 }
 0x290   : > { %v2230_v50 = vpack.c.bf16 %v1727_v33, %v1727_v33  ;;  %v2487_v45 = vunpack.c.l.bf16 %v2231_v23  ;;  %5537 = vtanh.f32 %v2489_v15  ;;  %v2488_v54 = vunpack.c.l.bf16 %v2232_v57  ;;  %v8326_v15 = vld [vmem:[#allocation62_spill] sm:$0xff] }
 0x291   : > { %v2189_v4 = vpack.c.bf16 %v1625_v7, %v1625_v7  ;;  %1663 = vmatmul.bf16.gmra.mxu0 %v5106_v29  ;;  %5539 = vtanh.f32 %v2490_v39  ;;  %v3373_v1 = vpack.c.b16 %v3346_v36, %v3345_v34  ;;  %v2603_v12 = vunpack.c.l.bf16 %v2347_v27  ;;  %v5200_v39 = vld [vmem:[%s6271_s29 + $0x3f8] sm:$0xff]  ;;  %v7051_v34 = vpop.f32.mrf.mxu1 }
 0x292   : > { %3403 = vmatpush.bf16.msrb.mxu3 %v3374_v14  ;;  %v2227_v29 = vpack.c.bf16 %v1720_v40, %v1720_v40  ;;  %v2228_v61 = vpack.c.bf16 %v1722_v2, %v1722_v2  ;;  %v8323_v14 = vld [vmem:[#allocation58_spill] sm:$0xff]  ;;  %v2485_v7 = vunpack.c.l.bf16 %v2229_v3  ;;  %v7031_v38 = vunpack.c.l.b16 %v2955_v32  ;;  %v7040_v2 = vld [vmem:[%s6284_s2] sm:$0x3]  ;;  %v7046_v3 = vld [vmem:[#allocation8] ss:$0 sm:$0xff]  ;;  %8328 = vst [vmem:[#allocation25_spill] sm:$0xff] %v7051_v34 }
 0x293   : > { %v5534_v25 = vpop.eup %5533  ;;  %v2445_v35 = vunpack.c.l.bf16 %v2189_v4  ;;  %v2025_v19 = vadd.f32 %v6680_v11, %v8323_v14  ;;  %v2027_v57 = vadd.f32 %v6680_v11, %v8326_v15  ;;  %v2486_v36 = vunpack.c.l.bf16 %v2230_v50  ;;  %8327 = vst [vmem:[#allocation23_spill] sm:$0xff] %v7040_v2 }
 0x294   : > { %v2956_v56 = vpack.c.bf16 %v5534_v25, %v5534_v25  ;;  %8324 = vst [vmem:[#allocation27_spill] sm:$0xff] %v7031_v38  ;;  %5541 = vtanh.f32 %v2487_v45  ;;  %v7044_v40 = vpop.eup %5535  ;;  %v2348_v37 = vpack.c.bf16 %v2022_v48, %v2022_v48  ;;  %v2030_v32 = vadd.f32 %v7046_v3, %v6648_v60 }
 0x295   : > { %5543 = vtanh.f32 %v2488_v54  ;;  %2133 = vmatmul.bf16.gmra.mxu3 %v5200_v39  ;;  %3172 = vst [vmem:[#allocation1] ss:$9 sm:$0xff] %v7040_v2  ;;  %v8329_v50 = vpack.c.bf16 %v6977_v24, %v6977_v24  ;;  %v8330_v48 = vpack.c.bf16 %v6985_v21, %v6985_v21  ;;  %v2349_v14 = vpack.c.bf16 %v2025_v19, %v2025_v19 }
 0x296   : > { %v7033_v23 = vunpack.c.l.b16 %v2956_v56  ;;  %v1626_v33 = vpop.f32.mrf.mxu0  ;;  %3404 = vmatpush.bf16.msrb.mxu3 %v3373_v1  ;;  %v7042_v27 = vpop.f32.mrf.mxu2  ;;  %5545 = vtanh.f32 %v2445_v35  ;;  %v2483_v1 = vunpack.c.l.bf16 %v2227_v29  ;;  %v8331_v24 = vpack.c.b16 %v6826_v6, %v6824_v0 }
 0x297   : > { %v1627_v4 = vadd.f32 %v6680_v11, %v1626_v33  ;;  %v5538_v25 = vpop.eup %5537  ;;  %v7058_v45 = vunpack.c.l.b16 %v8329_v50  ;;  %v7063_v56 = vunpack.c.l.b16 %v8330_v48  ;;  %5547 = vtanh.f32 %v2485_v7 }
 0x298   : > { %8325 = vst [vmem:[#allocation29_spill] sm:$0xff] %v7033_v23  ;;  %v5540_v54 = vpop.eup %5539  ;;  %v2032_v33 = vadd.f32 %v7046_v3, %v6664_v17  ;;  %v2484_v39 = vunpack.c.l.bf16 %v2228_v61  ;;  %v2350_v15 = vpack.c.bf16 %v2027_v57, %v2027_v57  ;;  %5549 = vtanh.f32 %v2486_v36  ;;  %v5107_v17 = vld [vmem:[%s6271_s29 + $0x110] sm:$0xff] }
 0x299   : > { %v2190_v60 = vpack.c.bf16 %v1627_v4, %v1627_v4  ;;  %v2991_v35 = vpack.c.bf16 %v6993_v59, %v6993_v59  ;;  %5551 = vtanh.f32 %v2603_v12  ;;  %v2604_v4 = vunpack.c.l.bf16 %v2348_v37 }
 0x29a   : > { %3405 = vmatpush.bf16.msrb.mxu3 %v8331_v24  ;;  %v2351_v29 = vpack.c.bf16 %v2030_v32, %v2030_v32  ;;  %v5542_v19 = vpop.eup %5541  ;;  %v3001_v50 = vpack.c.bf16 %v5538_v25, %v5538_v25  ;;  %v3002_v7 = vpack.c.bf16 %v5540_v54, %v5540_v54  ;;  %v2992_v61 = vpack.c.bf16 %v7001_v58, %v7001_v58  ;;  %v7086_v54 = vld [vmem:[%s6284_s2 + $0x2] sm:$0x3] }
 0x29b   : > { %v2446_v21 = vunpack.c.l.bf16 %v2190_v60  ;;  %v5544_v6 = vpop.eup %5543  ;;  %v2605_v57 = vunpack.c.l.bf16 %v2349_v14  ;;  %v2352_v36 = vpack.c.bf16 %v2032_v33, %v2032_v33  ;;  %v8332_v12 = vpack.c.b16 %v6792_v30, %v6790_v31  ;;  %v7083_v60 = vpop.f32.mrf.mxu3  ;;  %8333 = vst [vmem:[#allocation54_spill] sm:$0xff] %v7086_v54 }
 0x29c   : > { %v5546_v37 = vpop.eup %5545  ;;  %v2606_v32 = vunpack.c.l.bf16 %v2350_v15  ;;  %v2035_v25 = vadd.f32 %v7046_v3, %v6678_v52  ;;  %v3173_v58 = vld [vmem:[#allocation1] sm:$0xff]  ;;  %v7092_v31 = vunpack.c.l.b16 %v2991_v35  ;;  %v2607_v30 = vunpack.c.l.bf16 %v2351_v29 }
 0x29d   : > { %5553 = vtanh.f32 %v2446_v21  ;;  %v5548_v33 = vpop.eup %5547  ;;  %v2999_v24 = vpack.c.bf16 %v5542_v19, %v5542_v19  ;;  %3281 = vmatmul.bf16.vlgmr.msrb.gmra.mxu1 %v3173_v58  ;;  %v3495_v15 = vunpack.c.l.b16 %v3001_v50  ;;  %v3496_v21 = vunpack.c.l.b16 %v3002_v7 }
 0x29e   : > { %5555 = vtanh.f32 %v2483_v1  ;;  %v1629_v59 = vpop.f32.mrf.mxu0  ;;  %3406 = vmatpush.bf16.msrb.mxu3 %v8332_v12  ;;  %v7088_v1 = vld [vmem:[#allocation1 + $0x9] sm:$0xff]  ;;  %v7090_v14 = vpop.f32.mrf.mxu2  ;;  %v7095_v11 = vunpack.c.l.b16 %v2992_v61  ;;  %v2608_v0 = vunpack.c.l.bf16 %v2352_v36  ;;  %v2957_v2 = vpack.c.bf16 %v5546_v37, %v5546_v37 }
 0x29f   : > { %5557 = vtanh.f32 %v2484_v39  ;;  %v1630_v48 = vadd.f32 %v7046_v3, %v1629_v59  ;;  %3300 = vst [vmem:[#allocation1] ss:$9 sm:$0xff] %v7086_v54  ;;  %v5550_v52 = vpop.eup %5549  ;;  %v3000_v39 = vpack.c.bf16 %v5544_v6, %v5544_v6  ;;  %v8334_v35 = vpack.c.b16 %v6758_v43, %v6756_v10 }
 0x2a0   : > { %5559 = vtanh.f32 %v2604_v4  ;;  %v5552_v12 = vpop.eup %5551  ;;  %v7100_v4 = vpop.f32.mrf.mxu1  ;;  %v2993_v19 = vpack.c.bf16 %v7019_v18, %v7019_v18  ;;  %v2994_v50 = vpack.c.bf16 %v7044_v40, %v7044_v40  ;;  %v2353_v7 = vpack.c.bf16 %v2035_v25, %v2035_v25 }
 0x2a1   : > { %v2191_v59 = vpack.c.bf16 %v1630_v48, %v1630_v48  ;;  %1668 = vmatmul.bf16.gmra.mxu0 %v5107_v17  ;;  %5561 = vtanh.f32 %v2605_v57  ;;  %8335 = vst [vmem:[#allocation58_spill] sm:$0xff] %v7100_v4  ;;  %v2997_v6 = vpack.c.bf16 %v5548_v33, %v5548_v33  ;;  %v2998_v61 = vpack.c.bf16 %v5550_v52, %v5550_v52 }
 0x2a2   : > { %3407 = vmatpush.bf16.msrb.mxu3 %v8334_v35  ;;  %5563 = vtanh.f32 %v2606_v32  ;;  %v3493_v37 = vunpack.c.l.b16 %v2999_v24  ;;  %v3494_v10 = vunpack.c.l.b16 %v3000_v39  ;;  %v3512_v48 = vpack.c.b16 %v3496_v21, %v3495_v15 }
 0x2a3   : > { %v5554_v29 = vpop.eup %5553  ;;  %5565 = vtanh.f32 %v2607_v30  ;;  %v2447_v43 = vunpack.c.l.bf16 %v2191_v59  ;;  %v3115_v35 = vpack.c.bf16 %v5552_v12, %v5552_v12  ;;  %v7106_v54 = vunpack.c.l.b16 %v2957_v2 }
 0x2a4   : > { %v5556_v17 = vpop.eup %5555  ;;  %v2958_v57 = vpack.c.bf16 %v5554_v29, %v5554_v29  ;;  %5567 = vtanh.f32 %v2608_v0  ;;  %v8338_v32 = vpack.c.b16 %v6712_v8, %v6710_v13  ;;  %v2609_v33 = vunpack.c.l.bf16 %v2353_v7  ;;  %v7122_v7 = vpop.f32.mrf.mxu3 }
 0x2a5   : > { %v5558_v36 = vpop.eup %5557  ;;  %8336 = vst [vmem:[#allocation62_spill] sm:$0xff] %v7106_v54  ;;  %v2995_v25 = vpack.c.bf16 %v5556_v17, %v5556_v17  ;;  %v3491_v2 = vunpack.c.l.b16 %v2997_v6  ;;  %v2037_v15 = vadd.f32 %v7046_v3, %v6694_v42  ;;  %v3492_v59 = vunpack.c.l.b16 %v2998_v61  ;;  %v8340_v42 = vld [vmem:[#allocation32_spill] sm:$0xff] }
 0x2a6   : > { %v5560_v58 = vpop.eup %5559  ;;  %v7108_v18 = vunpack.c.l.b16 %v2958_v57  ;;  %v1631_v40 = vpop.f32.mrf.mxu0  ;;  %3408 = vmatpush.bf16.msrb.mxu3 %v8338_v32  ;;  %v3301_v24 = vld [vmem:[#allocation1] sm:$0xff]  ;;  %v2996_v0 = vpack.c.bf16 %v5558_v36, %v5558_v36  ;;  %5569 = vtanh.f32 %v2447_v43  ;;  %v3511_v29 = vpack.c.b16 %v3494_v10, %v3493_v37 }
 0x2a7   : > { %v1632_v30 = vadd.f32 %v7046_v3, %v1631_v40  ;;  %v5562_v39 = vpop.eup %5561  ;;  %v7120_v13 = vpop.f32.mrf.mxu2  ;;  %v7124_v57 = vunpack.c.l.b16 %v2993_v19  ;;  %v7126_v6 = vunpack.c.l.b16 %v2994_v50  ;;  %v7128_v36 = vunpack.c.l.b16 %v3115_v35 }
 0x2a8   : > { %8337 = vst [vmem:[#allocation123_spill] sm:$0xff] %v7108_v18  ;;  %v5564_v8 = vpop.eup %5563  ;;  %v3116_v40 = vpack.c.bf16 %v5560_v58, %v5560_v58  ;;  %5571 = vtanh.f32 %v2609_v33  ;;  %v2040_v61 = vadd.f32 %v7046_v3, %v6708_v20  ;;  %v3489_v43 = vunpack.c.l.b16 %v2995_v25  ;;  %v5108_v58 = vld [vmem:[%s6271_s29 + $0x118] sm:$0xff]  ;;  %v8343_v33 = vld [vmem:[#allocation34_spill] sm:$0xff]  ;;  %v8399_v18 = vld [vmem:[#allocation65_spill] sm:$0xff] }
 0x2a9   : > { %v2192_v12 = vpack.c.bf16 %v1632_v30, %v1632_v30  ;;  %3409 = vmatmul.bf16.vlgmr.msrb.gmra.mxu3 %v3301_v24  ;;  %v5566_v17 = vpop.eup %5565  ;;  %8339 = vst [vmem:[#allocation124_spill] sm:$0xff] %v7128_v36  ;;  %v3490_v19 = vunpack.c.l.b16 %v2996_v0  ;;  %v3117_v32 = vpack.c.bf16 %v5562_v39, %v5562_v39  ;;  %v2354_v50 = vpack.c.bf16 %v2037_v15, %v2037_v15  ;;  %v7136_v30 = vpop.f32.mrf.mxu1  ;;  %v8345_v20 = vld [vmem:[#allocation36_spill] sm:$0xff] }
 0x2aa   : > { %3542 = vmatpush.bf16.msra.mxu3 %v3512_v48  ;;  %v7132_v48 = vadd.f32 %v7046_v3, %v8340_v42  ;;  %v5568_v10 = vpop.eup %5567  ;;  %8342 = vst [vmem:[#allocation125_spill] sm:$0xff] %v7136_v30  ;;  %v3118_v35 = vpack.c.bf16 %v5564_v8, %v5564_v8  ;;  %v2042_v24 = vadd.f32 %v7046_v3, %v6734_v49  ;;  %v7151_v8 = vunpack.c.l.b16 %v3116_v40 }
 0x2ab   : > { %v2448_v37 = vunpack.c.l.bf16 %v2192_v12  ;;  %v3510_v42 = vpack.c.b16 %v3492_v59, %v3491_v2  ;;  %v7143_v21 = vadd.f32 %v7046_v3, %v8343_v33  ;;  %v7147_v12 = vadd.f32 %v7046_v3, %v8345_v20 }
 0x2ac   : > { %8341 = vst [vmem:[#allocation32_spill] sm:$0xff] %v7132_v48  ;;  %v3119_v25 = vpack.c.bf16 %v5566_v17, %v5566_v17  ;;  %v5570_v15 = vpop.eup %5569  ;;  %v3120_v49 = vpack.c.bf16 %v5568_v10, %v5568_v10  ;;  %v7154_v59 = vunpack.c.l.b16 %v3117_v32  ;;  %v7160_v52 = vunpack.c.l.b16 %v3118_v35  ;;  %v8365_v48 = vld [vmem:[#allocation48_spill] sm:$0xff] }
 0x2ad   : > { %5573 = vtanh.f32 %v2448_v37  ;;  %8344 = vst [vmem:[#allocation34_spill] sm:$0xff] %v7143_v21  ;;  %v2610_v37 = vunpack.c.l.bf16 %v2354_v50  ;;  %v2356_v0 = vpack.c.bf16 %v2042_v24, %v2042_v24  ;;  %v3509_v10 = vpack.c.b16 %v3490_v19, %v3489_v43  ;;  %v8352_v43 = vld [vmem:[#allocation35_spill] sm:$0xff]  ;;  %v8354_v50 = vld [vmem:[#allocation94_spill] sm:$0xff] }
 0x2ae   : > { %3543 = vmatpush.bf16.msra.mxu3 %v3511_v29  ;;  %8346 = vst [vmem:[#allocation36_spill] sm:$0xff] %v7147_v12  ;;  %v1634_v39 = vpop.f32.mrf.mxu0  ;;  %v2355_v29 = vpack.c.bf16 %v2040_v61, %v2040_v61  ;;  %v5572_v20 = vpop.eup %5571  ;;  %v7162_v61 = vunpack.c.l.b16 %v3119_v25  ;;  %v2045_v32 = vadd.f32 %v7046_v3, %v6754_v26  ;;  %v7170_v17 = vunpack.c.l.b16 %v3120_v49  ;;  %v8353_v26 = vld [vmem:[#allocation91_spill] sm:$0xff]  ;;  %v8370_v12 = vld [vmem:[#allocation117_spill] sm:$0xff] }
 0x2af   : > { %8347 = vst [vmem:[#allocation126_spill] sm:$0xff] %v7151_v8  ;;  %v1635_v2 = vadd.f32 %v7046_v3, %v1634_v39  ;;  %v7168_v39 = vpop.f32.mrf.mxu2  ;;  %v2047_v24 = vadd.f32 %v7046_v3, %v6774_v51  ;;  %v3506_v19 = vpack.c.b16 %v7058_v45, %v8352_v43  ;;  %5575 = vtanh.f32 %v2610_v37  ;;  %v8355_v51 = vld [vmem:[#allocation98_spill] sm:$0xff] }
 0x2b0   : > { %8348 = vst [vmem:[#allocation127_spill] sm:$0xff] %v7154_v59  ;;  %v2611_v35 = vunpack.c.l.bf16 %v2355_v29  ;;  %v2050_v25 = vadd.f32 %v7046_v3, %v8353_v26  ;;  %v2052_v4 = vadd.f32 %v7046_v3, %v8354_v50  ;;  %v3508_v29 = vpack.c.b16 %v7126_v6, %v7124_v57  ;;  %v8360_v6 = vld [vmem:[#allocation106_spill] sm:$0xff]  ;;  %v8361_v26 = vld [vmem:[#allocation39_spill] sm:$0xff] }
 0x2b1   : > { %8349 = vst [vmem:[#allocation128_spill] sm:$0xff] %v7160_v52  ;;  %v2193_v40 = vpack.c.bf16 %v1635_v2, %v1635_v2  ;;  %1673 = vmatmul.bf16.gmra.mxu0 %v5108_v58  ;;  %v3121_v58 = vpack.c.bf16 %v5572_v20, %v5572_v20  ;;  %v2612_v2 = vunpack.c.l.bf16 %v2356_v0  ;;  %v2357_v34 = vpack.c.bf16 %v2045_v32, %v2045_v32  ;;  %v7188_v20 = vpop.f32.mrf.mxu1 }
 0x2b2   : > { %3544 = vmatpush.bf16.msra.mxu3 %v3510_v42  ;;  %8350 = vst [vmem:[#allocation129_spill] sm:$0xff] %v7162_v61  ;;  %v2959_v42 = vpack.c.bf16 %v5570_v15, %v5570_v15  ;;  %5577 = vtanh.f32 %v2611_v35  ;;  %v2358_v0 = vpack.c.bf16 %v2047_v24, %v2047_v24  ;;  %v2359_v57 = vpack.c.bf16 %v2050_v25, %v2050_v25 }
 0x2b3   : > { %v5574_v33 = vpop.eup %5573  ;;  %8351 = vst [vmem:[#allocation130_spill] sm:$0xff] %v7170_v17  ;;  %v2449_v49 = vunpack.c.l.bf16 %v2193_v40  ;;  %v2060_v32 = vadd.f32 %v7046_v3, %v8360_v6  ;;  %v1740_v35 = vadd.f32 %v7046_v3, %v8361_v26  ;;  %v2360_v24 = vpack.c.bf16 %v2052_v4, %v2052_v4  ;;  %v8363_v26 = vld [vmem:[#allocation112_spill] sm:$0xff] }
 0x2b4   : > { %v2960_v15 = vpack.c.bf16 %v5574_v33, %v5574_v33  ;;  %v7184_v30 = vunpack.c.l.b16 %v2959_v42  ;;  %8358 = vst [vmem:[#allocation94_spill] sm:$0xff] %v7188_v20  ;;  %v8359_v33 = vld [vmem:[#allocation101_spill] sm:$0xff]  ;;  %v3507_v42 = vpack.c.b16 %v7095_v11, %v7092_v31  ;;  %v2613_v25 = vunpack.c.l.bf16 %v2357_v34 }
 0x2b5   : > { %v2057_v50 = vadd.f32 %v7046_v3, %v8359_v33  ;;  %5579 = vtanh.f32 %v2449_v49  ;;  %v7201_v33 = vunpack.c.l.b16 %v3121_v58  ;;  %v8362_v20 = vld [vmem:[#allocation109_spill] sm:$0xff]  ;;  %v2615_v43 = vunpack.c.l.bf16 %v2359_v57 }
 0x2b6   : > { %3545 = vmatpush.bf16.msra.mxu3 %v3509_v10  ;;  %v2055_v10 = vadd.f32 %v7046_v3, %v8355_v51  ;;  %8356 = vst [vmem:[#allocation35_spill] sm:$0xff] %v7184_v30  ;;  %v7186_v45 = vunpack.c.l.b16 %v2960_v15  ;;  %v1636_v37 = vpop.f32.mrf.mxu0  ;;  %v5576_v51 = vpop.eup %5575  ;;  %5581 = vtanh.f32 %v2612_v2  ;;  %v2062_v11 = vadd.f32 %v7046_v3, %v8362_v20  ;;  %v8364_v49 = vld [vmem:[#allocation37_spill] sm:$0xff] }
 0x2b7   : > { %v1637_v40 = vadd.f32 %v7046_v3, %v1636_v37  ;;  %v2614_v37 = vunpack.c.l.bf16 %v2358_v0  ;;  %v2362_v6 = vpack.c.bf16 %v2057_v50, %v2057_v50  ;;  %v2363_v21 = vpack.c.bf16 %v2060_v32, %v2060_v32  ;;  %v5109_v50 = vld [vmem:[%s6271_s29 + $0x120] sm:$0xff] }
 0x2b8   : > { %8357 = vst [vmem:[#allocation91_spill] sm:$0xff] %v7186_v45  ;;  %v2065_v4 = vadd.f32 %v7046_v3, %v8363_v26  ;;  %v3760_v58 = vpack.c.b16 %v7063_v56, %v8364_v49  ;;  %v5578_v34 = vpop.eup %5577  ;;  %v3122_v2 = vpack.c.bf16 %v5576_v51, %v5576_v51  ;;  %v2616_v0 = vunpack.c.l.bf16 %v2360_v24  ;;  %v8367_v57 = vld [vmem:[#allocation41_spill] sm:$0xff] }
 0x2b9   : > { %v2194_v15 = vpack.c.bf16 %v1637_v40, %v1637_v40  ;;  %v7209_v40 = vpop.f32.mrf.mxu2  ;;  %v7214_v20 = vadd.f32 %v7046_v3, %v8365_v48  ;;  %v7218_v32 = vadd.f32 %v7046_v3, %v8367_v57  ;;  %v2618_v26 = vunpack.c.l.bf16 %v2362_v6 }
 0x2ba   : > { %3546 = vmatpush.bf16.msra.mxu3 %v3508_v29  ;;  %v2361_v29 = vpack.c.bf16 %v2055_v10, %v2055_v10  ;;  %v2235_v10 = vpack.c.bf16 %v1740_v35, %v1740_v35  ;;  %v2364_v51 = vpack.c.bf16 %v2062_v11, %v2062_v11  ;;  %v8369_v35 = vld [vmem:[#allocation114_spill] sm:$0xff]  ;;  %v2619_v48 = vunpack.c.l.bf16 %v2363_v21 }
 0x2bb   : > { %v2450_v31 = vunpack.c.l.bf16 %v2194_v15  ;;  %8366 = vst [vmem:[#allocation98_spill] sm:$0xff] %v7214_v20  ;;  %v5580_v56 = vpop.eup %5579  ;;  %v2067_v24 = vadd.f32 %v7046_v3, %v8369_v35  ;;  %v2365_v49 = vpack.c.bf16 %v2065_v4, %v2065_v4  ;;  %v2070_v57 = vadd.f32 %v7046_v3, %v8370_v12  ;;  %v7226_v20 = vpop.f32.mrf.mxu1 }
 0x2bc   : > { %8368 = vst [vmem:[#allocation101_spill] sm:$0xff] %v7218_v32  ;;  %v2491_v38 = vunpack.c.l.bf16 %v2235_v10  ;;  %v2961_v21 = vpack.c.bf16 %v5580_v56, %v5580_v56  ;;  %v2620_v12 = vunpack.c.l.bf16 %v2364_v51  ;;  %v8386_v32 = vld [vmem:[#allocation52_spill] sm:$0xff] }
 0x2bd   : > { %5583 = vtanh.f32 %v2450_v31  ;;  %v5582_v31 = vpop.eup %5581  ;;  %v2366_v4 = vpack.c.bf16 %v2067_v24, %v2067_v24  ;;  %v2621_v10 = vunpack.c.l.bf16 %v2365_v49  ;;  %v8377_v24 = vld [vmem:[#allocation53_spill] sm:$0xff] }
 0x2be   : > { %3547 = vmatpush.bf16.msra.mxu3 %v3507_v42  ;;  %5585 = vtanh.f32 %v2613_v25  ;;  %v2617_v42 = vunpack.c.l.bf16 %v2361_v29  ;;  %v7220_v15 = vpop.f32.mrf.mxu0  ;;  %v7228_v25 = vunpack.c.l.b16 %v3122_v2  ;;  %v3123_v29 = vpack.c.bf16 %v5578_v34, %v5578_v34 }
 0x2bf   : > { %5587 = vtanh.f32 %v2614_v37  ;;  %v3124_v11 = vpack.c.bf16 %v5582_v31, %v5582_v31  ;;  %v8372_v2 = vpack.c.b16 %v6965_v28, %v6959_v5  ;;  %v7249_v5 = vadd.f32 %v7046_v3, %v8377_v24 }
 0x2c0   : > { %5589 = vtanh.f32 %v2615_v43  ;;  %v7237_v35 = vunpack.c.l.b16 %v3123_v29 }
 0x2c1   : > { %5591 = vtanh.f32 %v2616_v0  ;;  %1678 = vmatmul.bf16.gmra.mxu0 %v5109_v50  ;;  %v2367_v0 = vpack.c.bf16 %v2070_v57, %v2070_v57  ;;  %8378 = vst [vmem:[#allocation109_spill] sm:$0xff] %v7249_v5  ;;  %v7257_v57 = vpop.f32.mrf.mxu2  ;;  %v7291_v5 = vpop.f32.mrf.mxu3 }
 0x2c2   : > { %3548 = vmatpush.bf16.msra.mxu3 %v3506_v19  ;;  %5593 = vtanh.f32 %v2617_v42  ;;  %v8371_v19 = vld [vmem:[#allocation120_spill] sm:$0xff] }
 0x2c3   : > { %v2072_v43 = vadd.f32 %v7046_v3, %v8371_v19  ;;  %v5584_v6 = vpop.eup %5583  ;;  %5595 = vtanh.f32 %v2618_v26  ;;  %v8373_v19 = vld [vmem:[#allocation50_spill] sm:$0xff]  ;;  %v8375_v26 = vld [vmem:[#allocation43_spill] sm:$0xff] }
 0x2c4   : > { %v5586_v34 = vpop.eup %5585  ;;  %5597 = vtanh.f32 %v2619_v48  ;;  %v2962_v50 = vpack.c.bf16 %v5584_v6, %v5584_v6  ;;  %v7241_v56 = vadd.f32 %v7046_v3, %v8373_v19  ;;  %v7245_v51 = vadd.f32 %v7046_v3, %v8375_v26  ;;  %v8381_v19 = vld [vmem:[#allocation31_spill] sm:$0xff] }
 0x2c5   : > { %v5588_v42 = vpop.eup %5587  ;;  %5599 = vtanh.f32 %v2491_v38  ;;  %v2368_v31 = vpack.c.bf16 %v2072_v43, %v2072_v43  ;;  %v7251_v48 = vunpack.c.l.b16 %v2961_v21  ;;  %v7259_v6 = vunpack.c.l.b16 %v3124_v11 }
 0x2c6   : > { %3549 = vmatpush.bf16.msra.mxu3 %v8372_v2  ;;  %8374 = vst [vmem:[#allocation106_spill] sm:$0xff] %v7241_v56  ;;  %v5590_v28 = vpop.eup %5589  ;;  %v7255_v49 = vpop.f32.mrf.mxu0  ;;  %5601 = vtanh.f32 %v2620_v12  ;;  %v2622_v2 = vunpack.c.l.bf16 %v2366_v4  ;;  %v2075_v26 = vadd.f32 %v7046_v3, %v8381_v19  ;;  %v3125_v37 = vpack.c.bf16 %v5586_v34, %v5586_v34  ;;  %v8383_v19 = vld [vmem:[#allocation47_spill] sm:$0xff] }
 0x2c7   : > { %8376 = vst [vmem:[#allocation39_spill] sm:$0xff] %v7245_v51  ;;  %v5592_v29 = vpop.eup %5591  ;;  %5603 = vtanh.f32 %v2621_v10  ;;  %v2623_v38 = vunpack.c.l.bf16 %v2367_v0  ;;  %v8382_v43 = vpack.c.b16 %v6980_v22, %v6963_v47  ;;  %v3126_v4 = vpack.c.bf16 %v5588_v42, %v5588_v42  ;;  %v8385_v22 = vld [vmem:[#allocation57_spill] sm:$0xff]  ;;  %v7280_v56 = vpop.f32.mrf.mxu1 }
 0x2c8   : > { %8379 = vst [vmem:[#allocation112_spill] sm:$0xff] %v7251_v48  ;;  %v5594_v24 = vpop.eup %5593  ;;  %v7274_v34 = vadd.f32 %v7046_v3, %v8383_v19  ;;  %v3127_v0 = vpack.c.bf16 %v5590_v28, %v5590_v28  ;;  %v1760_v47 = vadd.f32 %v7046_v3, %v8385_v22  ;;  %v2077_v21 = vadd.f32 %v7046_v3, %v7027_v16  ;;  %v7287_v19 = vld [vmem:[%s6284_s2 + $0x4] sm:$0x3]  ;;  %v7289_v28 = vld [vmem:[#allocation1 + $0x9] sm:$0xff]  ;;  %v5110_v51 = vld [vmem:[%s6271_s29 + $0x128] sm:$0xff] }
 0x2c9   : > { %v3128_v11 = vpack.c.bf16 %v5592_v29, %v5592_v29  ;;  %v7284_v12 = vadd.f32 %v7046_v3, %v8386_v32  ;;  %5605 = vtanh.f32 %v2622_v2  ;;  %v2369_v42 = vpack.c.bf16 %v2075_v26, %v2075_v26  ;;  %8388 = vst [vmem:[#allocation114_spill] sm:$0xff] %v7287_v19  ;;  %v8391_v16 = vld [vmem:[#allocation45_spill] sm:$0xff] }
 0x2ca   : > { %3785 = vmatpush.bf16.msrb.mxu3 %v3760_v58  ;;  %v7253_v58 = vunpack.c.l.b16 %v2962_v50  ;;  %v5596_v50 = vpop.eup %5595  ;;  %8384 = vst [vmem:[#allocation48_spill] sm:$0xff] %v7274_v34  ;;  %v7295_v22 = vunpack.c.l.b16 %v3125_v37  ;;  %v7299_v29 = vadd.f32 %v7046_v3, %v8391_v16  ;;  %v3129_v23 = vpack.c.bf16 %v5594_v24, %v5594_v24 }
 0x2cb   : > { %v5598_v10 = vpop.eup %5597  ;;  %8387 = vst [vmem:[#allocation41_spill] sm:$0xff] %v7284_v12  ;;  %5607 = vtanh.f32 %v2623_v38  ;;  %v8393_v32 = vpack.c.b16 %v6957_v55, %v6955_v63  ;;  %v7305_v26 = vunpack.c.l.b16 %v3126_v4  ;;  %v3130_v37 = vpack.c.bf16 %v5596_v50, %v5596_v50 }
 0x2cc   : > { %8380 = vst [vmem:[#allocation37_spill] sm:$0xff] %v7253_v58  ;;  %v7310_v16 = vunpack.c.l.b16 %v3127_v0  ;;  %v2243_v24 = vpack.c.bf16 %v1760_v47, %v1760_v47  ;;  %v2370_v38 = vpack.c.bf16 %v2077_v21, %v2077_v21  ;;  %v7314_v63 = vunpack.c.l.b16 %v3128_v11  ;;  %v8413_v58 = vld [vmem:[#allocation116_spill] sm:$0xff] }
 0x2cd   : > { %8389 = vst [vmem:[#allocation117_spill] sm:$0xff] %v7289_v28  ;;  %v3131_v28 = vpack.c.bf16 %v5598_v10, %v5598_v10  ;;  %v2625_v4 = vunpack.c.l.bf16 %v2369_v42  ;;  %v7320_v50 = vunpack.c.l.b16 %v3129_v23  ;;  %v8395_v10 = vld [vmem:[#allocation55_spill] sm:$0xff]  ;;  %v8398_v11 = vpack.c.b16 %v6927_v62, %v6921_v53 }
 0x2ce   : > { %3786 = vmatpush.bf16.msrb.mxu3 %v8382_v43  ;;  %v2624_v43 = vunpack.c.l.bf16 %v2368_v31  ;;  %v7293_v31 = vpop.eup %5599  ;;  %8392 = vst [vmem:[#allocation50_spill] sm:$0xff] %v7299_v29  ;;  %v7312_v29 = vpop.f32.mrf.mxu0  ;;  %v7324_v0 = vadd.f32 %v7046_v3, %v8395_v10  ;;  %v7333_v55 = vunpack.c.l.b16 %v3130_v37  ;;  %v7339_v10 = vadd.f32 %v7046_v3, %v8399_v18  ;;  %v8403_v37 = vld [vmem:[#allocation60_spill] sm:$0xff] }
 0x2cf   : > { %8390 = vst [vmem:[#allocation120_spill] sm:$0xff] %v7293_v31  ;;  %v5602_v2 = vpop.eup %5601  ;;  %v7341_v34 = vunpack.c.l.bf16 %v2243_v24  ;;  %v2626_v62 = vunpack.c.l.bf16 %v2370_v38 }
 0x2d0   : > { %3428 = vst [vmem:[#allocation1] ss:$9 sm:$0xff] %v7287_v19  ;;  %v5604_v54 = vpop.eup %5603  ;;  %5609 = vtanh.f32 %v2624_v43  ;;  %v3132_v47 = vpack.c.bf16 %v5602_v2, %v5602_v2  ;;  %v8397_v43 = vld [vmem:[#allocation71_spill] sm:$0xff]  ;;  %v7331_v19 = vpop.f32.mrf.mxu2 }
 0x2d1   : > { %8396 = vst [vmem:[#allocation43_spill] sm:$0xff] %v7324_v0  ;;  %v1770_v21 = vadd.f32 %v7046_v3, %v8397_v43  ;;  %v5606_v42 = vpop.eup %5605  ;;  %v3133_v23 = vpack.c.bf16 %v5604_v54, %v5604_v54  ;;  %1683 = vmatmul.bf16.gmra.mxu0 %v5110_v51  ;;  %v8402_v43 = vld [vmem:[#allocation73_spill] sm:$0xff]  ;;  %v8405_v54 = vld [vmem:[#allocation67_spill] sm:$0xff]  ;;  %5611 = vtanh.f32 %v2625_v4 }
 0x2d2   : > { %3787 = vmatpush.bf16.msrb.mxu3 %v8393_v32  ;;  %v8394_v32 = vld [vmem:[#allocation77_spill] sm:$0xff]  ;;  %8400 = vst [vmem:[#allocation53_spill] sm:$0xff] %v7339_v10  ;;  %v5608_v2 = vpop.eup %5607  ;;  %v1772_v53 = vadd.f32 %v7046_v3, %v8402_v43  ;;  %v7353_v30 = vadd.f32 %v7046_v3, %v8405_v54  ;;  %v7355_v45 = vunpack.c.l.b16 %v3132_v47  ;;  %v3134_v43 = vpack.c.bf16 %v5606_v42, %v5606_v42  ;;  %v7367_v47 = vpop.f32.mrf.mxu3 }
 0x2d3   : > { %v1775_v31 = vadd.f32 %v7046_v3, %v8394_v32  ;;  %v7335_v32 = vunpack.c.l.b16 %v3131_v28  ;;  %8401 = vst [vmem:[#allocation31_spill] sm:$0xff] %v7341_v34  ;;  %v7349_v28 = vadd.f32 %v7046_v3, %v8403_v37  ;;  %v2247_v38 = vpack.c.bf16 %v1770_v21, %v1770_v21  ;;  %v1824_v34 = vpop.f32.mrf.mxu1  ;;  %v5169_v42 = vld [vmem:[%s6271_s29 + $0x300] sm:$0xff] }
 0x2d4   : > { %8406 = vst [vmem:[#allocation57_spill] sm:$0xff] %v7353_v30  ;;  %v8407_v37 = vpack.c.b16 %v6915_v9, %v6910_v44  ;;  %v7362_v12 = vunpack.c.l.b16 %v3133_v23  ;;  %v1825_v54 = vadd.f32 %v7046_v3, %v1824_v34  ;;  %v2248_v21 = vpack.c.bf16 %v1772_v53, %v1772_v53  ;;  %1978 = vmatmul.bf16.gmra.mxu2 %v5169_v42  ;;  %v8414_v30 = vld [vmem:[#allocation119_spill] sm:$0xff]  ;;  %v8428_v10 = vld [vmem:[#allocation113_spill] sm:$0xff] }
 0x2d5   : > { %8404 = vst [vmem:[#allocation47_spill] sm:$0xff] %v7349_v28  ;;  %v2249_v18 = vpack.c.bf16 %v1775_v31, %v1775_v31  ;;  %v3135_v31 = vpack.c.bf16 %v5608_v2, %v5608_v2  ;;  %5613 = vtanh.f32 %v2626_v62  ;;  %v1640_v44 = vadd.f32 %v7046_v3, %v7220_v15 }
 0x2d6   : > { %3788 = vmatpush.bf16.msrb.mxu3 %v8398_v11  ;;  %v2080_v11 = vadd.f32 %v7046_v3, %v7083_v60  ;;  %v5610_v24 = vpop.eup %5609  ;;  %v2082_v60 = vadd.f32 %v7046_v3, %v7122_v7  ;;  %v1646_v9 = vpop.f32.mrf.mxu0  ;;  %v1820_v2 = vadd.f32 %v7046_v3, %v7226_v20  ;;  %v7376_v34 = vunpack.c.l.b16 %v3134_v43 }
 0x2d7   : > { %v3430_v51 = vld [vmem:[#allocation1 + $0x9] sm:$0xff]  ;;  %v2505_v0 = vunpack.c.l.bf16 %v2249_v18  ;;  %v7378_v4 = vunpack.c.l.bf16 %v2247_v38  ;;  %v8409_v62 = vpack.c.b16 %v6902_v46, %v6897_v41  ;;  %v1822_v15 = vadd.f32 %v7046_v3, %v7280_v56 }
 0x2d8   : > { %3550 = vmatmul.bf16.vlgmr.msra.gmra.mxu3 %v3430_v51  ;;  %v2371_v7 = vpack.c.bf16 %v2080_v11, %v2080_v11  ;;  %v2372_v53 = vpack.c.bf16 %v2082_v60, %v2082_v60  ;;  %v7385_v11 = vpop.eup %5611  ;;  %v7387_v51 = vunpack.c.l.b16 %v3135_v31  ;;  %v8410_v18 = vld [vmem:[#allocation79_spill] sm:$0xff]  ;;  %v2269_v43 = vpack.c.bf16 %v1825_v54, %v1825_v54  ;;  %v7399_v60 = vpop.f32.mrf.mxu2 }
 0x2d9   : > { %8408 = vst [vmem:[#allocation52_spill] sm:$0xff] %v7378_v4  ;;  %v7391_v20 = vadd.f32 %v7046_v3, %v8410_v18  ;;  %v7395_v38 = vunpack.c.l.bf16 %v2248_v21  ;;  %v2195_v46 = vpack.c.bf16 %v1640_v44, %v1640_v44  ;;  %v1965_v56 = vadd.f32 %v7046_v3, %v7209_v40  ;;  %v8412_v21 = vld [vmem:[#allocation110_spill] sm:$0xff] }
 0x2da   : > { %3789 = vmatpush.bf16.msrb.mxu3 %v8407_v37  ;;  %v3136_v37 = vpack.c.bf16 %v5610_v24, %v5610_v24  ;;  %v1642_v24 = vadd.f32 %v7046_v3, %v7255_v49  ;;  %v2627_v41 = vunpack.c.l.bf16 %v2371_v7  ;;  %5615 = vtanh.f32 %v2505_v0  ;;  %v5111_v0 = vld [vmem:[%s6271_s29 + $0x130] sm:$0xff] }
 0x2db   : > { %8411 = vst [vmem:[#allocation45_spill] sm:$0xff] %v7395_v38  ;;  %v1645_v42 = vadd.f32 %v7046_v3, %v7312_v29  ;;  %v7405_v18 = vpop.eup %5613  ;;  %v2628_v54 = vunpack.c.l.bf16 %v2372_v53  ;;  %v1940_v7 = vadd.f32 %v7046_v3, %v8412_v21  ;;  %v2268_v44 = vpack.c.bf16 %v1822_v15, %v1822_v15  ;;  %v8418_v21 = vld [vmem:[#allocation122_spill] sm:$0xff] }
 0x2dc   : > { %v7401_v31 = vunpack.c.l.b16 %v3136_v37  ;;  %v2196_v37 = vpack.c.bf16 %v1642_v24, %v1642_v24  ;;  %v1955_v29 = vadd.f32 %v7046_v3, %v7042_v27  ;;  %5617 = vtanh.f32 %v2627_v41  ;;  %v7426_v41 = vld [vmem:[#allocation1] sm:$0xff] }
 0x2dd   : > { %v2451_v23 = vunpack.c.l.bf16 %v2195_v46  ;;  %v1647_v48 = vadd.f32 %v7046_v3, %v1646_v9  ;;  %v2325_v53 = vpack.c.bf16 %v1965_v56, %v1965_v56  ;;  %v2197_v15 = vpack.c.bf16 %v1645_v42, %v1645_v42  ;;  %8416 = vst [vmem:[#allocation55_spill] sm:$0xff] %v7426_v41 }
 0x2de   : > { %3790 = vmatpush.bf16.msrb.mxu3 %v8409_v62  ;;  %v2267_v62 = vpack.c.bf16 %v1820_v2, %v1820_v2  ;;  %v2525_v2 = vunpack.c.l.bf16 %v2269_v43  ;;  %v1649_v49 = vpop.f32.mrf.mxu0  ;;  %v1945_v40 = vadd.f32 %v7046_v3, %v8413_v58  ;;  %5619 = vtanh.f32 %v2628_v54  ;;  %v7424_v43 = vld [vmem:[%s6284_s2 + $0x6] sm:$0x3] }
 0x2df   : > { %v2315_v38 = vpack.c.bf16 %v1940_v7, %v1940_v7  ;;  %v1947_v27 = vadd.f32 %v7046_v3, %v8414_v30  ;;  %8415 = vst [vmem:[#allocation77_spill] sm:$0xff] %v7424_v43  ;;  %v2524_v9 = vunpack.c.l.bf16 %v2268_v44  ;;  %v2452_v56 = vunpack.c.l.bf16 %v2196_v37 }
 0x2e0   : > { %v2523_v24 = vunpack.c.l.bf16 %v2267_v62  ;;  %v7428_v46 = vpop.eup %5615  ;;  %v1950_v42 = vadd.f32 %v7046_v3, %v8418_v21  ;;  %v2321_v28 = vpack.c.bf16 %v1955_v29, %v1955_v29  ;;  %3556 = vst [vmem:[#allocation1] ss:$9 sm:$0xff] %v7424_v43  ;;  %5621 = vtanh.f32 %v2525_v2  ;;  %v1974_v21 = vpop.f32.mrf.mxu2 }
 0x2e1   : > { %8417 = vst [vmem:[#allocation71_spill] sm:$0xff] %v7428_v46  ;;  %1688 = vmatmul.bf16.gmra.mxu0 %v5111_v0  ;;  %5623 = vtanh.f32 %v2451_v23  ;;  %v2198_v58 = vpack.c.bf16 %v1647_v48, %v1647_v48  ;;  %v1957_v30 = vadd.f32 %v7046_v3, %v7090_v14  ;;  %v2581_v62 = vunpack.c.l.bf16 %v2325_v53  ;;  %v7440_v2 = vpop.f32.mrf.mxu3  ;;  %v8425_v46 = vld [vmem:[#allocation33_spill] sm:$0xff] }
 0x2e2   : > { %v2453_v54 = vunpack.c.l.bf16 %v2197_v15  ;;  %v1650_v7 = vadd.f32 %v7046_v3, %v1649_v49  ;;  %v2317_v44 = vpack.c.bf16 %v1945_v40, %v1945_v40  ;;  %5625 = vtanh.f32 %v2523_v24  ;;  %v5618_v37 = vpop.eup %5617 }
 0x2e3   : > { %v2571_v0 = vunpack.c.l.bf16 %v2315_v38  ;;  %v2318_v41 = vpack.c.bf16 %v1947_v27, %v1947_v27  ;;  %v1960_v29 = vadd.f32 %v7046_v3, %v7120_v13  ;;  %5627 = vtanh.f32 %v2524_v9 }
 0x2e4   : > { %5629 = vtanh.f32 %v2452_v56  ;;  %v2319_v23 = vpack.c.bf16 %v1950_v42, %v1950_v42  ;;  %v2577_v48 = vunpack.c.l.bf16 %v2321_v28  ;;  %v1970_v14 = vadd.f32 %v7046_v3, %v7331_v19  ;;  %v7442_v53 = vpop.eup %5619  ;;  %3294 = vmatmul.bf16.vlgmr.msrb.gmra.mxu2 %v7088_v1 }
 0x2e5   : > { %v2454_v49 = vunpack.c.l.bf16 %v2198_v58  ;;  %v2322_v15 = vpack.c.bf16 %v1957_v30, %v1957_v30  ;;  %5631 = vtanh.f32 %v2581_v62  ;;  %v1967_v38 = vadd.f32 %v7046_v3, %v7257_v57 }
 0x2e6   : > { %v1651_v40 = vpop.f32.mrf.mxu0  ;;  %v7446_v13 = vpop.eup %5621  ;;  %v3139_v24 = vpack.c.bf16 %v5618_v37, %v5618_v37  ;;  %5633 = vtanh.f32 %v2453_v54  ;;  %v2199_v27 = vpack.c.bf16 %v1650_v7, %v1650_v7  ;;  %v2573_v28 = vunpack.c.l.bf16 %v2317_v44 }
 0x2e7   : > { %v7449_v19 = vpop.eup %5623  ;;  %5635 = vtanh.f32 %v2571_v0  ;;  %v2574_v9 = vunpack.c.l.bf16 %v2318_v41  ;;  %v2323_v56 = vpack.c.bf16 %v1960_v29, %v1960_v29  ;;  %v1972_v42 = vadd.f32 %v7046_v3, %v7399_v60 }
 0x2e8   : > { %v7453_v58 = vpop.eup %5625  ;;  %v1652_v57 = vadd.f32 %v7046_v3, %v1651_v40  ;;  %v2575_v30 = vunpack.c.l.bf16 %v2319_v23  ;;  %5637 = vtanh.f32 %v2577_v48  ;;  %v2327_v62 = vpack.c.bf16 %v1970_v14, %v1970_v14 }
 0x2e9   : > { %v7456_v54 = vpop.eup %5627  ;;  %5639 = vtanh.f32 %v2454_v49  ;;  %v2578_v7 = vunpack.c.l.bf16 %v2322_v15  ;;  %v1962_v1 = vadd.f32 %v7046_v3, %v7168_v39  ;;  %v2326_v41 = vpack.c.bf16 %v1967_v38, %v1967_v38 }
 0x2ea   : > { %v7460_v44 = vpop.eup %5629  ;;  %v8419_v60 = vpack.c.bf16 %v7385_v11, %v7385_v11  ;;  %v8421_v0 = vpack.c.bf16 %v7391_v20, %v7391_v20  ;;  %v2455_v23 = vunpack.c.l.bf16 %v2199_v27  ;;  %5641 = vtanh.f32 %v2573_v28  ;;  %v5112_v27 = vld [vmem:[%s6271_s29 + $0x138] sm:$0xff]  ;;  %v1826_v28 = vpop.f32.mrf.mxu1 }
 0x2eb   : > { %v7472_v48 = vpop.eup %5631  ;;  %v8422_v39 = vpack.c.bf16 %v7405_v18, %v7405_v18  ;;  %5643 = vtanh.f32 %v2574_v9  ;;  %v2579_v49 = vunpack.c.l.bf16 %v2323_v56  ;;  %v2328_v40 = vpack.c.bf16 %v1972_v42, %v1972_v42  ;;  %v1976_v56 = vpop.f32.mrf.mxu2 }
 0x2ec   : > { %v7465_v37 = vunpack.c.l.b16 %v8419_v60  ;;  %v7470_v29 = vunpack.c.l.bf16 %v8421_v0  ;;  %v7479_v11 = vpop.eup %5633  ;;  %v7481_v15 = vunpack.c.l.b16 %v3139_v24  ;;  %v3140_v20 = vpack.c.bf16 %v7442_v53, %v7442_v53 }
 0x2ed   : > { %v7477_v14 = vunpack.c.l.b16 %v8422_v39  ;;  %v2200_v38 = vpack.c.bf16 %v1652_v57, %v1652_v57  ;;  %5645 = vtanh.f32 %v2575_v30  ;;  %v7486_v60 = vpop.eup %5635  ;;  %v2324_v18 = vpack.c.bf16 %v1962_v1, %v1962_v1  ;;  %v7494_v30 = vpop.f32.mrf.mxu3 }
 0x2ee   : > { %8420 = vst [vmem:[#allocation65_spill] sm:$0xff] %v7465_v37  ;;  %v1654_v0 = vpop.f32.mrf.mxu0  ;;  %5647 = vtanh.f32 %v2578_v7  ;;  %v2582_v39 = vunpack.c.l.bf16 %v2326_v41  ;;  %v2583_v9 = vunpack.c.l.bf16 %v2327_v62  ;;  %v7488_v42 = vpop.eup %5637  ;;  %v2085_v53 = vadd.f32 %v7046_v3, %v7291_v5  ;;  %v7560_v37 = vld [vmem:[%s6284_s2 + $0x8] sm:$0x3] }
 0x2ef   : > { %8423 = vst [vmem:[#allocation73_spill] sm:$0xff] %v7477_v14  ;;  %5649 = vtanh.f32 %v2455_v23  ;;  %v1655_v24 = vadd.f32 %v7046_v3, %v1654_v0  ;;  %v1975_v57 = vadd.f32 %v7046_v3, %v1974_v21  ;;  %v7496_v43 = vpop.eup %5639  ;;  %v1952_v7 = vadd.f32 %v7046_v3, %v8425_v46 }
 0x2f0   : > { %8424 = vst [vmem:[#allocation60_spill] sm:$0xff] %v7486_v60  ;;  %5651 = vtanh.f32 %v2579_v49  ;;  %v2584_v62 = vunpack.c.l.bf16 %v2328_v40  ;;  %v1827_v1 = vadd.f32 %v7046_v3, %v1826_v28  ;;  %v7501_v41 = vpop.eup %5641  ;;  %v2456_v23 = vunpack.c.l.bf16 %v2200_v38 }
 0x2f1   : > { %8426 = vst [vmem:[#allocation67_spill] sm:$0xff] %v7501_v41  ;;  %v2201_v0 = vpack.c.bf16 %v1655_v24, %v1655_v24  ;;  %1693 = vmatmul.bf16.gmra.mxu0 %v5112_v27  ;;  %v2329_v60 = vpack.c.bf16 %v1975_v57, %v1975_v57  ;;  %v1977_v5 = vadd.f32 %v7046_v3, %v1976_v56  ;;  %v7504_v21 = vpop.eup %5643  ;;  %v7506_v4 = vunpack.c.l.b16 %v3140_v20 }
 0x2f2   : > { %8427 = vst [vmem:[#allocation79_spill] sm:$0xff] %v7504_v21  ;;  %v1942_v14 = vadd.f32 %v7046_v3, %v8428_v10  ;;  %5653 = vtanh.f32 %v2582_v39  ;;  %v2270_v46 = vpack.c.bf16 %v1827_v1, %v1827_v1  ;;  %v2373_v38 = vpack.c.bf16 %v2085_v53, %v2085_v53 }
 0x2f3   : > { %v7510_v49 = vpop.eup %5645  ;;  %5655 = vtanh.f32 %v2583_v9  ;;  %v2585_v27 = vunpack.c.l.bf16 %v2329_v60  ;;  %v2457_v56 = vunpack.c.l.bf16 %v2201_v0  ;;  %v2320_v24 = vpack.c.bf16 %v1952_v7, %v1952_v7  ;;  %8429 = vst [vmem:[#allocation110_spill] sm:$0xff] %v7560_v37 }
 0x2f4   : > { %v7514_v28 = vpop.eup %5647  ;;  %5657 = vtanh.f32 %v2584_v62  ;;  %v2526_v20 = vunpack.c.l.bf16 %v2270_v46  ;;  %v2580_v3 = vunpack.c.l.bf16 %v2324_v18  ;;  %v3037_v10 = vpack.c.bf16 %v7446_v13, %v7446_v13  ;;  %v7526_v62 = vld [vmem:[#allocation8] ss:$0 sm:$0xff] }
 0x2f5   : > { %v7516_v57 = vpop.eup %5649  ;;  %5659 = vtanh.f32 %v2456_v23  ;;  %v2330_v39 = vpack.c.bf16 %v1977_v5, %v1977_v5  ;;  %v2965_v9 = vpack.c.bf16 %v7479_v11, %v7479_v11  ;;  %v2316_v60 = vpack.c.bf16 %v1942_v14, %v1942_v14 }
 0x2f6   : > { %v7520_v1 = vpop.eup %5651  ;;  %v1656_v53 = vpop.f32.mrf.mxu0  ;;  %v3035_v7 = vpack.c.bf16 %v7453_v58, %v7453_v58  ;;  %5661 = vtanh.f32 %v2585_v27  ;;  %v2629_v18 = vunpack.c.l.bf16 %v2373_v38  ;;  %v2576_v5 = vunpack.c.l.bf16 %v2320_v24 }
 0x2f7   : > { %v1657_v23 = vadd.f32 %v7526_v62, %v1656_v53  ;;  %5663 = vtanh.f32 %v2526_v20  ;;  %v2586_v0 = vunpack.c.l.bf16 %v2330_v39  ;;  %v3089_v11 = vpack.c.bf16 %v7488_v42, %v7488_v42  ;;  %v2094_v20 = vpop.f32.mrf.mxu3 }
 0x2f8   : > { %v7529_v13 = vpop.eup %5653  ;;  %5665 = vtanh.f32 %v2457_v56  ;;  %v3093_v14 = vpack.c.bf16 %v7472_v48, %v7472_v48  ;;  %v3036_v38 = vpack.c.bf16 %v7456_v54, %v7456_v54  ;;  %v7543_v56 = vunpack.c.l.b16 %v2965_v9 }
 0x2f9   : > { %v7535_v46 = vpop.eup %5655  ;;  %v2202_v27 = vpack.c.bf16 %v1657_v23, %v1657_v23  ;;  %5667 = vtanh.f32 %v2586_v0  ;;  %v2966_v42 = vpack.c.bf16 %v7496_v43, %v7496_v43  ;;  %v7547_v24 = vunpack.c.l.bf16 %v2316_v60 }
 0x2fa   : > { %v7541_v39 = vpop.eup %5657  ;;  %5669 = vtanh.f32 %v2580_v3  ;;  %v3090_v23 = vpack.c.bf16 %v7514_v28, %v7514_v28  ;;  %v2087_v54 = vadd.f32 %v7526_v62, %v7367_v47  ;;  %v7553_v9 = vunpack.c.l.b16 %v3089_v11  ;;  %v7562_v28 = vld [vmem:[#allocation1] sm:$0xff] }
 0x2fb   : > { %v5660_v48 = vpop.eup %5659  ;;  %v2458_v53 = vunpack.c.l.bf16 %v2202_v27  ;;  %5671 = vtanh.f32 %v2629_v18  ;;  %v7555_v58 = vunpack.c.l.b16 %v3093_v14  ;;  %v7557_v43 = vunpack.c.l.b16 %v3035_v7  ;;  %8430 = vst [vmem:[#allocation116_spill] sm:$0xff] %v7562_v28  ;;  %v7564_v18 = vld [vmem:[#allocation1 + $0x9] sm:$0xff] }
 0x2fc   : > { %v5662_v0 = vpop.eup %5661  ;;  %5673 = vtanh.f32 %v2576_v5  ;;  %v3722_v3 = vunpack.c.l.b16 %v3036_v38  ;;  %v2374_v27 = vpack.c.bf16 %v2087_v54, %v2087_v54  ;;  %8431 = vst [vmem:[#allocation119_spill] sm:$0xff] %v7564_v18  ;;  %v7566_v21 = vunpack.c.l.b16 %v2966_v42 }
 0x2fd   : > { %v5664_v60 = vpop.eup %5663  ;;  %5675 = vtanh.f32 %v2458_v53  ;;  %v3097_v40 = vpack.c.bf16 %v5662_v0, %v5662_v0  ;;  %v2967_v5 = vpack.c.bf16 %v7516_v57, %v7516_v57  ;;  %v3723_v7 = vunpack.c.l.b16 %v3037_v10  ;;  %3684 = vst [vmem:[#allocation1] ss:$9 sm:$0xff] %v7560_v37 }
 0x2fe   : > { %v5666_v47 = vpop.eup %5665  ;;  %v1659_v11 = vpop.f32.mrf.mxu0  ;;  %v3038_v14 = vpack.c.bf16 %v5664_v60, %v5664_v60  ;;  %v7572_v54 = vunpack.c.l.b16 %v3090_v23  ;;  %v3094_v0 = vpack.c.bf16 %v7529_v13, %v7529_v13  ;;  %v2630_v18 = vunpack.c.l.bf16 %v2374_v27 }
 0x2ff   : > { %v5668_v38 = vpop.eup %5667  ;;  %v1660_v53 = vadd.f32 %v7526_v62, %v1659_v11  ;;  %v3091_v42 = vpack.c.bf16 %v7520_v1, %v7520_v1  ;;  %v3095_v57 = vpack.c.bf16 %v7535_v46, %v7535_v46  ;;  %v3096_v11 = vpack.c.bf16 %v7541_v39, %v7541_v39 }
 0x300   : > { %v5670_v28 = vpop.eup %5669  ;;  %v3724_v10 = vunpack.c.l.b16 %v3038_v14  ;;  %v3098_v60 = vpack.c.bf16 %v5668_v38, %v5668_v38  ;;  %v3879_v23 = vunpack.c.l.b16 %v3097_v40  ;;  %5677 = vtanh.f32 %v2630_v18  ;;  %v2096_v14 = vpop.f32.mrf.mxu3 }
 0x301   : > { %v5672_v8 = vpop.eup %5671  ;;  %v2203_v37 = vpack.c.bf16 %v1660_v53, %v1660_v53  ;;  %v2968_v13 = vpack.c.bf16 %v5660_v48, %v5660_v48  ;;  %v2969_v27 = vpack.c.bf16 %v5666_v47, %v5666_v47  ;;  %v3365_v1 = vunpack.c.l.b16 %v2967_v5 }
 0x302   : > { %v7582_v36 = vpop.eup %5673  ;;  %v3880_v52 = vunpack.c.l.b16 %v3098_v60  ;;  %v3754_v59 = vpack.c.b16 %v3724_v10, %v3723_v7  ;;  %v3092_v17 = vpack.c.bf16 %v5670_v28, %v5670_v28  ;;  %v7584_v61 = vunpack.c.l.b16 %v3094_v0 }
 0x303   : > { %v5676_v41 = vpop.eup %5675  ;;  %v2095_v46 = vadd.f32 %v7526_v62, %v2094_v20  ;;  %v3141_v53 = vpack.c.bf16 %v5672_v8, %v5672_v8  ;;  %v3753_v40 = vpack.c.b16 %v3722_v3, %v7557_v43  ;;  %v2097_v39 = vadd.f32 %v7526_v62, %v2096_v14 }
 0x304   : > { %v2970_v38 = vpack.c.bf16 %v5676_v41, %v5676_v41  ;;  %3791 = vmatpush.bf16.msrb.mxu3 %v3754_v59  ;;  %v2459_v18 = vunpack.c.l.bf16 %v2203_v37  ;;  %v3877_v48 = vunpack.c.l.b16 %v3095_v57  ;;  %v3878_v47 = vunpack.c.l.b16 %v3096_v11  ;;  %v3685_v11 = vld [vmem:[#allocation1] sm:$0xff] }
 0x305   : > { %v3896_v60 = vpack.c.b16 %v3880_v52, %v3879_v23  ;;  %v3366_v7 = vunpack.c.l.b16 %v2968_v13  ;;  %v3367_v10 = vunpack.c.l.b16 %v2969_v27  ;;  %v3892_v0 = vpack.c.b16 %v7572_v54, %v7553_v9 }
 0x306   : > { %v3368_v5 = vunpack.c.l.b16 %v2970_v38  ;;  %v1661_v28 = vpop.f32.mrf.mxu0  ;;  %v5678_v20 = vpop.eup %5677  ;;  %v2090_v8 = vadd.f32 %v7526_v62, %v7440_v2  ;;  %v2092_v59 = vadd.f32 %v7526_v62, %v7494_v30  ;;  %v2377_v37 = vpack.c.bf16 %v2095_v46, %v2095_v46  ;;  %v8453_v46 = vld [vmem:[#allocation37_spill] sm:$0xff] }
 0x307   : > { %v1662_v41 = vadd.f32 %v7526_v62, %v1661_v28  ;;  %v7596_v3 = vunpack.c.l.b16 %v3141_v53  ;;  %v3142_v52 = vpack.c.bf16 %v5678_v20, %v5678_v20  ;;  %v2378_v57 = vpack.c.bf16 %v2097_v39, %v2097_v39 }
 0x308   : > { %v3384_v43 = vpack.c.b16 %v3368_v5, %v3367_v10  ;;  %3792 = vmatpush.bf16.msrb.mxu3 %v3753_v40  ;;  %5679 = vtanh.f32 %v2459_v18  ;;  %v3895_v13 = vpack.c.b16 %v3878_v47, %v3877_v48  ;;  %v3873_v2 = vunpack.c.l.b16 %v3091_v42 }
 0x309   : > { %v2204_v23 = vpack.c.bf16 %v1662_v41, %v1662_v41  ;;  %v7600_v14 = vunpack.c.l.b16 %v3142_v52  ;;  %v2375_v53 = vpack.c.bf16 %v2090_v8, %v2090_v8  ;;  %v2376_v40 = vpack.c.bf16 %v2092_v59, %v2092_v59  ;;  %v8434_v52 = vld [vmem:[#allocation129_spill] sm:$0xff] }
 0x30a   : > { %3414 = vmatpush.bf16.msra.mxu1 %v3384_v43  ;;  %v2633_v39 = vunpack.c.l.bf16 %v2377_v37  ;;  %v3383_v18 = vpack.c.b16 %v3366_v7, %v3365_v1  ;;  %v3874_v48 = vunpack.c.l.b16 %v3092_v17  ;;  %v2634_v47 = vunpack.c.l.bf16 %v2378_v57  ;;  %v8435_v57 = vld [vmem:[#allocation130_spill] sm:$0xff] }
 0x30b   : > { %v2460_v38 = vunpack.c.l.bf16 %v2204_v23  ;;  %3793 = vmatmul.bf16.vlgmr.msrb.gmra.mxu3 %v3685_v11  ;;  %v8432_v42 = vpack.c.bf16 %v7449_v19, %v7449_v19  ;;  %v8433_v5 = vpack.c.bf16 %v7460_v44, %v7460_v44  ;;  %v3894_v20 = vpack.c.b16 %v7584_v61, %v7555_v58 }
 0x30c   : > { %3926 = vmatpush.bf16.msra.mxu3 %v3896_v60  ;;  %v3087_v17 = vpack.c.bf16 %v7510_v49, %v7510_v49  ;;  %v3088_v1 = vpack.c.bf16 %v7582_v36, %v7582_v36  ;;  %v3382_v19 = vpack.c.b16 %v7566_v21, %v7543_v56  ;;  %v2631_v8 = vunpack.c.l.bf16 %v2375_v53  ;;  %v8437_v53 = vld [vmem:[#allocation127_spill] sm:$0xff]  ;;  %v8446_v56 = vld [vmem:[#allocation52_spill] sm:$0xff] }
 0x30d   : > { %v3361_v10 = vunpack.c.l.b16 %v8432_v42  ;;  %v3362_v28 = vunpack.c.l.b16 %v8433_v5  ;;  %5681 = vtanh.f32 %v2460_v38  ;;  %v2632_v59 = vunpack.c.l.bf16 %v2376_v40  ;;  %v8438_v40 = vld [vmem:[#allocation128_spill] sm:$0xff]  ;;  %v8441_v42 = vld [vmem:[#allocation79_spill] sm:$0xff] }
 0x30e   : > { %5683 = vtanh.f32 %v7547_v24  ;;  %v1664_v7 = vpop.f32.mrf.mxu0  ;;  %3415 = vmatpush.bf16.msra.mxu1 %v3383_v18  ;;  %v5680_v44 = vpop.eup %5679  ;;  %v3893_v61 = vpack.c.b16 %v3874_v48, %v3873_v2  ;;  %v3086_v5 = vpack.c.bf16 %v8441_v42, %v8441_v42  ;;  %v3869_v11 = vunpack.c.l.b16 %v3087_v17  ;;  %v8447_v42 = vld [vmem:[#allocation47_spill] sm:$0xff]  ;;  %v8451_v24 = vld [vmem:[#allocation60_spill] sm:$0xff] }
 0x30f   : > { %v1665_v41 = vadd.f32 %v7526_v62, %v1664_v7  ;;  %5685 = vtanh.f32 %v2633_v39  ;;  %v2971_v37 = vpack.c.bf16 %v5680_v44, %v5680_v44  ;;  %v3381_v38 = vpack.c.b16 %v3362_v28, %v3361_v10  ;;  %v8442_v7 = vld [vmem:[#allocation65_spill] sm:$0xff] }
 0x310   : > { %3927 = vmatpush.bf16.msra.mxu3 %v3895_v13  ;;  %5687 = vtanh.f32 %v2634_v47  ;;  %v8436_v13 = vld [vmem:[#allocation67_spill] sm:$0xff]  ;;  %v3870_v43 = vunpack.c.l.b16 %v3088_v1  ;;  %v8444_v28 = vld [vmem:[#allocation53_spill] sm:$0xff]  ;;  %v2244_v17 = vpack.c.bf16 %v8447_v42, %v8447_v42  ;;  %v3868_v49 = vunpack.c.l.b16 %v3086_v5 }
 0x311   : > { %v2205_v36 = vpack.c.bf16 %v1665_v41, %v1665_v41  ;;  %5689 = vtanh.f32 %v7470_v29  ;;  %v3085_v2 = vpack.c.bf16 %v8436_v13, %v8436_v13  ;;  %v8445_v39 = vpack.c.bf16 %v8444_v28, %v8444_v28  ;;  %v8448_v1 = vld [vmem:[#allocation57_spill] sm:$0xff]  ;;  %v8456_v5 = vld [vmem:[#allocation43_spill] sm:$0xff] }
 0x312   : > { %3416 = vmatpush.bf16.msra.mxu1 %v3382_v19  ;;  %5691 = vtanh.f32 %v2631_v8  ;;  %v8443_v19 = vld [vmem:[#allocation73_spill] sm:$0xff]  ;;  %v7653_v21 = vunpack.c.l.b16 %v2971_v37 }
 0x313   : > { %v5682_v23 = vpop.eup %5681  ;;  %v2461_v13 = vunpack.c.l.bf16 %v2205_v36  ;;  %5693 = vtanh.f32 %v2632_v59  ;;  %v2501_v47 = vunpack.c.l.bf16 %v8445_v39  ;;  %v8449_v59 = vpack.c.bf16 %v8448_v1, %v8448_v1  ;;  %v8450_v36 = vld [vmem:[#allocation45_spill] sm:$0xff] }
 0x314   : > { %3928 = vmatpush.bf16.msra.mxu3 %v3894_v20  ;;  %v5684_v29 = vpop.eup %5683  ;;  %v2972_v20 = vpack.c.bf16 %v5682_v23, %v5682_v23  ;;  %5695 = vtanh.f32 %v8446_v56  ;;  %v3083_v56 = vpack.c.bf16 %v8451_v24, %v8451_v24  ;;  %v3891_v1 = vpack.c.b16 %v3870_v43, %v3869_v11  ;;  %v8454_v24 = vld [vmem:[#allocation112_spill] sm:$0xff] }
 0x315   : > { %v5686_v41 = vpop.eup %5685  ;;  %5697 = vtanh.f32 %v8450_v36  ;;  %v3084_v37 = vpack.c.bf16 %v5684_v29, %v5684_v29  ;;  %v8452_v36 = vld [vmem:[#allocation49_spill] sm:$0xff]  ;;  %v8455_v29 = vpack.c.b16 %v8453_v46, %v8454_v24 }
 0x316   : > { %v5688_v10 = vpop.eup %5687  ;;  %v7655_v23 = vunpack.c.l.b16 %v2972_v20  ;;  %v1666_v8 = vpop.f32.mrf.mxu0  ;;  %3417 = vmatpush.bf16.msra.mxu1 %v3381_v38  ;;  %v3867_v20 = vunpack.c.l.b16 %v3085_v2  ;;  %5699 = vtanh.f32 %v2461_v13  ;;  %v3145_v2 = vpack.c.bf16 %v5686_v41, %v5686_v41 }
 0x317   : > { %v1667_v28 = vadd.f32 %v7526_v62, %v1666_v8  ;;  %v5690_v39 = vpop.eup %5689  ;;  %v1752_v8 = vadd.f32 %v7526_v62, %v8452_v36  ;;  %5701 = vtanh.f32 %v2501_v47  ;;  %v3146_v30 = vpack.c.bf16 %v5688_v10, %v5688_v10  ;;  %v8459_v36 = vld [vmem:[#allocation31_spill] sm:$0xff] }
 0x318   : > { %3929 = vmatpush.bf16.msra.mxu3 %v3893_v61  ;;  %v2502_v61 = vunpack.c.l.bf16 %v8449_v59  ;;  %v5692_v59 = vpop.eup %5691  ;;  %v2242_v13 = vpack.c.bf16 %v8456_v5, %v8456_v5  ;;  %v8460_v47 = vld [vmem:[#allocation71_spill] sm:$0xff]  ;;  %v3018_v24 = vpack.c.bf16 %v5690_v39, %v5690_v39  ;;  %v3865_v10 = vunpack.c.l.b16 %v3083_v56 }
 0x319   : > { %v2206_v42 = vpack.c.bf16 %v1667_v28, %v1667_v28  ;;  %v5694_v38 = vpop.eup %5693  ;;  %v2500_v28 = vunpack.c.l.bf16 %v2244_v17  ;;  %v3017_v46 = vpack.c.bf16 %v8460_v47, %v8460_v47  ;;  %v3890_v5 = vpack.c.b16 %v3868_v49, %v3867_v20 }
 0x31a   : > { %3418 = vmatpush.bf16.msra.mxu1 %v8455_v29  ;;  %5703 = vtanh.f32 %v2502_v61  ;;  %v5696_v54 = vpop.eup %5695  ;;  %v3866_v29 = vunpack.c.l.b16 %v3084_v37  ;;  %v8461_v61 = vld [vmem:[#allocation91_spill] sm:$0xff]  ;;  %v3143_v44 = vpack.c.bf16 %v5692_v59, %v5692_v59  ;;  %v4120_v58 = vunpack.c.l.b16 %v3146_v30  ;;  %v8464_v37 = vld [vmem:[#allocation48_spill] sm:$0xff] }
 0x31b   : > { %v2462_v9 = vunpack.c.l.bf16 %v2206_v42  ;;  %5705 = vtanh.f32 %v8459_v36  ;;  %v5698_v41 = vpop.eup %5697  ;;  %v8462_v42 = vld [vmem:[#allocation35_spill] sm:$0xff]  ;;  %v2240_v60 = vpack.c.bf16 %v1752_v8, %v1752_v8  ;;  %v2498_v18 = vunpack.c.l.bf16 %v2242_v13 }
 0x31c   : > { %3930 = vmatpush.bf16.msra.mxu3 %v3892_v0  ;;  %v8457_v0 = vld [vmem:[#allocation41_spill] sm:$0xff]  ;;  %v8463_v27 = vpack.c.b16 %v8461_v61, %v8462_v42  ;;  %v5700_v36 = vpop.eup %5699  ;;  %v3015_v20 = vpack.c.bf16 %v5696_v54, %v5696_v54  ;;  %v3608_v59 = vunpack.c.l.b16 %v3018_v24  ;;  %v3889_v30 = vpack.c.b16 %v3866_v29, %v3865_v10  ;;  %v8466_v13 = vld [vmem:[#allocation123_spill] sm:$0xff] }
 0x31d   : > { %v8458_v43 = vpack.c.bf16 %v8457_v0, %v8457_v0  ;;  %5707 = vtanh.f32 %v2462_v9  ;;  %v3144_v0 = vpack.c.bf16 %v5694_v38, %v5694_v38  ;;  %v5702_v56 = vpop.eup %5701  ;;  %v3016_v9 = vpack.c.bf16 %v5698_v41, %v5698_v41  ;;  %v8471_v41 = vld [vmem:[#allocation39_spill] sm:$0xff] }
 0x31e   : > { %v1669_v17 = vpop.f32.mrf.mxu0  ;;  %3419 = vmatpush.bf16.msra.mxu1 %v8463_v27  ;;  %5709 = vtanh.f32 %v2500_v28  ;;  %v3607_v27 = vunpack.c.l.b16 %v3017_v46  ;;  %v2973_v8 = vpack.c.bf16 %v5700_v36, %v5700_v36  ;;  %v8467_v28 = vld [vmem:[#allocation62_spill] sm:$0xff]  ;;  %v2496_v24 = vunpack.c.l.bf16 %v2240_v60 }
 0x31f   : > { %v2497_v11 = vunpack.c.l.bf16 %v8458_v43  ;;  %v4119_v43 = vunpack.c.l.b16 %v3145_v2  ;;  %v1670_v39 = vadd.f32 %v7526_v62, %v1669_v17  ;;  %v8468_v61 = vpack.c.b16 %v8466_v13, %v8467_v28 }
 0x320   : > { %3931 = vmatpush.bf16.msra.mxu3 %v3891_v1  ;;  %v8465_v1 = vpack.c.bf16 %v8464_v37, %v8464_v37  ;;  %v5704_v47 = vpop.eup %5703  ;;  %v4117_v17 = vunpack.c.l.b16 %v3143_v44  ;;  %v4118_v42 = vunpack.c.l.b16 %v3144_v0  ;;  %v8472_v10 = vpack.c.bf16 %v8471_v41, %v8471_v41 }
 0x321   : > { %5711 = vtanh.f32 %v2497_v11  ;;  %v2207_v38 = vpack.c.bf16 %v1670_v39, %v1670_v39  ;;  %v5706_v2 = vpop.eup %5705  ;;  %v4144_v48 = vpack.c.b16 %v4120_v58, %v4119_v43  ;;  %v8470_v11 = vld [vmem:[#allocation56_spill] sm:$0xff]  ;;  %v3014_v36 = vpack.c.bf16 %v5704_v47, %v5704_v47 }
 0x322   : > { %v2495_v49 = vunpack.c.l.bf16 %v8465_v1  ;;  %3420 = vmatpush.bf16.msra.mxu1 %v8468_v61  ;;  %v8469_v1 = vld [vmem:[#allocation50_spill] sm:$0xff]  ;;  %v1897_v46 = vadd.f32 %v7526_v62, %v8470_v11  ;;  %5713 = vtanh.f32 %v2498_v18  ;;  %v2493_v29 = vunpack.c.l.bf16 %v8472_v10  ;;  %v8473_v18 = vld [vmem:[#allocation29_spill] sm:$0xff]  ;;  %v8474_v11 = vld [vmem:[#allocation27_spill] sm:$0xff] }
 0x323   : > { %v5708_v37 = vpop.eup %5707  ;;  %v2238_v54 = vpack.c.bf16 %v8469_v1, %v8469_v1  ;;  %v3605_v44 = vunpack.c.l.b16 %v3015_v20  ;;  %v3606_v0 = vunpack.c.l.b16 %v3016_v9  ;;  %v2463_v58 = vunpack.c.l.bf16 %v2207_v38 }
 0x324   : > { %3932 = vmatpush.bf16.msra.mxu3 %v3890_v5  ;;  %v3013_v5 = vpack.c.bf16 %v5702_v56, %v5702_v56  ;;  %v2974_v39 = vpack.c.bf16 %v5708_v37, %v5708_v37  ;;  %v5710_v13 = vpop.eup %5709  ;;  %v3632_v43 = vpack.c.b16 %v3608_v59, %v3607_v27  ;;  %5715 = vtanh.f32 %v2495_v49 }
 0x325   : > { %v7701_v61 = vunpack.c.l.b16 %v2973_v8  ;;  %v8475_v41 = vpack.c.b16 %v8473_v18, %v8474_v11  ;;  %v4143_v56 = vpack.c.b16 %v4118_v42, %v4117_v17  ;;  %v2494_v47 = vunpack.c.l.bf16 %v2238_v54  ;;  %v8478_v42 = vld [vmem:[#allocation46_spill] sm:$0xff] }
 0x326   : > { %v7703_v1 = vunpack.c.l.b16 %v2974_v39  ;;  %v1671_v60 = vpop.f32.mrf.mxu0  ;;  %v2298_v37 = vpack.c.bf16 %v1897_v46, %v1897_v46  ;;  %5717 = vtanh.f32 %v2496_v24  ;;  %v3011_v9 = vpack.c.bf16 %v5706_v2, %v5706_v2  ;;  %v8476_v39 = vld [vmem:[#allocation117_spill] sm:$0xff] }
 0x327   : > { %v5712_v28 = vpop.eup %5711  ;;  %3421 = vmatpush.bf16.msra.mxu1 %v8475_v41  ;;  %v1672_v20 = vadd.f32 %v7526_v62, %v1671_v60  ;;  %v3012_v27 = vpack.c.bf16 %v5710_v13, %v5710_v13  ;;  %v3603_v49 = vunpack.c.l.b16 %v3013_v5  ;;  %5719 = vtanh.f32 %v2463_v58  ;;  %v8479_v46 = vld [vmem:[#allocation101_spill] sm:$0xff]  ;;  %v8481_v5 = vld [vmem:[#allocation98_spill] sm:$0xff] }
 0x328   : > { %3933 = vmatpush.bf16.msra.mxu3 %v3889_v30  ;;  %v3498_v59 = vpack.c.b16 %v7703_v1, %v7701_v61  ;;  %v5714_v38 = vpop.eup %5713  ;;  %v3604_v30 = vunpack.c.l.b16 %v3014_v36  ;;  %v3631_v10 = vpack.c.b16 %v3606_v0, %v3605_v44  ;;  %v1887_v54 = vadd.f32 %v7526_v62, %v8478_v42  ;;  %v8482_v13 = vld [vmem:[#allocation109_spill] sm:$0xff]  ;;  %v8484_v60 = vld [vmem:[#allocation106_spill] sm:$0xff]  ;;  %v8485_v42 = vld [vmem:[#allocation40_spill] sm:$0xff] }
 0x329   : > { %v2208_v8 = vpack.c.bf16 %v1672_v20, %v1672_v20  ;;  %v8480_v2 = vpack.c.bf16 %v8479_v46, %v8479_v46  ;;  %5721 = vtanh.f32 %v2493_v29  ;;  %v2295_v36 = vpack.c.bf16 %v8481_v5, %v8481_v5  ;;  %v8543_v1 = vld [vmem:[#allocation97_spill] sm:$0xff] }
 0x32a   : > { %3422 = vmatmul.bf16.vlgmr.msra.gmra.mxu1 %v8476_v39  ;;  %v8483_v44 = vpack.c.bf16 %v8482_v13, %v8482_v13  ;;  %5723 = vtanh.f32 %v2494_v47  ;;  %v2296_v18 = vpack.c.bf16 %v8484_v60, %v8484_v60  ;;  %v2554_v11 = vunpack.c.l.bf16 %v2298_v37 }
 0x32b   : > { %3657 = vmatpush.bf16.msrb.mxu1 %v3632_v43  ;;  %v2492_v24 = vunpack.c.l.bf16 %v8480_v2  ;;  %v2464_v58 = vunpack.c.l.bf16 %v2208_v8  ;;  %v5716_v43 = vpop.eup %5715  ;;  %v3009_v41 = vpack.c.bf16 %v5712_v28, %v5712_v28  ;;  %v3010_v20 = vpack.c.bf16 %v5714_v38, %v5714_v38  ;;  %v8486_v2 = vld [vmem:[#allocation42_spill] sm:$0xff] }
 0x32c   : > { %4169 = vmatpush.bf16.msrb.mxu3 %v4144_v48  ;;  %v8477_v48 = vld [vmem:[#allocation44_spill] sm:$0xff]  ;;  %v2553_v0 = vunpack.c.l.bf16 %v8483_v44  ;;  %v5718_v39 = vpop.eup %5717  ;;  %v3601_v29 = vunpack.c.l.b16 %v3011_v9  ;;  %v1880_v46 = vadd.f32 %v7526_v62, %v8485_v42  ;;  %v1882_v47 = vadd.f32 %v7526_v62, %v8486_v2 }
 0x32d   : > { %v1885_v17 = vadd.f32 %v7526_v62, %v8477_v48  ;;  %5725 = vtanh.f32 %v2464_v58  ;;  %v3630_v48 = vpack.c.b16 %v3604_v30, %v3603_v49  ;;  %v8487_v5 = vpack.c.b16 %v7600_v14, %v7596_v3  ;;  %v5720_v28 = vpop.eup %5719  ;;  %v8488_v42 = vld [vmem:[#allocation36_spill] sm:$0xff]  ;;  %v8489_v14 = vld [vmem:[#allocation38_spill] sm:$0xff] }
 0x32e   : > { %5727 = vtanh.f32 %v2492_v24  ;;  %v2294_v37 = vpack.c.bf16 %v1887_v54, %v1887_v54  ;;  %v2551_v38 = vunpack.c.l.bf16 %v2295_v36  ;;  %v2552_v49 = vunpack.c.l.bf16 %v2296_v18 }
 0x32f   : > { %3658 = vmatpush.bf16.msrb.mxu1 %v3631_v10  ;;  %v2293_v8 = vpack.c.bf16 %v1885_v17, %v1885_v17  ;;  %v1674_v10 = vpop.f32.mrf.mxu0  ;;  %5729 = vtanh.f32 %v2553_v0  ;;  %v3007_v30 = vpack.c.bf16 %v5716_v43, %v5716_v43  ;;  %v3008_v13 = vpack.c.bf16 %v5718_v39, %v5718_v39 }
 0x330   : > { %4170 = vmatpush.bf16.msrb.mxu3 %v4143_v56  ;;  %v3602_v56 = vunpack.c.l.b16 %v3012_v27  ;;  %v1675_v9 = vadd.f32 %v7526_v62, %v1674_v10  ;;  %v5722_v27 = vpop.eup %5721  ;;  %5731 = vtanh.f32 %v2554_v11  ;;  %v3599_v17 = vunpack.c.l.b16 %v3009_v41 }
 0x331   : > { %v5724_v44 = vpop.eup %5723  ;;  %v3600_v24 = vunpack.c.l.b16 %v3010_v20  ;;  %v2289_v3 = vpack.c.bf16 %v8488_v42, %v8488_v42  ;;  %v1877_v54 = vadd.f32 %v7526_v62, %v8489_v14  ;;  %v2549_v36 = vunpack.c.l.bf16 %v2293_v8 }
 0x332   : > { %v2209_v58 = vpack.c.bf16 %v1675_v9, %v1675_v9  ;;  %v3629_v60 = vpack.c.b16 %v3602_v56, %v3601_v29  ;;  %v2975_v0 = vpack.c.bf16 %v5720_v28, %v5720_v28  ;;  %v2291_v43 = vpack.c.bf16 %v1880_v46, %v1880_v46 }
 0x333   : > { %3659 = vmatpush.bf16.msrb.mxu1 %v3630_v48  ;;  %v8490_v48 = vpack.c.b16 %v7506_v4, %v7481_v15  ;;  %v5726_v18 = vpop.eup %5725  ;;  %v2292_v11 = vpack.c.bf16 %v1882_v47, %v1882_v47  ;;  %v2550_v39 = vunpack.c.l.bf16 %v2294_v37  ;;  %5733 = vtanh.f32 %v2551_v38  ;;  %v7745_v47 = vpop.f32.mrf.mxu3 }
 0x334   : > { %4171 = vmatpush.bf16.msrb.mxu3 %v8487_v5  ;;  %v5728_v41 = vpop.eup %5727  ;;  %5735 = vtanh.f32 %v2552_v49  ;;  %v3005_v20 = vpack.c.bf16 %v5722_v27, %v5722_v27  ;;  %v3006_v29 = vpack.c.bf16 %v5724_v44, %v5724_v44  ;;  %v2976_v56 = vpack.c.bf16 %v5726_v18, %v5726_v18 }
 0x335   : > { %v5730_v2 = vpop.eup %5729  ;;  %v3597_v10 = vunpack.c.l.b16 %v3007_v30  ;;  %v3598_v5 = vunpack.c.l.b16 %v3008_v13  ;;  %v2465_v8 = vunpack.c.l.bf16 %v2209_v58  ;;  %v3628_v28 = vpack.c.b16 %v3600_v24, %v3599_v17  ;;  %v8492_v30 = vld [vmem:[#allocation120_spill] sm:$0xff] }
 0x336   : > { %v5732_v9 = vpop.eup %5731  ;;  %v2290_v42 = vpack.c.bf16 %v1877_v54, %v1877_v54  ;;  %5737 = vtanh.f32 %v2549_v36  ;;  %v7741_v4 = vunpack.c.l.b16 %v2975_v0  ;;  %v7743_v15 = vunpack.c.l.b16 %v2976_v56  ;;  %v8493_v54 = vld [vmem:[#allocation28_spill] sm:$0xff]  ;;  %v8497_v56 = vld [vmem:[#allocation34_spill] sm:$0xff] }
 0x337   : > { %3660 = vmatpush.bf16.msrb.mxu1 %v3629_v60  ;;  %v1676_v46 = vpop.f32.mrf.mxu0  ;;  %v8491_v37 = vpack.c.b16 %v8443_v19, %v8442_v7  ;;  %v2547_v38 = vunpack.c.l.bf16 %v2291_v43  ;;  %v2548_v27 = vunpack.c.l.bf16 %v2292_v11  ;;  %5739 = vtanh.f32 %v2550_v39  ;;  %v8495_v43 = vld [vmem:[#allocation30_spill] sm:$0xff]  ;;  %v8496_v39 = vld [vmem:[#allocation32_spill] sm:$0xff] }
 0x338   : > { %4172 = vmatpush.bf16.msrb.mxu3 %v8490_v48  ;;  %v1677_v49 = vadd.f32 %v7526_v62, %v1676_v46  ;;  %v3003_v13 = vpack.c.bf16 %v8492_v30, %v8492_v30  ;;  %v3004_v44 = vpack.c.bf16 %v5728_v41, %v5728_v41  ;;  %v3595_v17 = vunpack.c.l.b16 %v3005_v20 }
 0x339   : > { %v3499_v24 = vpack.c.b16 %v7743_v15, %v7741_v4  ;;  %v5734_v58 = vpop.eup %5733  ;;  %v3596_v60 = vunpack.c.l.b16 %v3006_v29  ;;  %5741 = vtanh.f32 %v2465_v8  ;;  %v3627_v7 = vpack.c.b16 %v3598_v5, %v3597_v10 }
 0x33a   : > { %v2210_v14 = vpack.c.bf16 %v1677_v49, %v1677_v49  ;;  %v5736_v19 = vpop.eup %5735  ;;  %v1865_v36 = vadd.f32 %v7526_v62, %v8493_v54  ;;  %v3065_v0 = vpack.c.bf16 %v5730_v2, %v5730_v2  ;;  %v3066_v48 = vpack.c.bf16 %v5732_v9, %v5732_v9 }
 0x33b   : > { %3661 = vmatpush.bf16.msrb.mxu1 %v3628_v28  ;;  %v8494_v18 = vpack.c.b16 %v7401_v31, %v7387_v51  ;;  %v1867_v11 = vadd.f32 %v7526_v62, %v8495_v43  ;;  %v2287_v41 = vpack.c.bf16 %v8496_v39, %v8496_v39  ;;  %5743 = vtanh.f32 %v2547_v38 }
 0x33c   : > { %4173 = vmatpush.bf16.msrb.mxu3 %v8491_v37  ;;  %v2466_v20 = vunpack.c.l.bf16 %v2210_v14  ;;  %v5738_v29 = vpop.eup %5737  ;;  %v2288_v10 = vpack.c.bf16 %v8497_v56, %v8497_v56  ;;  %v2545_v5 = vunpack.c.l.bf16 %v2289_v3  ;;  %v2546_v2 = vunpack.c.l.bf16 %v2290_v42  ;;  %v8500_v42 = vld [vmem:[#allocation26_spill] sm:$0xff] }
 0x33d   : > { %5745 = vtanh.f32 %v2548_v27  ;;  %v5740_v8 = vpop.eup %5739  ;;  %v3593_v28 = vunpack.c.l.b16 %v3003_v13  ;;  %v3594_v51 = vunpack.c.l.b16 %v3004_v44  ;;  %v3626_v31 = vpack.c.b16 %v3596_v60, %v3595_v17  ;;  %v7775_v60 = vpop.f32.mrf.mxu3 }
 0x33e   : > { %5747 = vtanh.f32 %v2466_v20  ;;  %v3063_v9 = vpack.c.bf16 %v5734_v58, %v5734_v58  ;;  %v3064_v46 = vpack.c.bf16 %v5736_v19, %v5736_v19  ;;  %v3751_v37 = vunpack.c.l.b16 %v3065_v0 }
 0x33f   : > { %3662 = vmatpush.bf16.msrb.mxu1 %v3627_v7  ;;  %v3752_v49 = vunpack.c.l.b16 %v3066_v48  ;;  %v7766_v30 = vpop.f32.mrf.mxu0  ;;  %v8498_v38 = vpack.c.b16 %v7376_v34, %v7362_v12  ;;  %v5742_v14 = vpop.eup %5741  ;;  %v8499_v7 = vld [vmem:[#allocation24_spill] sm:$0xff]  ;;  %v1862_v27 = vadd.f32 %v7526_v62, %v8500_v42  ;;  %v2285_v13 = vpack.c.bf16 %v1865_v36, %v1865_v36 }
 0x340   : > { %4174 = vmatpush.bf16.msrb.mxu3 %v8494_v18  ;;  %v1860_v3 = vadd.f32 %v7526_v62, %v8499_v7  ;;  %v2286_v44 = vpack.c.bf16 %v1867_v11, %v1867_v11  ;;  %v2543_v17 = vunpack.c.l.bf16 %v2287_v41  ;;  %v2544_v58 = vunpack.c.l.bf16 %v2288_v10 }
 0x341   : > { %5749 = vtanh.f32 %v2545_v5  ;;  %v5744_v19 = vpop.eup %5743  ;;  %v3061_v54 = vpack.c.bf16 %v5738_v29, %v5738_v29  ;;  %v3062_v12 = vpack.c.bf16 %v5740_v8, %v5740_v8  ;;  %v3625_v34 = vpack.c.b16 %v3594_v51, %v3593_v28 }
 0x342   : > { %5751 = vtanh.f32 %v2546_v2  ;;  %v3749_v48 = vunpack.c.l.b16 %v3063_v9  ;;  %v3750_v18 = vunpack.c.l.b16 %v3064_v46  ;;  %v2977_v43 = vpack.c.bf16 %v5742_v14, %v5742_v14  ;;  %v8502_v46 = vld [vmem:[#allocation116_spill] sm:$0xff] }
 0x343   : > { %3663 = vmatpush.bf16.msrb.mxu1 %v3626_v31  ;;  %v5746_v0 = vpop.eup %5745  ;;  %v3768_v39 = vpack.c.b16 %v3752_v49, %v3751_v37  ;;  %v8501_v36 = vpack.c.b16 %v7355_v45, %v7335_v32  ;;  %v2283_v41 = vpack.c.bf16 %v1860_v3, %v1860_v3  ;;  %v2284_v20 = vpack.c.bf16 %v1862_v27, %v1862_v27 }
 0x344   : > { %4175 = vmatpush.bf16.msrb.mxu3 %v8498_v38  ;;  %v5748_v11 = vpop.eup %5747  ;;  %v2541_v56 = vunpack.c.l.bf16 %v2285_v13  ;;  %v2542_v10 = vunpack.c.l.bf16 %v2286_v44  ;;  %5753 = vtanh.f32 %v2543_v17  ;;  %v3059_v29 = vpack.c.bf16 %v5744_v19, %v5744_v19 }
 0x345   : > { %v2978_v5 = vpack.c.bf16 %v5748_v11, %v5748_v11  ;;  %5755 = vtanh.f32 %v2544_v58  ;;  %v3060_v2 = vpack.c.bf16 %v5746_v0, %v5746_v0  ;;  %v3747_v8 = vunpack.c.l.b16 %v3061_v54  ;;  %v7789_v17 = vpop.f32.mrf.mxu3 }
 0x346   : > { %v3748_v51 = vunpack.c.l.b16 %v3062_v12  ;;  %v7780_v31 = vunpack.c.l.b16 %v2977_v43  ;;  %v3767_v32 = vpack.c.b16 %v3750_v18, %v3749_v48  ;;  %v2539_v49 = vunpack.c.l.bf16 %v2283_v41 }
 0x347   : > { %3664 = vmatpush.bf16.msrb.mxu1 %v3625_v34  ;;  %v5750_v28 = vpop.eup %5749  ;;  %v7782_v9 = vunpack.c.l.b16 %v2978_v5  ;;  %v7784_v45 = vpop.f32.mrf.mxu0  ;;  %5757 = vtanh.f32 %v2541_v56  ;;  %v2540_v14 = vunpack.c.l.bf16 %v2284_v20  ;;  %v3745_v27 = vunpack.c.l.b16 %v3059_v29 }
 0x348   : > { %4176 = vmatpush.bf16.msrb.mxu3 %v8501_v36  ;;  %v5752_v37 = vpop.eup %5751  ;;  %5759 = vtanh.f32 %v2542_v10  ;;  %v3057_v7 = vpack.c.bf16 %v5750_v28, %v5750_v28  ;;  %v3746_v13 = vunpack.c.l.b16 %v3060_v2  ;;  %v3766_v44 = vpack.c.b16 %v3748_v51, %v3747_v8 }
 0x349   : > { %v3500_v38 = vpack.c.b16 %v7782_v9, %v7780_v31  ;;  %v3058_v42 = vpack.c.bf16 %v5752_v37, %v5752_v37  ;;  %5761 = vtanh.f32 %v2539_v49  ;;  %v8537_v9 = vld [vmem:[#allocation83_spill] sm:$0xff] }
 0x34a   : > { %3665 = vmatmul.bf16.vlgmr.msrb.gmra.mxu1 %v8502_v46  ;;  %v5754_v3 = vpop.eup %5753  ;;  %5763 = vtanh.f32 %v2540_v14  ;;  %v3743_v34 = vunpack.c.l.b16 %v3057_v7  ;;  %v3765_v18 = vpack.c.b16 %v3746_v13, %v3745_v27  ;;  %v8504_v27 = vld [vmem:[#allocation103_spill] sm:$0xff] }
 0x34b   : > { %3798 = vmatpush.bf16.msra.mxu1 %v3768_v39  ;;  %v5756_v58 = vpop.eup %5755  ;;  %v3055_v19 = vpack.c.bf16 %v5754_v3, %v5754_v3  ;;  %v3744_v0 = vunpack.c.l.b16 %v3058_v42  ;;  %v8503_v42 = vld [vmem:[#allocation104_spill] sm:$0xff] }
 0x34c   : > { %v3056_v12 = vpack.c.bf16 %v5756_v58, %v5756_v58  ;;  %v8505_v13 = vpack.c.b16 %v8503_v42, %v8504_v27  ;;  %v8507_v58 = vld [vmem:[#allocation95_spill] sm:$0xff]  ;;  %v8518_v42 = vld [vmem:[#allocation70_spill] sm:$0xff]  ;;  %v8519_v27 = vld [vmem:[#allocation69_spill] sm:$0xff] }
 0x34d   : > { %v5758_v54 = vpop.eup %5757  ;;  %v3741_v41 = vunpack.c.l.b16 %v3055_v19  ;;  %v3764_v56 = vpack.c.b16 %v3744_v0, %v3743_v34  ;;  %v7791_v5 = vpop.f32.mrf.mxu3  ;;  %v8509_v34 = vld [vmem:[#allocation88_spill] sm:$0xff]  ;;  %v8510_v0 = vld [vmem:[#allocation87_spill] sm:$0xff] }
 0x34e   : > { %v5760_v43 = vpop.eup %5759  ;;  %v3053_v39 = vpack.c.bf16 %v5758_v54, %v5758_v54  ;;  %v3742_v20 = vunpack.c.l.b16 %v3056_v12 }
 0x34f   : > { %3799 = vmatpush.bf16.msra.mxu1 %v3767_v32  ;;  %v1684_v48 = vpop.f32.mrf.mxu0  ;;  %v5762_v36 = vpop.eup %5761  ;;  %v3054_v11 = vpack.c.bf16 %v5760_v43, %v5760_v43  ;;  %v8512_v43 = vld [vmem:[#allocation82_spill] sm:$0xff] }
 0x350   : > { %v5764_v10 = vpop.eup %5763  ;;  %v3051_v29 = vpack.c.bf16 %v5762_v36, %v5762_v36  ;;  %v3739_v8 = vunpack.c.l.b16 %v3053_v39  ;;  %v3763_v32 = vpack.c.b16 %v3742_v20, %v3741_v41  ;;  %v8513_v39 = vld [vmem:[#allocation81_spill] sm:$0xff] }
 0x351   : > { %v3052_v2 = vpack.c.bf16 %v5764_v10, %v5764_v10  ;;  %v3740_v28 = vunpack.c.l.b16 %v3054_v11  ;;  %v8514_v36 = vpack.c.b16 %v8512_v43, %v8513_v39  ;;  %v8522_v43 = vld [vmem:[#allocation63_spill] sm:$0xff] }
 0x352   : > { %v3737_v46 = vunpack.c.l.b16 %v3051_v29  ;;  %v8515_v29 = vld [vmem:[#allocation76_spill] sm:$0xff] }
 0x353   : > { %3800 = vmatpush.bf16.msra.mxu1 %v3766_v44  ;;  %v3738_v37 = vunpack.c.l.b16 %v3052_v2  ;;  %v3762_v49 = vpack.c.b16 %v3740_v28, %v3739_v8  ;;  %v8506_v44 = vld [vmem:[#allocation96_spill] sm:$0xff]  ;;  %v8516_v2 = vld [vmem:[#allocation75_spill] sm:$0xff] }
 0x354   : > { %v8508_v19 = vpack.c.b16 %v8506_v44, %v8507_v58  ;;  %v8517_v8 = vpack.c.b16 %v8515_v29, %v8516_v2 }
 0x355   : > { %v3761_v7 = vpack.c.b16 %v3738_v37, %v3737_v46  ;;  %v7793_v3 = vpop.f32.mrf.mxu3 }
 0x357   : > { %3801 = vmatpush.bf16.msra.mxu1 %v3765_v18  ;;  %v1686_v51 = vpop.f32.mrf.mxu0  ;;  %v8511_v18 = vpack.c.b16 %v8509_v34, %v8510_v0 }
 0x35b   : > { %3802 = vmatpush.bf16.msra.mxu1 %v3764_v56 }
 0x35d   : > { %v7801_v12 = vpop.f32.mrf.mxu3 }
 0x35f   : > { %3803 = vmatpush.bf16.msra.mxu1 %v3763_v32  ;;  %v1689_v14 = vpop.f32.mrf.mxu0  ;;  %v1687_v32 = vadd.f32 %v7526_v62, %v1686_v51  ;;  %v1680_v51 = vadd.f32 %v7526_v62, %v7766_v30 }
 0x360   : > { %v1690_v56 = vadd.f32 %v7526_v62, %v1689_v14  ;;  %v1682_v14 = vadd.f32 %v7526_v62, %v7784_v45 }
 0x361   : > { %v2214_v58 = vpack.c.bf16 %v1687_v32, %v1687_v32 }
 0x362   : > { %v2215_v37 = vpack.c.bf16 %v1690_v56, %v1690_v56 }
 0x363   : > { %3804 = vmatpush.bf16.msra.mxu1 %v3762_v49  ;;  %v1685_v49 = vadd.f32 %v7526_v62, %v1684_v48 }
 0x364   : > { %v2471_v34 = vunpack.c.l.bf16 %v2215_v37 }
 0x365   : > { %v7815_v28 = vpop.f32.mrf.mxu3  ;;  %v2213_v0 = vpack.c.bf16 %v1685_v49, %v1685_v49 }
 0x367   : > { %3805 = vmatpush.bf16.msra.mxu1 %v3761_v7  ;;  %v1691_v54 = vpop.f32.mrf.mxu0  ;;  %v2469_v56 = vunpack.c.l.bf16 %v2213_v0 }
 0x368   : > { %v1692_v41 = vadd.f32 %v7526_v62, %v1691_v54 }
 0x36a   : > { %v2216_v46 = vpack.c.bf16 %v1692_v41, %v1692_v41 }
 0x36b   : > { %4041 = vmatpush.bf16.msrb.mxu1 %v8505_v13  ;;  %v8520_v13 = vpack.c.b16 %v8518_v42, %v8519_v27 }
 0x36d   : > { %v7830_v45 = vpop.f32.mrf.mxu3 }
 0x36f   : > { %4042 = vmatpush.bf16.msrb.mxu1 %v8508_v19  ;;  %v1694_v11 = vpop.f32.mrf.mxu0  ;;  %v2472_v19 = vunpack.c.l.bf16 %v2216_v46 }
 0x370   : > { %v1695_v20 = vadd.f32 %v7526_v62, %v1694_v11  ;;  %v2470_v11 = vunpack.c.l.bf16 %v2214_v58  ;;  %v8524_v58 = vld [vmem:[#allocation125_spill] sm:$0xff] }
 0x372   : > { %v2217_v10 = vpack.c.bf16 %v1695_v20, %v1695_v20  ;;  %v2211_v20 = vpack.c.bf16 %v1680_v51, %v1680_v51 }
 0x373   : > { %4043 = vmatpush.bf16.msrb.mxu1 %v8511_v18  ;;  %v8521_v18 = vld [vmem:[#allocation64_spill] sm:$0xff] }
 0x374   : > { %v2473_v7 = vunpack.c.l.bf16 %v2217_v10  ;;  %v8523_v39 = vpack.c.b16 %v8521_v18, %v8522_v43  ;;  %v2467_v30 = vunpack.c.l.bf16 %v2211_v20  ;;  %v8527_v20 = vld [vmem:[#allocation58_spill] sm:$0xff] }
 0x376   : > { %5765 = vtanh.f32 %v2473_v7 }
 0x377   : > { %4044 = vmatpush.bf16.msrb.mxu1 %v8514_v36  ;;  %v1696_v44 = vpop.f32.mrf.mxu0  ;;  %v2212_v36 = vpack.c.bf16 %v1682_v14, %v1682_v14  ;;  %5767 = vtanh.f32 %v2472_v19  ;;  %v7834_v14 = vld [vmem:[#allocation8] ss:$0 sm:$0xff] }
 0x378   : > { %v1697_v54 = vadd.f32 %v7526_v62, %v1696_v44  ;;  %5769 = vtanh.f32 %v2471_v34  ;;  %v1815_v19 = vadd.f32 %v7834_v14, %v8524_v58 }
 0x379   : > { %v2468_v29 = vunpack.c.l.bf16 %v2212_v36 }
 0x37a   : > { %v2218_v48 = vpack.c.bf16 %v1697_v54, %v1697_v54  ;;  %v8525_v54 = vld [vmem:[#allocation94_spill] sm:$0xff] }
 0x37b   : > { %4045 = vmatpush.bf16.msrb.mxu1 %v8517_v8  ;;  %v1817_v34 = vadd.f32 %v7834_v14, %v8525_v54 }
 0x37c   : > { %v2474_v41 = vunpack.c.l.bf16 %v2218_v48  ;;  %v5766_v10 = vpop.eup %5765 }
 0x37d   : > { %v5768_v62 = vpop.eup %5767  ;;  %v2985_v8 = vpack.c.bf16 %v5766_v10, %v5766_v10  ;;  %v2265_v10 = vpack.c.bf16 %v1815_v19, %v1815_v19 }
 0x37e   : > { %5771 = vtanh.f32 %v2474_v41  ;;  %v5770_v2 = vpop.eup %5769  ;;  %v2984_v46 = vpack.c.bf16 %v5768_v62, %v5768_v62 }
 0x37f   : > { %4046 = vmatpush.bf16.msrb.mxu1 %v8520_v13  ;;  %5773 = vtanh.f32 %v2470_v11  ;;  %v2983_v7 = vpack.c.bf16 %v5770_v2, %v5770_v2  ;;  %v3479_v42 = vunpack.c.l.b16 %v2985_v8  ;;  %v7832_v13 = vpop.f32.mrf.mxu3  ;;  %v8526_v11 = vld [vmem:[#allocation25_spill] sm:$0xff] }
 0x380   : > { %5775 = vtanh.f32 %v2469_v56  ;;  %v3478_v0 = vunpack.c.l.b16 %v2984_v46  ;;  %v1810_v41 = vadd.f32 %v7834_v14, %v8526_v11  ;;  %v1812_v56 = vadd.f32 %v7834_v14, %v8527_v20  ;;  %v8528_v46 = vld [vmem:[#allocation121_spill] sm:$0xff] }
 0x381   : > { %5777 = vtanh.f32 %v2468_v29  ;;  %v2266_v29 = vpack.c.bf16 %v1817_v34, %v1817_v34  ;;  %v8530_v34 = vld [vmem:[#allocation115_spill] sm:$0xff] }
 0x382   : > { %5779 = vtanh.f32 %v2467_v30 }
 0x383   : > { %4047 = vmatpush.bf16.msrb.mxu1 %v8523_v39  ;;  %v3477_v39 = vunpack.c.l.b16 %v2983_v7  ;;  %v2522_v58 = vunpack.c.l.bf16 %v2266_v29 }
 0x384   : > { %v5772_v32 = vpop.eup %5771 }
 0x385   : > { %v2986_v37 = vpack.c.bf16 %v5772_v32, %v5772_v32  ;;  %v5774_v49 = vpop.eup %5773  ;;  %v3503_v2 = vpack.c.b16 %v3478_v0, %v3477_v39 }
 0x386   : > { %v5776_v44 = vpop.eup %5775  ;;  %v2982_v51 = vpack.c.bf16 %v5774_v49, %v5774_v49  ;;  %v8529_v49 = vld [vmem:[#allocation51_spill] sm:$0xff] }
 0x387   : > { %v3480_v27 = vunpack.c.l.b16 %v2986_v37  ;;  %v5778_v18 = vpop.eup %5777  ;;  %v2981_v43 = vpack.c.bf16 %v5776_v44, %v5776_v44  ;;  %v1805_v37 = vadd.f32 %v7834_v14, %v8528_v46  ;;  %v1807_v7 = vadd.f32 %v7834_v14, %v8529_v49  ;;  %v7848_v19 = vpop.f32.mrf.mxu3  ;;  %v8534_v49 = vld [vmem:[#allocation59_spill] sm:$0xff] }
 0x388   : > { %v5780_v36 = vpop.eup %5779  ;;  %v2980_v62 = vpack.c.bf16 %v5778_v18, %v5778_v18  ;;  %v3476_v30 = vunpack.c.l.b16 %v2982_v51  ;;  %v2264_v44 = vpack.c.bf16 %v1812_v56, %v1812_v56  ;;  %v1800_v51 = vadd.f32 %v7834_v14, %v8530_v34  ;;  %v8531_v18 = vld [vmem:[#allocation118_spill] sm:$0xff]  ;;  %v8532_v56 = vld [vmem:[#allocation107_spill] sm:$0xff] }
 0x389   : > { %v3504_v48 = vpack.c.b16 %v3480_v27, %v3479_v42  ;;  %v2979_v8 = vpack.c.bf16 %v5780_v36, %v5780_v36  ;;  %v3475_v32 = vunpack.c.l.b16 %v2981_v43  ;;  %v2263_v42 = vpack.c.bf16 %v1810_v41, %v1810_v41 }
 0x38a   : > { %v2521_v27 = vunpack.c.l.bf16 %v2265_v10  ;;  %v3474_v54 = vunpack.c.l.b16 %v2980_v62  ;;  %v1802_v43 = vadd.f32 %v7834_v14, %v8531_v18  ;;  %v2261_v39 = vpack.c.bf16 %v1805_v37, %v1805_v37 }
 0x38b   : > { %3529 = vmatpush.bf16.msra.mxu2 %v3504_v48  ;;  %v3502_v48 = vpack.c.b16 %v3476_v30, %v3475_v32  ;;  %v3473_v0 = vunpack.c.l.b16 %v2979_v8  ;;  %v2519_v36 = vunpack.c.l.bf16 %v2263_v42  ;;  %v2262_v11 = vpack.c.bf16 %v1807_v7, %v1807_v7  ;;  %v8533_v30 = vld [vmem:[#allocation111_spill] sm:$0xff] }
 0x38c   : > { %5781 = vtanh.f32 %v2521_v27  ;;  %v2520_v41 = vunpack.c.l.bf16 %v2264_v44  ;;  %v1795_v10 = vadd.f32 %v7834_v14, %v8532_v56  ;;  %v2259_v29 = vpack.c.bf16 %v1800_v51, %v1800_v51  ;;  %v8535_v27 = vld [vmem:[#allocation99_spill] sm:$0xff] }
 0x38d   : > { %5783 = vtanh.f32 %v2522_v58  ;;  %v3501_v20 = vpack.c.b16 %v3474_v54, %v3473_v0  ;;  %v2517_v62 = vunpack.c.l.bf16 %v2261_v39  ;;  %v2260_v8 = vpack.c.bf16 %v1802_v43, %v1802_v43 }
 0x38e   : > { %5785 = vtanh.f32 %v2519_v36  ;;  %v2518_v32 = vunpack.c.l.bf16 %v2262_v11  ;;  %v1900_v7 = vadd.f32 %v7834_v14, %v8534_v49  ;;  %v1790_v44 = vadd.f32 %v7834_v14, %v8535_v27  ;;  %v8538_v11 = vld [vmem:[#allocation89_spill] sm:$0xff] }
 0x38f   : > { %3530 = vmatpush.bf16.msra.mxu2 %v3503_v2  ;;  %v1797_v2 = vadd.f32 %v7834_v14, %v8533_v30  ;;  %5787 = vtanh.f32 %v2520_v41  ;;  %v7863_v42 = vpop.f32.mrf.mxu3  ;;  %v2257_v58 = vpack.c.bf16 %v1795_v10, %v1795_v10  ;;  %v2515_v54 = vunpack.c.l.bf16 %v2259_v29  ;;  %v8539_v10 = vld [vmem:[#allocation93_spill] sm:$0xff] }
 0x390   : > { %5789 = vtanh.f32 %v2517_v62  ;;  %v2516_v0 = vunpack.c.l.bf16 %v2260_v8  ;;  %v2299_v31 = vpack.c.bf16 %v1900_v7, %v1900_v7  ;;  %v1785_v41 = vadd.f32 %v7834_v14, %v8538_v11  ;;  %v8541_v27 = vld [vmem:[#allocation105_spill] sm:$0xff] }
 0x391   : > { %v2258_v51 = vpack.c.bf16 %v1797_v2, %v1797_v2  ;;  %5791 = vtanh.f32 %v2518_v32  ;;  %v2513_v56 = vunpack.c.l.bf16 %v2257_v58  ;;  %v1787_v29 = vadd.f32 %v7834_v14, %v8539_v10 }
 0x392   : > { %v5782_v46 = vpop.eup %5781  ;;  %5793 = vtanh.f32 %v2515_v54  ;;  %v2555_v4 = vunpack.c.l.bf16 %v2299_v31  ;;  %v2253_v58 = vpack.c.bf16 %v1785_v41, %v1785_v41  ;;  %v8542_v54 = vld [vmem:[#allocation108_spill] sm:$0xff] }
 0x393   : > { %3531 = vmatpush.bf16.msra.mxu2 %v3502_v48  ;;  %v5784_v37 = vpop.eup %5783  ;;  %v8536_v48 = vld [vmem:[#allocation102_spill] sm:$0xff]  ;;  %v3033_v43 = vpack.c.bf16 %v5782_v46, %v5782_v46  ;;  %v2514_v30 = vunpack.c.l.bf16 %v2258_v51  ;;  %5795 = vtanh.f32 %v2516_v0  ;;  %v2254_v51 = vpack.c.bf16 %v1787_v29, %v1787_v29 }
 0x394   : > { %v1792_v34 = vadd.f32 %v7834_v14, %v8536_v48  ;;  %v5786_v18 = vpop.eup %5785  ;;  %v3034_v39 = vpack.c.bf16 %v5784_v37, %v5784_v37  ;;  %v1937_v48 = vadd.f32 %v7834_v14, %v8542_v54  ;;  %5797 = vtanh.f32 %v2513_v56  ;;  %v8545_v56 = vld [vmem:[#allocation100_spill] sm:$0xff] }
 0x395   : > { %v5788_v36 = vpop.eup %5787  ;;  %v3031_v8 = vpack.c.bf16 %v5786_v18, %v5786_v18  ;;  %v3623_v46 = vunpack.c.l.b16 %v3033_v43  ;;  %5799 = vtanh.f32 %v2514_v30  ;;  %v1932_v10 = vadd.f32 %v7834_v14, %v8545_v56 }
 0x396   : > { %v2256_v62 = vpack.c.bf16 %v1792_v34, %v1792_v34  ;;  %v5790_v2 = vpop.eup %5789  ;;  %v3032_v32 = vpack.c.bf16 %v5788_v36, %v5788_v36  ;;  %v3624_v37 = vunpack.c.l.b16 %v3034_v39  ;;  %5801 = vtanh.f32 %v2555_v4 }
 0x397   : > { %3532 = vmatpush.bf16.msra.mxu2 %v3501_v20  ;;  %v2255_v20 = vpack.c.bf16 %v1790_v44, %v1790_v44  ;;  %v5792_v49 = vpop.eup %5791  ;;  %v1935_v44 = vadd.f32 %v7834_v14, %v8541_v27  ;;  %v3029_v18 = vpack.c.bf16 %v5790_v2, %v5790_v2  ;;  %v7887_v43 = vpop.f32.mrf.mxu3  ;;  %v3621_v31 = vunpack.c.l.b16 %v3031_v8 }
 0x398   : > { %v2512_v0 = vunpack.c.l.bf16 %v2256_v62  ;;  %v5794_v39 = vpop.eup %5793  ;;  %v3030_v36 = vpack.c.bf16 %v5792_v49, %v5792_v49  ;;  %v2509_v29 = vunpack.c.l.bf16 %v2253_v58  ;;  %v2510_v30 = vunpack.c.l.bf16 %v2254_v51  ;;  %v8549_v58 = vld [vmem:[#allocation92_spill] sm:$0xff] }
 0x399   : > { %v2511_v34 = vunpack.c.l.bf16 %v2255_v20  ;;  %v5796_v11 = vpop.eup %5795  ;;  %v8544_v20 = vpack.c.b16 %v7655_v23, %v7653_v21  ;;  %v2313_v62 = vpack.c.bf16 %v1935_v44, %v1935_v44  ;;  %v2314_v2 = vpack.c.bf16 %v1937_v48, %v1937_v48  ;;  %v8547_v23 = vld [vmem:[#allocation61_spill] sm:$0xff] }
 0x39a   : > { %v3027_v8 = vpack.c.bf16 %v5794_v39, %v5794_v39  ;;  %v3620_v49 = vunpack.c.l.b16 %v3030_v36  ;;  %v1927_v54 = vadd.f32 %v7834_v14, %v8549_v58  ;;  %v8553_v58 = vld [vmem:[#allocation68_spill] sm:$0xff] }
 0x39b   : > { %3533 = vmatpush.bf16.msra.mxu2 %v3500_v38  ;;  %v1780_v38 = vadd.f32 %v7834_v14, %v8537_v9  ;;  %v3622_v9 = vunpack.c.l.b16 %v3032_v32  ;;  %5803 = vtanh.f32 %v2511_v34  ;;  %v5798_v32 = vpop.eup %5797  ;;  %v2569_v34 = vunpack.c.l.bf16 %v2313_v62 }
 0x39c   : > { %5805 = vtanh.f32 %v2512_v0  ;;  %v5800_v21 = vpop.eup %5799  ;;  %v2312_v0 = vpack.c.bf16 %v1932_v10, %v1932_v10  ;;  %v3025_v39 = vpack.c.bf16 %v5798_v32, %v5798_v32  ;;  %v8552_v10 = vld [vmem:[#allocation86_spill] sm:$0xff]  ;;  %v2310_v32 = vpack.c.bf16 %v1927_v54, %v1927_v54 }
 0x39d   : > { %v2251_v15 = vpack.c.bf16 %v1780_v38, %v1780_v38  ;;  %v3640_v38 = vpack.c.b16 %v3624_v37, %v3623_v46  ;;  %v3028_v46 = vpack.c.bf16 %v5796_v11, %v5796_v11  ;;  %v3619_v37 = vunpack.c.l.b16 %v3029_v18  ;;  %v7903_v51 = vpop.eup %5801 }
 0x39e   : > { %v3639_v4 = vpack.c.b16 %v3622_v9, %v3621_v31  ;;  %v2570_v18 = vunpack.c.l.bf16 %v2314_v2  ;;  %v3026_v31 = vpack.c.bf16 %v5800_v21, %v5800_v21  ;;  %v3617_v9 = vunpack.c.l.b16 %v3027_v8 }
 0x39f   : > { %3534 = vmatpush.bf16.msra.mxu2 %v3499_v24  ;;  %v8540_v24 = vld [vmem:[#allocation85_spill] sm:$0xff]  ;;  %v2507_v61 = vunpack.c.l.bf16 %v2251_v15  ;;  %v8546_v15 = vld [vmem:[#allocation55_spill] sm:$0xff]  ;;  %v3638_v11 = vpack.c.b16 %v3620_v49, %v3619_v37  ;;  %v1922_v62 = vadd.f32 %v7834_v14, %v8552_v10 }
 0x3a0   : > { %v1782_v7 = vadd.f32 %v7834_v14, %v8540_v24  ;;  %v1902_v24 = vadd.f32 %v7834_v14, %v8547_v23  ;;  %v3616_v21 = vunpack.c.l.b16 %v3026_v31  ;;  %v2566_v31 = vunpack.c.l.bf16 %v2310_v32 }
 0x3a1   : > { %5807 = vtanh.f32 %v2507_v61  ;;  %v5804_v36 = vpop.eup %5803 }
 0x3a2   : > { %v2252_v41 = vpack.c.bf16 %v1782_v7, %v1782_v7  ;;  %v8548_v7 = vld [vmem:[#allocation90_spill] sm:$0xff]  ;;  %5809 = vtanh.f32 %v2509_v29  ;;  %v5806_v61 = vpop.eup %5805  ;;  %v7909_v29 = vpop.f32.mrf.mxu3  ;;  %v3023_v37 = vpack.c.bf16 %v5804_v36, %v5804_v36 }
 0x3a3   : > { %3535 = vmatpush.bf16.msra.mxu2 %v3498_v59  ;;  %v1930_v59 = vadd.f32 %v7834_v14, %v8543_v1  ;;  %v1925_v27 = vadd.f32 %v7834_v14, %v8548_v7  ;;  %5811 = vtanh.f32 %v2510_v30  ;;  %v2300_v1 = vpack.c.bf16 %v1902_v24, %v1902_v24 }
 0x3a4   : > { %v2508_v44 = vunpack.c.l.bf16 %v2252_v41  ;;  %v8550_v41 = vld [vmem:[#allocation66_spill] sm:$0xff] }
 0x3a5   : > { %v2311_v48 = vpack.c.bf16 %v1930_v59, %v1930_v59  ;;  %v8551_v59 = vld [vmem:[#allocation84_spill] sm:$0xff]  ;;  %v2309_v30 = vpack.c.bf16 %v1925_v27, %v1925_v27  ;;  %v2556_v7 = vunpack.c.l.bf16 %v2300_v1  ;;  %v1907_v27 = vadd.f32 %v7834_v14, %v8553_v58 }
 0x3a6   : > { %v1920_v56 = vadd.f32 %v7834_v14, %v8551_v59  ;;  %5813 = vtanh.f32 %v2508_v44  ;;  %v3613_v1 = vunpack.c.l.b16 %v3023_v37 }
 0x3a7   : > { %3536 = vmatpush.bf16.msra.mxu2 %v8544_v20  ;;  %v1905_v20 = vadd.f32 %v7834_v14, %v8550_v41  ;;  %v2567_v2 = vunpack.c.l.bf16 %v2311_v48  ;;  %5815 = vtanh.f32 %v2569_v34  ;;  %v7913_v8 = vpop.eup %5807  ;;  %v8554_v48 = vld [vmem:[#allocation78_spill] sm:$0xff]  ;;  %v2302_v58 = vpack.c.bf16 %v1907_v27, %v1907_v27 }
 0x3a8   : > { %5817 = vtanh.f32 %v2570_v18  ;;  %v5810_v49 = vpop.eup %5809  ;;  %v1915_v34 = vadd.f32 %v7834_v14, %v8554_v48  ;;  %v2565_v18 = vunpack.c.l.bf16 %v2309_v30  ;;  %v8556_v48 = vld [vmem:[#allocation72_spill] sm:$0xff]  ;;  %v8557_v30 = vld [vmem:[#allocation74_spill] sm:$0xff]  ;;  %v3019_v37 = vpack.c.bf16 %v7913_v8, %v7913_v8 }
 0x3a9   : > { %v5812_v24 = vpop.eup %5811  ;;  %v2301_v44 = vpack.c.bf16 %v1905_v20, %v1905_v20  ;;  %5819 = vtanh.f32 %v2567_v2  ;;  %v1912_v2 = vadd.f32 %v7834_v14, %v8557_v30 }
 0x3aa   : > { %3537 = vmatmul.bf16.vlgmr.msra.gmra.mxu2 %v8546_v15  ;;  %v3615_v15 = vunpack.c.l.b16 %v3025_v39  ;;  %v2308_v39 = vpack.c.bf16 %v1922_v62, %v1922_v62 }
 0x3ab   : > { %3670 = vmatpush.bf16.msrb.mxu2 %v3640_v38  ;;  %v3618_v38 = vunpack.c.l.b16 %v3028_v46  ;;  %v2568_v46 = vunpack.c.l.bf16 %v2312_v0  ;;  %v2307_v0 = vpack.c.bf16 %v1920_v56, %v1920_v56  ;;  %v2557_v10 = vunpack.c.l.bf16 %v2301_v44 }
 0x3ac   : > { %v5814_v36 = vpop.eup %5813  ;;  %v3636_v20 = vpack.c.b16 %v3616_v21, %v3615_v15  ;;  %v1910_v56 = vadd.f32 %v7834_v14, %v8556_v48 }
 0x3ad   : > { %v3637_v23 = vpack.c.b16 %v3618_v38, %v3617_v9  ;;  %5821 = vtanh.f32 %v2568_v46  ;;  %v3021_v9 = vpack.c.bf16 %v5810_v49, %v5810_v49  ;;  %v5816_v38 = vpop.eup %5815  ;;  %v2563_v62 = vunpack.c.l.bf16 %v2307_v0  ;;  %v2131_v49 = vpop.f32.mrf.mxu3 }
 0x3ae   : > { %v5818_v59 = vpop.eup %5817  ;;  %5823 = vtanh.f32 %v2556_v7  ;;  %v2564_v46 = vunpack.c.l.bf16 %v2308_v39  ;;  %v3020_v15 = vpack.c.bf16 %v5814_v36, %v5814_v36  ;;  %v3081_v27 = vpack.c.bf16 %v5816_v38, %v5816_v38 }
 0x3af   : > { %3671 = vmatpush.bf16.msrb.mxu2 %v3639_v4  ;;  %v3024_v4 = vpack.c.bf16 %v5806_v61, %v5806_v61  ;;  %v3022_v61 = vpack.c.bf16 %v5812_v24, %v5812_v24  ;;  %5825 = vtanh.f32 %v2565_v18  ;;  %v3611_v21 = vunpack.c.l.b16 %v3021_v9 }
 0x3b0   : > { %5827 = vtanh.f32 %v2566_v31  ;;  %v2304_v18 = vpack.c.bf16 %v1912_v2, %v1912_v2  ;;  %v2558_v31 = vunpack.c.l.bf16 %v2302_v58  ;;  %v3610_v36 = vunpack.c.l.b16 %v3020_v15 }
 0x3b1   : > { %v3614_v41 = vunpack.c.l.b16 %v3024_v4  ;;  %v5820_v4 = vpop.eup %5819  ;;  %v3612_v24 = vunpack.c.l.b16 %v3022_v61  ;;  %5829 = vtanh.f32 %v2557_v10  ;;  %v3863_v10 = vunpack.c.l.b16 %v3081_v27 }
 0x3b2   : > { %5831 = vtanh.f32 %v2563_v62  ;;  %v1979_v62 = vpop.f32.mrf.mxu2 }
 0x3b3   : > { %3672 = vmatpush.bf16.msrb.mxu2 %v3638_v11  ;;  %v8555_v11 = vld [vmem:[#allocation80_spill] sm:$0xff]  ;;  %v3635_v7 = vpack.c.b16 %v3614_v41, %v3613_v1  ;;  %v5822_v44 = vpop.eup %5821  ;;  %5833 = vtanh.f32 %v2564_v46  ;;  %v3634_v9 = vpack.c.b16 %v3612_v24, %v3611_v21  ;;  %v3079_v1 = vpack.c.bf16 %v5820_v4, %v5820_v4 }
 0x3b4   : > { %v1917_v54 = vadd.f32 %v7834_v14, %v8555_v11  ;;  %v3082_v11 = vpack.c.bf16 %v5818_v59, %v5818_v59  ;;  %v3080_v41 = vpack.c.bf16 %v5822_v44, %v5822_v44  ;;  %v1980_v15 = vadd.f32 %v7834_v14, %v1979_v62 }
 0x3b5   : > { %v3861_v46 = vunpack.c.l.b16 %v3079_v1  ;;  %v2134_v21 = vpop.f32.mrf.mxu3  ;;  %v3067_v1 = vpack.c.bf16 %v7903_v51, %v7903_v51 }
 0x3b6   : > { %v2306_v32 = vpack.c.bf16 %v1917_v54, %v1917_v54  ;;  %v7927_v54 = vpop.eup %5823  ;;  %v3864_v38 = vunpack.c.l.b16 %v3082_v11  ;;  %v2135_v24 = vadd.f32 %v7834_v14, %v2134_v21  ;;  %v2122_v21 = vadd.f32 %v7834_v14, %v7848_v19 }
 0x3b7   : > { %3673 = vmatpush.bf16.msrb.mxu2 %v3637_v23  ;;  %v2305_v23 = vpack.c.bf16 %v1915_v34, %v1915_v34  ;;  %v2303_v34 = vpack.c.bf16 %v1910_v56, %v1910_v56  ;;  %v5826_v8 = vpop.eup %5825  ;;  %v2560_v56 = vunpack.c.l.bf16 %v2304_v18  ;;  %v2115_v19 = vadd.f32 %v7834_v14, %v7815_v28 }
 0x3b8   : > { %v2562_v39 = vunpack.c.l.bf16 %v2306_v32  ;;  %v5828_v61 = vpop.eup %5827  ;;  %v3077_v2 = vpack.c.bf16 %v5826_v8, %v5826_v8  ;;  %v3888_v4 = vpack.c.b16 %v3864_v38, %v3863_v10 }
 0x3b9   : > { %v2561_v0 = vunpack.c.l.bf16 %v2305_v23  ;;  %v2559_v59 = vunpack.c.l.bf16 %v2303_v34  ;;  %v7929_v48 = vpop.eup %5829  ;;  %v3078_v23 = vpack.c.bf16 %v5828_v61, %v5828_v61  ;;  %v2393_v61 = vpack.c.bf16 %v2135_v24, %v2135_v24 }
 0x3ba   : > { %v5832_v30 = vpop.eup %5831  ;;  %v3859_v34 = vunpack.c.l.b16 %v3077_v2  ;;  %v2385_v28 = vpack.c.bf16 %v2115_v19, %v2115_v19 }
 0x3bb   : > { %3674 = vmatpush.bf16.msrb.mxu2 %v3636_v20  ;;  %v3609_v20 = vunpack.c.l.b16 %v3019_v37  ;;  %5835 = vtanh.f32 %v2561_v0  ;;  %v5834_v32 = vpop.eup %5833  ;;  %v3862_v37 = vunpack.c.l.b16 %v3080_v41  ;;  %v3075_v27 = vpack.c.bf16 %v5832_v30, %v5832_v30 }
 0x3bc   : > { %5837 = vtanh.f32 %v2562_v39  ;;  %v3076_v11 = vpack.c.bf16 %v5834_v32, %v5834_v32  ;;  %v2132_v0 = vadd.f32 %v7834_v14, %v2131_v49  ;;  %v3860_v39 = vunpack.c.l.b16 %v3078_v23 }
 0x3bd   : > { %5839 = vtanh.f32 %v2558_v31  ;;  %v3633_v58 = vpack.c.b16 %v3610_v36, %v3609_v20  ;;  %v3887_v8 = vpack.c.b16 %v3862_v37, %v3861_v46  ;;  %v2125_v31 = vadd.f32 %v7834_v14, %v7863_v42  ;;  %v8558_v20 = vld [vmem:[#allocation119_spill] sm:$0xff] }
 0x3be   : > { %5841 = vtanh.f32 %v2559_v59  ;;  %v2331_v36 = vpack.c.bf16 %v1980_v15, %v1980_v15  ;;  %v3068_v49 = vpack.c.bf16 %v7927_v54, %v7927_v54  ;;  %v3857_v59 = vunpack.c.l.b16 %v3075_v27 }
 0x3bf   : > { %3675 = vmatpush.bf16.msrb.mxu2 %v3635_v7  ;;  %5843 = vtanh.f32 %v2560_v56  ;;  %v2130_v7 = vadd.f32 %v7834_v14, %v7909_v29  ;;  %v2127_v29 = vadd.f32 %v7834_v14, %v7887_v43  ;;  %v2392_v56 = vpack.c.bf16 %v2132_v0, %v2132_v0 }
 0x3c0   : > { %v3858_v2 = vunpack.c.l.b16 %v3076_v11  ;;  %v3886_v23 = vpack.c.b16 %v3860_v39, %v3859_v34  ;;  %v2587_v62 = vunpack.c.l.bf16 %v2331_v36  ;;  %v3069_v43 = vpack.c.bf16 %v7929_v48, %v7929_v48  ;;  %v1981_v34 = vpop.f32.mrf.mxu2 }
 0x3c1   : > { %v5836_v44 = vpop.eup %5835  ;;  %v2391_v41 = vpack.c.bf16 %v2130_v7, %v2130_v7  ;;  %v2120_v32 = vadd.f32 %v7834_v14, %v7832_v13  ;;  %v2390_v46 = vpack.c.bf16 %v2127_v29, %v2127_v29  ;;  %v2649_v37 = vunpack.c.l.bf16 %v2393_v61 }
 0x3c2   : > { %v5838_v18 = vpop.eup %5837  ;;  %v3073_v38 = vpack.c.bf16 %v5836_v44, %v5836_v44  ;;  %v2648_v11 = vunpack.c.l.bf16 %v2392_v56  ;;  %v3885_v48 = vpack.c.b16 %v3858_v2, %v3857_v59  ;;  %5845 = vtanh.f32 %v2587_v62 }
 0x3c3   : > { %3676 = vmatpush.bf16.msrb.mxu2 %v3634_v9  ;;  %v7939_v9 = vpop.eup %5839  ;;  %v3074_v42 = vpack.c.bf16 %v5838_v18, %v5838_v18  ;;  %v2647_v24 = vunpack.c.l.bf16 %v2391_v41  ;;  %v1982_v13 = vadd.f32 %v7834_v14, %v1981_v34  ;;  %v2136_v18 = vpop.f32.mrf.mxu3  ;;  %v2387_v39 = vpack.c.bf16 %v2120_v32, %v2120_v32 }
 0x3c4   : > { %v5842_v10 = vpop.eup %5841  ;;  %v3855_v44 = vunpack.c.l.b16 %v3073_v38  ;;  %5847 = vtanh.f32 %v2649_v37  ;;  %v2117_v29 = vadd.f32 %v7834_v14, %v7830_v45  ;;  %v2110_v45 = vadd.f32 %v7834_v14, %v7793_v3 }
 0x3c5   : > { %v5844_v30 = vpop.eup %5843  ;;  %v3071_v15 = vpack.c.bf16 %v5842_v10, %v5842_v10  ;;  %v3856_v27 = vunpack.c.l.b16 %v3074_v42  ;;  %5849 = vtanh.f32 %v2647_v24  ;;  %v2332_v36 = vpack.c.bf16 %v1982_v13, %v1982_v13 }
 0x3c6   : > { %v3072_v7 = vpack.c.bf16 %v5844_v30, %v5844_v30  ;;  %5851 = vtanh.f32 %v2648_v11  ;;  %v2643_v42 = vunpack.c.l.bf16 %v2387_v39  ;;  %v3851_v30 = vunpack.c.l.b16 %v3069_v43 }
 0x3c7   : > { %3677 = vmatpush.bf16.msrb.mxu2 %v3633_v58  ;;  %v2389_v58 = vpack.c.bf16 %v2125_v31, %v2125_v31  ;;  %v2137_v31 = vadd.f32 %v7834_v14, %v2136_v18  ;;  %v3884_v10 = vpack.c.b16 %v3856_v27, %v3855_v44  ;;  %v2588_v38 = vunpack.c.l.bf16 %v2332_v36 }
 0x3c8   : > { %v3854_v41 = vunpack.c.l.b16 %v3072_v7  ;;  %v5846_v56 = vpop.eup %5845  ;;  %v2386_v62 = vpack.c.bf16 %v2117_v29, %v2117_v29  ;;  %v3850_v43 = vunpack.c.l.b16 %v3068_v49  ;;  %v2105_v3 = vadd.f32 %v7834_v14, %v7789_v17  ;;  %v3686_v29 = vld [vmem:[#allocation1 + $0x9] sm:$0xff] }
 0x3c9   : > { %v2645_v0 = vunpack.c.l.bf16 %v2389_v58  ;;  %v2394_v61 = vpack.c.bf16 %v2137_v31, %v2137_v31  ;;  %v2641_v7 = vunpack.c.l.bf16 %v2385_v28  ;;  %v2383_v44 = vpack.c.bf16 %v2110_v45, %v2110_v45  ;;  %3806 = vmatmul.bf16.vlgmr.msra.gmra.mxu1 %v3686_v29 }
 0x3ca   : > { %3678 = vmatmul.bf16.vlgmr.msrb.gmra.mxu2 %v8558_v20  ;;  %v2388_v20 = vpack.c.bf16 %v2122_v21, %v2122_v21  ;;  %v2112_v21 = vadd.f32 %v7834_v14, %v7801_v12  ;;  %v2642_v27 = vunpack.c.l.bf16 %v2386_v62  ;;  %v2100_v11 = vadd.f32 %v7834_v14, %v7745_v47 }
 0x3cb   : > { %3913 = vmatpush.bf16.msra.mxu2 %v3888_v4  ;;  %v3070_v4 = vpack.c.bf16 %v7939_v9, %v7939_v9  ;;  %v3853_v9 = vunpack.c.l.b16 %v3071_v15  ;;  %5853 = vtanh.f32 %v2645_v0  ;;  %v2650_v59 = vunpack.c.l.bf16 %v2394_v61 }
 0x3cc   : > { %v2644_v2 = vunpack.c.l.bf16 %v2388_v20  ;;  %v2107_v13 = vadd.f32 %v7834_v14, %v7791_v5  ;;  %v2384_v17 = vpack.c.bf16 %v2112_v21, %v2112_v21  ;;  %v2639_v36 = vunpack.c.l.bf16 %v2383_v44 }
 0x3cd   : > { %v3852_v58 = vunpack.c.l.b16 %v3070_v4  ;;  %v3883_v37 = vpack.c.b16 %v3854_v41, %v3853_v9  ;;  %v3099_v4 = vpack.c.bf16 %v5846_v56, %v5846_v56 }
 0x3ce   : > { %v2382_v56 = vpack.c.bf16 %v2107_v13, %v2107_v13 }
 0x3cf   : > { %3914 = vmatpush.bf16.msra.mxu2 %v3887_v8  ;;  %v2646_v8 = vunpack.c.l.bf16 %v2390_v46  ;;  %v3849_v46 = vunpack.c.l.b16 %v3067_v1  ;;  %v3882_v54 = vpack.c.b16 %v3852_v58, %v3851_v30  ;;  %v3977_v18 = vunpack.c.l.b16 %v3099_v4  ;;  %v3410_v4 = vpop.f32.mrf.mxu3 }
 0x3d0   : > { %v2640_v30 = vunpack.c.l.bf16 %v2384_v17 }
 0x3d1   : > { %5855 = vtanh.f32 %v2646_v8  ;;  %v3881_v34 = vpack.c.b16 %v3850_v43, %v3849_v46  ;;  %v2381_v8 = vpack.c.bf16 %v2105_v3, %v2105_v3  ;;  %v3282_v46 = vpop.f32.mrf.mxu1 }
 0x3d2   : > { %5857 = vtanh.f32 %v2588_v38 }
 0x3d3   : > { %3915 = vmatpush.bf16.msra.mxu2 %v3886_v23  ;;  %v5848_v23 = vpop.eup %5847  ;;  %5859 = vtanh.f32 %v2650_v59  ;;  %v2102_v59 = vadd.f32 %v7834_v14, %v7775_v60  ;;  %v2637_v58 = vunpack.c.l.bf16 %v2381_v8  ;;  %v3295_v60 = vpop.f32.mrf.mxu2 }
 0x3d4   : > { %v5850_v32 = vpop.eup %5849  ;;  %5861 = vtanh.f32 %v2643_v42  ;;  %v3161_v51 = vpack.c.bf16 %v5848_v23, %v5848_v23  ;;  %v7978_v42 = vld [vmem:[%s6284_s2 + $0xa] sm:$0x3]  ;;  %v7986_v21 = vadd.f32 %v3295_v60, %v3282_v46 }
 0x3d5   : > { %v5852_v15 = vpop.eup %5851  ;;  %5863 = vtanh.f32 %v2644_v2  ;;  %v3159_v12 = vpack.c.bf16 %v5850_v32, %v5850_v32  ;;  %3812 = vst [vmem:[#allocation1] ss:$9 sm:$0xff] %v7978_v42  ;;  %v2379_v2 = vpack.c.bf16 %v2100_v11, %v2100_v11  ;;  %v8559_v32 = vpack.c.b16 %v7333_v55, %v7320_v50 }
 0x3d6   : > { %v5854_v24 = vpop.eup %5853  ;;  %5865 = vtanh.f32 %v2641_v7  ;;  %v4135_v31 = vunpack.c.l.b16 %v3161_v51  ;;  %v2380_v3 = vpack.c.bf16 %v2102_v59, %v2102_v59  ;;  %v2638_v7 = vunpack.c.l.bf16 %v2382_v56  ;;  %v7989_v51 = vld [vmem:[%s6284_s2 + $0xc] sm:$0x3] }
 0x3d7   : > { %3916 = vmatpush.bf16.msra.mxu2 %v3885_v48  ;;  %v5856_v1 = vpop.eup %5855  ;;  %v3160_v48 = vpack.c.bf16 %v5852_v15, %v5852_v15  ;;  %5867 = vtanh.f32 %v2642_v27  ;;  %v3157_v47 = vpack.c.bf16 %v5854_v24, %v5854_v24  ;;  %v2635_v55 = vunpack.c.l.bf16 %v2379_v2  ;;  %v3412_v8 = vpop.f32.mrf.mxu3 }
 0x3d8   : > { %v5858_v49 = vpop.eup %5857  ;;  %v3158_v41 = vpack.c.bf16 %v5856_v1, %v5856_v1  ;;  %5869 = vtanh.f32 %v2639_v36  ;;  %v8560_v1 = vpack.c.b16 %v7314_v63, %v7310_v16  ;;  %v8561_v16 = vpack.c.b16 %v7305_v26, %v7295_v22  ;;  %v7999_v36 = vld [vmem:[%s6284_s2 + $0xe] sm:$0x3] }
 0x3d9   : > { %v5860_v0 = vpop.eup %5859  ;;  %v3100_v39 = vpack.c.bf16 %v5858_v49, %v5858_v49  ;;  %v4134_v38 = vunpack.c.l.b16 %v3160_v48  ;;  %v4131_v43 = vunpack.c.l.b16 %v3157_v47  ;;  %5871 = vtanh.f32 %v2640_v30  ;;  %v3284_v63 = vpop.f32.mrf.mxu1  ;;  %v8572_v8 = vld [vmem:[#allocation114_spill] sm:$0xff] }
 0x3da   : > { %v3162_v19 = vpack.c.bf16 %v5860_v0, %v5860_v0  ;;  %v5862_v20 = vpop.eup %5861  ;;  %5873 = vtanh.f32 %v2637_v58  ;;  %v2636_v48 = vunpack.c.l.bf16 %v2380_v3  ;;  %v8563_v56 = vpack.c.b16 %v7228_v25, %v7201_v33 }
 0x3db   : > { %3917 = vmatpush.bf16.msra.mxu2 %v3884_v10  ;;  %v3978_v9 = vunpack.c.l.b16 %v3100_v39  ;;  %v5864_v61 = vpop.eup %5863  ;;  %v4133_v10 = vunpack.c.l.b16 %v3159_v12  ;;  %v3155_v45 = vpack.c.bf16 %v5862_v20, %v5862_v20  ;;  %5875 = vtanh.f32 %v2638_v7  ;;  %v3297_v13 = vpop.f32.mrf.mxu2 }
 0x3dc   : > { %v4136_v5 = vunpack.c.l.b16 %v3162_v19  ;;  %v3156_v62 = vpack.c.bf16 %v5864_v61, %v5864_v61  ;;  %v5866_v14 = vpop.eup %5865  ;;  %v3813_v11 = vld [vmem:[#allocation1] sm:$0xff]  ;;  %5877 = vtanh.f32 %v2635_v55  ;;  %v8565_v25 = vpack.c.b16 %v8438_v40, %v8437_v53 }
 0x3dd   : > { %v4009_v28 = vpack.c.b16 %v3978_v9, %v3977_v18  ;;  %v4151_v15 = vpack.c.b16 %v4134_v38, %v4133_v10  ;;  %v5868_v24 = vpop.eup %5867  ;;  %v4129_v50 = vunpack.c.l.b16 %v3155_v45  ;;  %v3153_v44 = vpack.c.bf16 %v5866_v14, %v5866_v14 }
 0x3de   : > { %v4152_v23 = vpack.c.b16 %v4136_v5, %v4135_v31  ;;  %v3154_v27 = vpack.c.bf16 %v5868_v24, %v5868_v24  ;;  %v5870_v12 = vpop.eup %5869  ;;  %5879 = vtanh.f32 %v2636_v48  ;;  %v8562_v9 = vpack.c.b16 %v7259_v6, %v7237_v35 }
 0x3df   : > { %3918 = vmatpush.bf16.msra.mxu2 %v3883_v37  ;;  %4048 = vmatpush.bf16.msrb.mxu1 %v4009_v28  ;;  %v4132_v37 = vunpack.c.l.b16 %v3158_v41  ;;  %v5872_v0 = vpop.eup %5871  ;;  %v4127_v17 = vunpack.c.l.b16 %v3153_v44  ;;  %v3151_v19 = vpack.c.bf16 %v5870_v12, %v5870_v12  ;;  %v8564_v45 = vpack.c.b16 %v8435_v57, %v8434_v52  ;;  %v3551_v57 = vpop.f32.mrf.mxu3 }
 0x3e0   : > { %v4128_v18 = vunpack.c.l.b16 %v3154_v27  ;;  %v5874_v31 = vpop.eup %5873  ;;  %v3152_v20 = vpack.c.bf16 %v5872_v0, %v5872_v0  ;;  %v8570_v27 = vld [vmem:[#allocation23_spill] sm:$0xff] }
 0x3e1   : > { %v4150_v49 = vpack.c.b16 %v4132_v37, %v4131_v43  ;;  %v5876_v47 = vpop.eup %5875  ;;  %v3149_v41 = vpack.c.bf16 %v5874_v31, %v5874_v31  ;;  %v4125_v38 = vunpack.c.l.b16 %v3151_v19  ;;  %v3423_v30 = vpop.f32.mrf.mxu1  ;;  %v8566_v43 = vld [vmem:[#allocation126_spill] sm:$0xff]  ;;  %v8567_v37 = vld [vmem:[#allocation124_spill] sm:$0xff]  ;;  %v4231_v31 = vunpack.c.l.bf16 %v8572_v8  ;;  %v8573_v19 = vld [vmem:[#allocation77_spill] sm:$0xff] }
 0x3e2   : > { %v4148_v22 = vpack.c.b16 %v4128_v18, %v4127_v17  ;;  %v5878_v61 = vpop.eup %5877  ;;  %v3150_v10 = vpack.c.bf16 %v5876_v47, %v5876_v47  ;;  %v4126_v5 = vunpack.c.l.b16 %v3152_v20  ;;  %v8008_v35 = vadd.f32 %v3423_v30, %v3410_v4  ;;  %v8571_v18 = vld [vmem:[#allocation110_spill] sm:$0xff] }
 0x3e3   : > { %3919 = vmatpush.bf16.msra.mxu2 %v3882_v54  ;;  %4182 = vmatpush.bf16.msra.mxu1 %v4152_v23  ;;  %v4130_v54 = vunpack.c.l.b16 %v3156_v62  ;;  %v3147_v6 = vpack.c.bf16 %v5878_v61, %v5878_v61  ;;  %v4123_v2 = vunpack.c.l.b16 %v3149_v41  ;;  %v4232_v20 = vunpack.c.l.bf16 %v8573_v19 }
 0x3e4   : > { %v5880_v59 = vpop.eup %5879  ;;  %v4124_v23 = vunpack.c.l.b16 %v3150_v10  ;;  %v4147_v58 = vpack.c.b16 %v4126_v5, %v4125_v38 }
 0x3e5   : > { %v4149_v39 = vpack.c.b16 %v4130_v54, %v4129_v50  ;;  %v3148_v28 = vpack.c.bf16 %v5880_v59, %v5880_v59  ;;  %v4229_v54 = vunpack.c.l.bf16 %v8570_v27  ;;  %v4252_v61 = vperm.slane %v4232_v20, 2 }
 0x3e6   : > { %v4146_v33 = vpack.c.b16 %v4124_v23, %v4123_v2 }
 0x3e7   : > { %3920 = vmatpush.bf16.msra.mxu2 %v3881_v34  ;;  %4183 = vmatpush.bf16.msra.mxu1 %v4151_v15  ;;  %v3814_v34 = vld [vmem:[#allocation1 + $0x9] sm:$0xff]  ;;  %v4122_v46 = vunpack.c.l.b16 %v3148_v28  ;;  %v8568_v15 = vpack.c.b16 %v8566_v43, %v8567_v37  ;;  %v3553_v24 = vpop.f32.mrf.mxu3  ;;  %v4246_v12 = vperm.slane %v4229_v54, 2  ;;  %v4294_v30 = vsel %vm4277_vm1, %v4252_v61, 0.0 }
 0x3e8   : > { %3934 = vmatmul.bf16.vlgmr.msra.gmra.mxu3 %v3814_v34  ;;  %3940 = vst [vmem:[#allocation1] ss:$9 sm:$0xff] %v7989_v51  ;;  %v4245_v34 = vperm.slane %v4229_v54, 0 }
 0x3e9   : > { %v3425_v60 = vpop.f32.mrf.mxu1  ;;  %v4279_v63 = vsel %vm4277_vm1, %v4246_v12, 0.0 }
 0x3ea   : > { %3921 = vmatmul.bf16.vlgmr.msra.gmra.mxu2 %v3813_v11 }
 0x3eb   : > { %4054 = vmatpush.bf16.msrb.mxu2 %v8559_v32  ;;  %4184 = vmatpush.bf16.msra.mxu1 %v4150_v49  ;;  %v4121_v32 = vunpack.c.l.b16 %v3147_v6 }
 0x3ed   : > { %v4145_v14 = vpack.c.b16 %v4122_v46, %v4121_v32 }
 0x3ef   : > { %4055 = vmatpush.bf16.msrb.mxu2 %v8560_v1  ;;  %4185 = vmatpush.bf16.msra.mxu1 %v4149_v39  ;;  %v3941_v26 = vld [vmem:[#allocation1] sm:$0xff]  ;;  %v3942_v29 = vld [vmem:[#allocation1 + $0x9] sm:$0xff]  ;;  %v8019_v55 = vpop.f32.mrf.mxu3  ;;  %v4233_v39 = vunpack.c.l.bf16 %v8571_v18 }
 0x3f0   : > { %4049 = vmatmul.bf16.vlgmr.msrb.gmra.mxu1 %v3941_v26  ;;  %4068 = vst [vmem:[#allocation1] ss:$9 sm:$0xff] %v7999_v36  ;;  %v8569_v1 = vld [vmem:[#allocation54_spill] sm:$0xff]  ;;  %v4250_v26 = vperm.slane %v4231_v31, 2 }
 0x3f1   : > { %v3666_v4 = vpop.f32.mrf.mxu1  ;;  %v4230_v44 = vunpack.c.l.bf16 %v8569_v1  ;;  %v4253_v47 = vperm.slane %v4233_v39, 0 }
 0x3f2   : > { %v4289_v5 = vsel %vm4277_vm1, %v4250_v26, 0.0 }
 0x3f3   : > { %4056 = vmatpush.bf16.msrb.mxu2 %v8561_v16  ;;  %4186 = vmatpush.bf16.msra.mxu1 %v4148_v22  ;;  %v4247_v49 = vperm.slane %v4230_v44, 0  ;;  %v4248_v11 = vperm.slane %v4230_v44, 2  ;;  %v4278_v16 = vsel %vm4277_vm1, %v4245_v34, 0.0  ;;  %v4249_v22 = vperm.slane %v4231_v31, 0 }
 0x3f4   : > { %v4280_v17 = vadd.f32 %v4279_v63, %v4278_v16  ;;  %v4298_v41 = vsel %vm4277_vm1, %v4253_v47, 0.0  ;;  %v4204_v16 = vrot.slane %v8008_v35, 7 }
 0x3f5   : > { %v4283_v48 = vsel %vm4277_vm1, %v4247_v49, 0.0  ;;  %v4284_v0 = vsel %vm4277_vm1, %v4248_v11, 0.0  ;;  %v4288_v38 = vsel %vm4277_vm1, %v4249_v22, 0.0  ;;  %v4195_v22 = vld [vmem:[%s6286_s1] sm:$0xff] }
 0x3f6   : > { %v4285_v13 = vadd.f32 %v4284_v0, %v4283_v48  ;;  %4281 = vadd.xlane.f32.xlu1 %v4280_v17  ;;  %v4290_v28 = vadd.f32 %v4289_v5, %v4288_v38 }
 0x3f7   : > { %4057 = vmatpush.bf16.msrb.mxu2 %v8562_v9  ;;  %4187 = vmatpush.bf16.msra.mxu1 %v4147_v58  ;;  %v4069_v62 = vld [vmem:[#allocation1] sm:$0xff]  ;;  %v4070_v52 = vld [vmem:[#allocation1 + $0x9] sm:$0xff]  ;;  %v3796_v50 = vpop.f32.mrf.mxu3  ;;  %v4254_v9 = vperm.slane %v4233_v39, 2  ;;  %v4234_v58 = vunpack.c.l.bf16 %v7978_v42  ;;  %v4206_v39 = vsel %vm4205_vm2, %v4204_v16, %v7986_v21 }
 0x3f8   : > { %4177 = vmatmul.bf16.vlgmr.msrb.gmra.mxu3 %v4069_v62  ;;  %4286 = vadd.xlane.f32.xlu0 %v4285_v13  ;;  %v4236_v62 = vunpack.c.l.bf16 %v7999_v36 }
 0x3f9   : > { %v3668_v3 = vpop.f32.mrf.mxu1  ;;  %v4299_v10 = vsel %vm4277_vm1, %v4254_v9, 0.0  ;;  %v4255_v32 = vperm.slane %v4234_v58, 0  ;;  %v4256_v46 = vperm.slane %v4234_v58, 2 }
 0x3fa   : > { %v4300_v59 = vadd.f32 %v4299_v10, %v4298_v41  ;;  %v4259_v60 = vperm.slane %v4236_v62, 0 }
 0x3fb   : > { %4058 = vmatpush.bf16.msrb.mxu2 %v8563_v56  ;;  %4188 = vmatpush.bf16.msra.mxu1 %v4146_v33  ;;  %v4303_v37 = vsel %vm4277_vm1, %v4255_v32, 0.0 }
 0x3fc   : > { %4301 = vadd.xlane.f32.xlu2 %v4300_v59 }
 0x3ff   : > { %4059 = vmatpush.bf16.msrb.mxu2 %v8564_v45  ;;  %4189 = vmatpush.bf16.msra.mxu1 %v4145_v14  ;;  %v4235_v45 = vunpack.c.l.bf16 %v7989_v51  ;;  %v4260_v14 = vperm.slane %v4236_v62, 2  ;;  %v4313_v51 = vsel %vm4277_vm1, %v4259_v60, 0.0 }
 0x400   : > { %4291 = vadd.xlane.f32.xlu0 %v4290_v28 }
 0x401   : > { %v4257_v33 = vperm.slane %v4235_v45, 0  ;;  %v4314_v36 = vsel %vm4277_vm1, %v4260_v14, 0.0 }
 0x402   : > { %4190 = vmatmul.bf16.vlgmr.msra.gmra.mxu1 %v4070_v52  ;;  %v4315_v24 = vadd.f32 %v4314_v36, %v4313_v51 }
 0x403   : > { %4060 = vmatpush.bf16.msrb.mxu2 %v8565_v25  ;;  %v4258_v25 = vperm.slane %v4235_v45, 2  ;;  %v4308_v52 = vsel %vm4277_vm1, %v4257_v33, 0.0 }
 0x407   : > { %4061 = vmatpush.bf16.msrb.mxu2 %v8568_v15  ;;  %v4304_v15 = vsel %vm4277_vm1, %v4256_v46, 0.0 }
 0x408   : > { %v4305_v42 = vadd.f32 %v4304_v15, %v4303_v37 }
 0x40a   : > { %4062 = vmatmul.bf16.vlgmr.msrb.gmra.mxu2 %v3942_v29  ;;  %v4251_v29 = vperm.slane %v4232_v20, 0  ;;  %4306 = vadd.xlane.f32.xlu2 %v4305_v42 }
 0x40c   : > { %v4293_v56 = vsel %vm4277_vm1, %v4251_v29, 0.0 }
 0x40d   : > { %v4295_v2 = vadd.f32 %v4294_v30, %v4293_v56 }
 0x40f   : > { %4296 = vadd.xlane.f32.xlu1 %v4295_v2 }
 0x417   : > { %4316 = vadd.xlane.f32.xlu1 %v4315_v24 }
 0x42d   : > { %v3538_v7 = vpop.f32.mrf.mxu2 }
 0x42e   : > { %v8021_v53 = vadd.f32 %v3551_v57, %v3538_v7  ;;  %v4309_v57 = vsel %vm4277_vm1, %v4258_v25, 0.0 }
 0x430   : > { %v4207_v17 = vrot.slane %v8021_v53, 6 }
 0x435   : > { %v3540_v40 = vpop.f32.mrf.mxu2 }
 0x446   : > { %v3807_v3 = vpop.f32.mrf.mxu1 }
 0x447   : > { %v3808_v63 = vadd.f32 %v3807_v3, %v8019_v55  ;;  %v4209_v55 = vsel %vm4208_vm3, %v4207_v17, %v4206_v39 }
 0x449   : > { %v4213_v19 = vrot.slane %v3808_v63, 4 }
 0x44d   : > { %v3679_v6 = vpop.f32.mrf.mxu2 }
 0x44e   : > { %v3680_v23 = vadd.f32 %v3679_v6, %v3666_v4  ;;  %v4310_v4 = vadd.f32 %v4309_v57, %v4308_v52  ;;  %v3809_v7 = vpop.f32.mrf.mxu1 }
 0x450   : > { %4311 = vadd.xlane.f32.xlu0 %v4310_v4  ;;  %v4210_v8 = vrot.slane %v3680_v23, 5 }
 0x452   : > { %v4212_v53 = vsel %vm4211_vm4, %v4210_v8, %v4209_v55 }
 0x453   : > { %v4215_v9 = vsel %vm4214_vm5, %v4213_v19, %v4212_v53 }
 0x455   : > { %v3681_v43 = vpop.f32.mrf.mxu2 }
 0x456   : > { %v4228_v43 = vld [vmem:[#allocation2] sm:$0xff] }
 0x469   : > { %v4282_v10 = vpop.xlane.xlu1 %4281 }
 0x46b   : > { %v3935_v50 = vpop.f32.mrf.mxu3  ;;  %v4287_v41 = vpop.xlane.xlu0 %4286 }
 0x46c   : > { %v4326_v38 = vrot.slane %v4287_v41, 7 }
 0x46d   : > { %v3922_v40 = vpop.f32.mrf.mxu2  ;;  %v4050_v1 = vpop.f32.mrf.mxu1 }
 0x46e   : > { %v3936_v13 = vadd.f32 %v3935_v50, %v3922_v40  ;;  %v4327_v59 = vsel %vm4205_vm2, %v4326_v38, %v4282_v10 }
 0x46f   : > { %v4302_v5 = vpop.xlane.xlu2 %4301 }
 0x470   : > { %v4216_v20 = vrot.slane %v3936_v13, 3  ;;  %v4332_v2 = vrot.slane %v4302_v5, 4 }
 0x472   : > { %v4218_v21 = vsel %vm4217_vm6, %v4216_v20, %v4215_v9 }
 0x473   : > { %v3937_v27 = vpop.f32.mrf.mxu3  ;;  %v4292_v56 = vpop.xlane.xlu0 %4291 }
 0x474   : > { %v4328_v6 = vrot.slane %v4292_v56, 6 }
 0x475   : > { %v3924_v44 = vpop.f32.mrf.mxu2  ;;  %v4052_v54 = vpop.f32.mrf.mxu1 }
 0x476   : > { %v4329_v23 = vsel %vm4208_vm3, %v4328_v6, %v4327_v59 }
 0x47b   : > { %v4178_v49 = vpop.f32.mrf.mxu3 }
 0x47d   : > { %v4307_v45 = vpop.xlane.xlu2 %4306 }
 0x47e   : > { %v4334_v32 = vrot.slane %v4307_v45, 3 }
 0x47f   : > { %v4191_v11 = vpop.f32.mrf.mxu1 }
 0x480   : > { %v4192_v31 = vadd.f32 %v4191_v11, %v4178_v49 }
 0x482   : > { %v4222_v47 = vrot.slane %v4192_v31, 1  ;;  %v4297_v30 = vpop.xlane.xlu1 %4296 }
 0x483   : > { %v4180_v34 = vpop.f32.mrf.mxu3  ;;  %v4330_v28 = vrot.slane %v4297_v30, 5 }
 0x485   : > { %v4331_v58 = vsel %vm4211_vm4, %v4330_v28, %v4329_v23 }
 0x486   : > { %v4333_v62 = vsel %vm4214_vm5, %v4332_v2, %v4331_v58 }
 0x487   : > { %v4193_v48 = vpop.f32.mrf.mxu1  ;;  %v4335_v14 = vsel %vm4217_vm6, %v4334_v32, %v4333_v62 }
 0x48a   : > { %v4317_v33 = vpop.xlane.xlu1 %4316 }
 0x48b   : > { %v4338_v60 = vrot.slane %v4317_v33, 1 }
 0x48d   : > { %v4063_v12 = vpop.f32.mrf.mxu2 }
 0x48e   : > { %v4064_v18 = vadd.f32 %v4063_v12, %v4050_v1 }
 0x490   : > { %v4219_v35 = vrot.slane %v4064_v18, 2 }
 0x492   : > { %v4221_v26 = vsel %vm4220_vm7, %v4219_v35, %v4218_v21 }
 0x493   : > { %v4224_v29 = vsel %vm4223_vm8, %v4222_v47, %v4221_v26 }
 0x494   : > { %v4226_v61 = vadd.f32 %v4224_v29, %v4195_v22 }
 0x495   : > { %v4065_v0 = vpop.f32.mrf.mxu2 }
 0x496   : > { %4227 = vst [vmem:[%s6286_s1] sm:$0xff] %v4226_v61 }
 0x4c3   : > { %v4312_v46 = vpop.xlane.xlu0 %4311 }
 0x4c4   : > { %v4336_v25 = vrot.slane %v4312_v46, 2 }
 0x4c6   : > { %v4337_v37 = vsel %vm4220_vm7, %v4336_v25, %v4335_v14  ;;  %4347 = sbr.rel (%p5066_p6) target bundleno = 1361 (0x551), region = 97 }
 0x4c7   : > { %v4339_v15 = vsel %vm4223_vm8, %v4338_v60, %v4337_v37 }
 0x4c8   : > { %v4341_v52 = vadd.f32 %v4339_v15, %v4228_v43 }
 0x4ca   : > { %4343 = vst.msk [vmem:[#allocation2] sm:$0xff] %vm4342_vm9, %v4341_v52 }
 0x4cb   : > { %v6087_v42 = vmov 0   ;;  %v4351_v36 = vld [vmem:[%s6286_s1] sm:$0xff] }
 0x4cc   : > { %5885 = vset.pattern.permute.xlu0 %v6087_v42 }
 0x4d1   : > { %v4348_v57 = vld [vmem:[#allocation2] sm:$0xff] }
 0x4d2   : > { %v4349_v4 = vmax.f32 %v4348_v57, 1e-09 }
 0x4d4   : > { %5886 = vrcp.f32 %v4349_v4 }
 0x4da   : > { %v5887_v51 = vpop.eup %5886 }
 0x4db   : > { %4354 = vperm.xlu0 %5885, %v5887_v51  }
 0x54d   : > { %v4355_v24 = vpop.permute.xlu0 %4354 }
 0x54e   : > { %v4357_v3 = vmul.f32 %v4355_v24, %v4351_v36 }
 0x550   : > { %4358 = vst [vmem:[%s6286_s1] sm:$0xff] %v4357_v3 }
 0x551 PF: > { %s5068_s21 = sshll.u32 %s6062_s22, 3  ;;  %s4372_s11 = sshll.u32 %s6286_s1, 4  ;;  %s4373_s11 = int_to_ptr.vmem [resolvable:$true] %s4372_s11 }
 0x552   : > { %s4370_s27 = scalar_lea.hbm %s8128_s4, %s5068_s21  ;;  %s4360_s13 = scalar_lea.sflag [#allocation5], %s384_s26 }
 0x553   : > { %s4374_s5 = sshll.u32 %s4370_s27, 4  ;;  %s5968_s22 = scalar_lea.hbm %s8128_s4, 16  ;;  %s4375_s5 = int_to_ptr.hbm [resolvable:$true] %s4374_s5 }
 0x554   : > { %s5962_s30 = sshra.s32 %s4375_s5, 4  ;;  %s5963_s30 = int_to_ptr.hbm [resolvable:$true] %s5962_s30 }
 0x555   : > { %s5964_s14 = scalar_lea.hbm %s5963_s30, 8  ;;  %p5969_p0 = scmp.lt.s32.totalorder %s5963_s30, %s8128_s4 }
 0x556   : > { %p5965_p7 = scmp.ne.s32.totalorder %s5963_s30, %s5964_s14  ;;  %p5970_p1 = scmp.lt.s32.totalorder %s5968_s22, %s5964_s14 }
 0x558   : > { %p5966_p11 = pnand %p5965_p7, %p6201_p12  ;;  %p5971_p2 = por %p5970_p1, %p5969_p0 }
 0x55a   : > { %p5967_p13 = pneg %p5966_p11 }
 0x55c   : > { %p5972_p5 = pnand %p5971_p2, %p5967_p13 }
 0x55e   : > { %5975 = shalt.err (!%p5972_p5)
}
 0x55f   : > { %5250 = dma.vmem_to_hbm [thread:$0]  (%p6201_p12), %s4373_s11, 128, %s4375_s5, %s4360_s13  }
 0x560 PF: > { %p5267_p8 = scmp.ge.s32.totalorder %s6074_s25, 2  ;;  %s4386_s8 = sand.u32 1, %s6034_s15  }
 0x561   : > { %s4387_s29 = scalar_lea.sflag [#allocation5], %s4386_s8 }
 0x562   : > { %p5260_p9 = pnand %p5267_p8, %p6215_p4 }
 0x564   : > { %p5261_p10 = pneg %p5260_p9 }
 0x566   : > { %6029 = dma.done.wait (%p5261_p10), %s4387_s29, 128  }
 0x567   : > { %6031 = vsyncadd (%p5261_p10), %s4387_s29, 4294967168  ;;  %s21_s25 = sadd.s32 1, %s6074_s25   ;;  %s8574_s0 = sld [smem:[#allocation17_spill]] }
 0x568   : > { %p18_p3 = scmp.ge.s32.totalorder %s21_s25, 6   ;;  %s8575_s17 = sld [smem:[#allocation21_spill]] }
 0x569   : > { %s8576_s12 = sld [smem:[#allocation18_spill]]  ;;  %s8580_s15 = smov %s6038_s16 }
 0x56a   : > { %s8577_s20 = sld [smem:[#allocation22_spill]]  ;;  %s8582_s18 = smov %s6050_s19 }
 0x56b   : > { %s8578_s26 = sld [smem:[#allocation19_spill]]  ;;  %s8584_s21 = smov %s6066_s23 }
 0x56c   : > { %s8579_s28 = sld [smem:[#allocation20_spill]]  ;;  %s8585_s22 = smov %s6070_s24 }
 0x56d   : > { %s8581_s16 = smov %s8574_s0 }
 0x56e   :  { %20 = sbr.rel (!%p18_p3) target bundleno = 14 (0xe), region = 151 }
 0x56f   : > { %s8583_s19 = smov %s8576_s12 }
 0x571   : > { %s8586_s23 = smov %s8578_s26 }
 0x572   : > { %s8587_s24 = smov %s8579_s28 }
 0x573   :  { %4393 = vsyncpa [#allocation4], 1 }
 0x574   :  { %4395 = vsyncpa [#allocation4 + $0x1], 1 }
 0x575   :  { %4396 = vsyncpa [#allocation7], 1 }
 0x576   :  { %4397 = vsyncpa [#allocation5], 1 }
 0x577   :  { %4399 = vsyncpa [#allocation5 + $0x1], 1 }

</bundles_post_ra>
